<compile_context>
chip_gen: v5e
topology: v5e:2x2
jax: 0.10.0
libtpu: 0.0.40
codegen_flags: <defaults>
</compile_context>

<pallas_src>
import functools

import jax
import jax.numpy as jnp
from jax import lax
from jax.experimental import pallas as pl
from jax.experimental.pallas import tpu as pltpu


# ----------------------------------------------------------------------------
# Pallas kernels
# ----------------------------------------------------------------------------
def _proj_kernel(x_ref, w_ref, y_ref):
    """Y = X @ W, tiled over node rows."""
    y_ref[...] = jnp.dot(
        x_ref[...], w_ref[...], preferred_element_type=jnp.float32
    ).astype(y_ref.dtype)


def _edge_kernel(hinc_ref, y_ref, attmat_ref, invsz_ref,
                 xe_ref, alpha_ref, acc_ref, *, negative_slope):
    """Per-edge mean aggregation + attention logits.

    grid = (edge_tiles, node_k_tiles); acc_ref is an f32 accumulator for the
    K-reduction over node tiles.  At finalize: scale by 1/|e|, emit Xe (bf16)
    and leaky_relu(alpha) broadcast over each head's C lanes (f32).
    """
    k = pl.program_id(1)

    @pl.when(k == 0)
    def _init():
        acc_ref[...] = jnp.zeros_like(acc_ref)

    # int8 (0/1) incidence block -> bf16 for the MXU (exact; rides VPU slack).
    hinc = hinc_ref[...].astype(jnp.float32).astype(jnp.bfloat16)
    acc_ref[...] += jnp.dot(hinc, y_ref[...], preferred_element_type=jnp.float32)

    @pl.when(k == pl.num_programs(1) - 1)
    def _finalize():
        xe = acc_ref[...] * invsz_ref[...]          # [TM, HC] f32, mean agg
        xe_b = xe.astype(jnp.bfloat16)
        xe_ref[...] = xe_b
        # alpha[e, h*C + c] = sum_c' Xe[e,h,c'] * att_e[h,c']  (same for all c)
        a = jnp.dot(xe_b, attmat_ref[...], preferred_element_type=jnp.float32)
        alpha_ref[...] = jnp.where(a >= 0.0, a, negative_slope * a)


def _node_kernel(*refs, use_norm, skip_sum, hc):
    """Node aggregation: num/den fused dot over incident edges + epilogue.

    grid = (node_tiles, edge_k_tiles); acc is a single f32 [TN, 2*hc] VMEM
    accumulator holding num (first hc lanes) and den (last hc lanes).
    """
    if skip_sum:
        hinc_ref, pq_ref, y_ref, o_ref, acc_ref = refs
    else:
        hinc_ref, pq_ref, o_ref, acc_ref = refs
        y_ref = None

    k = pl.program_id(1)

    @pl.when(k == 0)
    def _init():
        acc_ref[...] = jnp.zeros_like(acc_ref)

    hinc = hinc_ref[...].astype(jnp.float32).astype(jnp.bfloat16)   # [TKe, TN]
    # Contract the edge axis (dim 0) of the single incidence block against the
    # precomputed [TKe, 2*hc] (p||q) block: no materialized transpose, one
    # full-width MXU dot per step.
    acc_ref[...] += lax.dot_general(
        hinc, pq_ref[...],
        dimension_numbers=(((0,), (0,)), ((), ())),
        preferred_element_type=jnp.float32)

    @pl.when(k == pl.num_programs(1) - 1)
    def _finalize():
        acc = acc_ref[...]
        num = acc[:, :hc]
        den = acc[:, hc:]
        inv_den = pl.reciprocal(den, approx=True)                   # EUP slot
        xv = jnp.where(den > 0.0, num * inv_den, 0.0)               # isolated -> 0
        if use_norm:                                                # normalize_l2
            rn2 = jnp.sum(xv * xv, axis=-1, keepdims=True)
            xv = xv * jnp.where(rn2 > 0.0, lax.rsqrt(rn2), 0.0)
        if skip_sum:
            xv = xv + y_ref[...].astype(jnp.float32)
        o_ref[...] = xv.astype(o_ref.dtype)


# ----------------------------------------------------------------------------
# Operator construction (plain-JAX glue)
# ----------------------------------------------------------------------------
def build_incidence(vertex, edges, n_nodes, n_edges, first_aggregate="mean"):
    """Densify (vertex, edges) index lists into Hbin [M, N] and 1/|e| [M, 1]."""
    hbin = jnp.zeros((n_edges, n_nodes), jnp.float32).at[edges, vertex].set(1.0)
    size = jnp.sum(hbin, axis=1, keepdims=True)
    if first_aggregate == "mean":
        inv = 1.0 / jnp.maximum(size, 1.0)
    elif first_aggregate == "sum":
        inv = jnp.ones_like(size)
    else:
        raise ValueError(f"unsupported first_aggregate: {first_aggregate}")
    return hbin, inv


def _att_projection_matrix(att_e):
    """Block-diagonal [HC, HC] matrix M with (Xe @ M)[e, h*C+c] = <Xe[e,h,:], att_e[h,:]>."""
    heads, c = att_e.shape
    hc = heads * c
    block_mask = jnp.kron(jnp.eye(heads, dtype=jnp.float32),
                          jnp.ones((c, c), jnp.float32))       # [HC, HC]
    return att_e.reshape(hc, 1).astype(jnp.float32) * block_mask


def _round_up(x, m):
    return -(-x // m) * m


def _pick_tile(dim, desired):
    """Largest 128-multiple tile <= desired that does not exceed the padded dim."""
    return min(desired, _round_up(dim, 128))


# ----------------------------------------------------------------------------
# Wrapper: UniGATConv forward (eval mode)
# ----------------------------------------------------------------------------
def unigat_conv(X, W, att_e, hbin, inv_size, *,
                negative_slope=0.2, use_norm=False, skip_sum=False,
                tile_n=512, tile_m=512):
    n_nodes, f_in = X.shape
    n_edges = hbin.shape[0]
    heads, c_out = att_e.shape
    hc = heads * c_out
    assert W.shape == (f_in, hc)
    assert hc % 128 == 0, "pad heads*out_channels to a multiple of 128"
    bf = jnp.bfloat16

    # Tile sizes: big (default 512) but clamped to the 128-aligned problem size.
    tile_n = _pick_tile(n_nodes, tile_n)
    tile_m = _pick_tile(n_edges, tile_m)
    assert tile_n % 128 == 0 and tile_m % 128 == 0

    # Pad node / edge row counts to tile multiples (zero rows are inert).
    n_pad = -n_nodes % tile_n
    m_pad = -n_edges % tile_m
    np_, mp_ = n_nodes + n_pad, n_edges + m_pad

    x_b = jnp.pad(X, ((0, n_pad), (0, 0))).astype(bf)
    w_b = W.astype(bf)
    # Incidence stored as int8 in HBM (binary -> exact); cast to bf16 in-kernel.
    h_i8 = jnp.pad(hbin, ((0, m_pad), (0, n_pad))).astype(jnp.int8)
    inv_p = jnp.pad(inv_size, ((0, m_pad), (0, 0))).astype(jnp.float32)
    att_mat = _att_projection_matrix(att_e).astype(bf)

    n_tiles = np_ // tile_n
    m_tiles = mp_ // tile_m

    # ---- stage 1: Y = X @ W ------------------------------------------------
    y = pl.pallas_call(
        _proj_kernel,
        out_shape=jax.ShapeDtypeStruct((np_, hc), bf),
        grid_spec=pltpu.PrefetchScalarGridSpec(
            num_scalar_prefetch=0,
            grid=(n_tiles,),
            in_specs=[pl.BlockSpec((tile_n, f_in), lambda i: (i, 0)),
                      pl.BlockSpec((f_in, hc), lambda i: (0, 0))],
            out_specs=pl.BlockSpec((tile_n, hc), lambda i: (i, 0))),
        compiler_params=pltpu.CompilerParams(
            dimension_semantics=("parallel",)),
    )(x_b, w_b)

    # ---- stage 2: per-edge aggregation + attention logits --------------------
    xe, alpha = pl.pallas_call(
        functools.partial(_edge_kernel, negative_slope=negative_slope),
        out_shape=(jax.ShapeDtypeStruct((mp_, hc), bf),
                   jax.ShapeDtypeStruct((mp_, hc), jnp.float32)),
        grid_spec=pltpu.PrefetchScalarGridSpec(
            num_scalar_prefetch=0,
            grid=(m_tiles, n_tiles),
            in_specs=[pl.BlockSpec((tile_m, tile_n), lambda e, k: (e, k)),
                      pl.BlockSpec((tile_n, hc), lambda e, k: (k, 0)),
                      pl.BlockSpec((hc, hc), lambda e, k: (0, 0)),
                      pl.BlockSpec((tile_m, 1), lambda e, k: (e, 0))],
            out_specs=(pl.BlockSpec((tile_m, hc), lambda e, k: (e, 0)),
                       pl.BlockSpec((tile_m, hc), lambda e, k: (e, 0))),
            scratch_shapes=[pltpu.VMEM((tile_m, hc), jnp.float32)]),
        compiler_params=pltpu.CompilerParams(
            dimension_semantics=("parallel", "arbitrary")),
    )(h_i8, y, att_mat, inv_p)

    # ---- glue: global per-head shift + precompute p/q ONCE -------------------
    # The logit depends only on the edge, so a single per-head shift is exact.
    # Padded edge rows are masked to -inf so they neither bias the shift nor
    # inject non-zero softmax mass.  Precomputing p/q here moves the exp / VPU
    # work and 2 B/elem of traffic out of stage 3's hot loop.
    # TODO(synk): emit a per-edge-tile max from stage 2's finalize to avoid the
    # extra full read of alpha here.
    valid = (jnp.arange(mp_, dtype=jnp.int32) < n_edges)[:, None]
    alpha_m = jnp.where(valid, alpha, -jnp.inf)
    shift = jnp.max(alpha_m, axis=0, keepdims=True)              # [1, hc]
    expv = jnp.exp(alpha_m - shift)                              # padded rows -> 0
    pq = jnp.concatenate(
        [(expv * xe.astype(jnp.float32)).astype(bf),             # p
         expv.astype(bf)],                                       # q
        axis=-1)                                                 # [mp_, 2*hc] bf16

    # ---- stage 3: fused num/den aggregation + epilogue ------------------------
    in_arrays = [h_i8, pq]
    in_specs = [pl.BlockSpec((tile_m, tile_n), lambda i, k: (k, i)),
                pl.BlockSpec((tile_m, 2 * hc), lambda i, k: (k, 0))]
    if skip_sum:
        in_arrays.append(y)
        in_specs.append(pl.BlockSpec((tile_n, hc), lambda i, k: (i, 0)))

    out = pl.pallas_call(
        functools.partial(_node_kernel, use_norm=use_norm,
                          skip_sum=skip_sum, hc=hc),
        out_shape=jax.ShapeDtypeStruct((np_, hc), jnp.float32),
        grid_spec=pltpu.PrefetchScalarGridSpec(
            num_scalar_prefetch=0,
            grid=(n_tiles, m_tiles),
            in_specs=in_specs,
            out_specs=pl.BlockSpec((tile_n, hc), lambda i, k: (i, 0)),
            scratch_shapes=[pltpu.VMEM((tile_n, 2 * hc), jnp.float32)]),
        compiler_params=pltpu.CompilerParams(
            dimension_semantics=("parallel", "arbitrary")),
    )(*in_arrays)

    return out[:n_nodes]


# ----------------------------------------------------------------------------
# References for correctness checking
# ----------------------------------------------------------------------------
def unigat_conv_dense_ref(X, W, att_e, hbin, inv_size, *,
                          negative_slope, use_norm, skip_sum):
    """Dense jnp reference mirroring the kernel's bf16 casts."""
    bf = jnp.bfloat16
    h_b = hbin.astype(bf)
    y = jnp.dot(X.astype(bf), W.astype(bf), preferred_element_type=jnp.float32)
    y_b = y.astype(bf)
    xe = jnp.dot(h_b, y_b, preferred_element_type=jnp.float32) * inv_size
    xe_b = xe.astype(bf)
    att_mat = _att_projection_matrix(att_e).astype(bf)
    a = jnp.dot(xe_b, att_mat, preferred_element_type=jnp.float32)
    alpha = jnp.where(a >= 0.0, a, negative_slope * a)
    shift = jnp.max(alpha, axis=0, keepdims=True)
    expv = jnp.exp(alpha - shift)
    p = (expv * xe_b.astype(jnp.float32)).astype(bf)
    q = expv.astype(bf)
    num = jnp.dot(h_b.T, p, preferred_element_type=jnp.float32)
    den = jnp.dot(h_b.T, q, preferred_element_type=jnp.float32)
    xv = jnp.where(den > 0.0, num / den, 0.0)
    if use_norm:
        rn = jnp.sqrt(jnp.sum(xv * xv, axis=-1, keepdims=True))
        xv = xv * jnp.where(rn > 0.0, 1.0 / rn, 0.0)
    if skip_sum:
        xv = xv + y_b.astype(jnp.float32)
    return xv


def unigat_conv_spec_ref(X, W, att_e, vertex, edges, n_edges, *,
                         first_aggregate, negative_slope, use_norm, skip_sum):
    """f32 gather/scatter reference following the PyTorch code literally."""
    n = X.shape[0]
    heads, c = att_e.shape
    x0 = X @ W                                        # [N, HC]
    xh = x0.reshape(n, heads, c)
    xve = xh[vertex]                                  # [nnz, H, C]
    seg = jax.ops.segment_sum(xve, edges, num_segments=n_edges)
    if first_aggregate == "mean":
        cnt = jax.ops.segment_sum(jnp.ones((vertex.shape[0],), jnp.float32),
                                  edges, num_segments=n_edges)
        xe = seg / jnp.maximum(cnt, 1.0)[:, None, None]
    else:
        xe = seg
    alpha_e = jnp.sum(xe * att_e[None], axis=-1)      # [M, H]
    a_ev = alpha_e[edges]                             # [nnz, H]
    a = jnp.where(a_ev >= 0.0, a_ev, negative_slope * a_ev)
    amax = jax.ops.segment_max(a, vertex, num_segments=n)
    ea = jnp.exp(a - amax[vertex])
    denom = jax.ops.segment_sum(ea, vertex, num_segments=n)
    attn = ea / denom[vertex]
    xev = xe[edges] * attn[:, :, None]
    xv = jax.ops.segment_sum(xev, vertex, num_segments=n)
    out = xv.reshape(n, heads * c)
    if use_norm:
        rn = jnp.linalg.norm(out, axis=1, keepdims=True)
        out = out * jnp.where(rn > 0.0, 1.0 / rn, 0.0)
    if skip_sum:
        out = out + x0
    return out


# ----------------------------------------------------------------------------
if __name__ == "__main__":
    # Small deterministic config (lane-aligned: heads*out_channels = 128).
    N_NODES, M_EDGES, EDGE_SIZE = 256, 256, 8
    IN_CH, HEADS, OUT_CH = 64, 8, 16
    HC = HEADS * OUT_CH
    NEG_SLOPE = 0.2
    FIRST_AGGREGATE = "mean"
    USE_NORM = True
    SKIP_SUM = True

    key = jax.random.PRNGKey(0)
    kx, kw, ka = jax.random.split(key, 3)

    def glorot(k, shape):
        stdv = (6.0 / (shape[-2] + shape[-1])) ** 0.5
        return jax.random.uniform(k, shape, jnp.float32, -stdv, stdv)

    X = jax.random.normal(kx, (N_NODES, IN_CH), jnp.float32)
    W = glorot(kw, (IN_CH, HC))          # nn.Linear(in_ch, heads*out_ch).weight.T
    att_e = glorot(ka, (HEADS, OUT_CH))  # self.att_e (att_v is unused in forward)

    # Deterministic hypergraph: edge e = {(EDGE_SIZE*e + j) % N : j}.
    V_list, E_list = [], []
    for e in range(M_EDGES):
        for j in range(EDGE_SIZE):
            V_list.append((EDGE_SIZE * e + j) % N_NODES)
            E_list.append(e)
    V = jnp.array(V_list, jnp.int32)
    E = jnp.array(E_list, jnp.int32)

    Hbin, inv_size = build_incidence(V, E, N_NODES, M_EDGES, FIRST_AGGREGATE)

    run = jax.jit(functools.partial(
        unigat_conv, negative_slope=NEG_SLOPE,
        use_norm=USE_NORM, skip_sum=SKIP_SUM))
    out = jax.block_until_ready(run(X, W, att_e, Hbin, inv_size))
    assert out.shape == (N_NODES, HC)

    ref_mirror = unigat_conv_dense_ref(
        X, W, att_e, Hbin, inv_size,
        negative_slope=NEG_SLOPE, use_norm=USE_NORM, skip_sum=SKIP_SUM)
    assert jnp.allclose(out, ref_mirror, atol=1e-2, rtol=1e-2), \
        "mismatch vs bf16-mirrored dense reference"

    ref_spec = unigat_conv_spec_ref(
        X, W, att_e, V, E, M_EDGES, first_aggregate=FIRST_AGGREGATE,
        negative_slope=NEG_SLOPE, use_norm=USE_NORM, skip_sum=SKIP_SUM)
    assert jnp.allclose(out, ref_spec, atol=5e-2, rtol=5e-2), \
        "mismatch vs f32 gather/scatter spec reference"

    print("KERNEL_OK")
</pallas_src>

<mosaic_0001>
module attributes {stable_mosaic.version = 11 : i64} {
  func.func @_proj_kernel(%arg0: i32, %arg1: memref<256x64xbf16, #tpu.memory_space<vmem>>, %arg2: memref<64x128xbf16, #tpu.memory_space<vmem>>, %arg3: memref<256x128xbf16, #tpu.memory_space<vmem>>) attributes {dimension_semantics = [#tpu.dimension_semantics<parallel>], iteration_bounds = array<i64: 1>, scalar_prefetch = 0 : i64, scratch_operands = 0 : i64, tpu.core_type = #tpu.core_type<tc>, window_params = [{transform_indices = @transform_0, window_bounds = array<i64: 256, 64>}, {pipeline_mode = #tpu.pipeline_mode<synchronous>, transform_indices = @transform_1, window_bounds = array<i64: 64, 128>}, {transform_indices = @transform_2, window_bounds = array<i64: 256, 128>}]} {
    %c0 = arith.constant 0 : index
    %c0_0 = arith.constant 0 : index
    %0 = vector.load %arg1[%c0, %c0_0] : memref<256x64xbf16, #tpu.memory_space<vmem>>, vector<256x64xbf16>
    %c0_1 = arith.constant 0 : index
    %c0_2 = arith.constant 0 : index
    %1 = vector.load %arg2[%c0_1, %c0_2] : memref<64x128xbf16, #tpu.memory_space<vmem>>, vector<64x128xbf16>
    %cst = arith.constant dense<0.000000e+00> : vector<256x128xf32>
    %2 = tpu.matmul %0, %1, %cst {dimension_numbers = #tpu.dot_dimension_numbers<[1], [0], [0], [1], [0, 0, 1, 1], [], []>} : vector<256x64xbf16>, vector<64x128xbf16>, vector<256x128xf32> -> vector<256x128xf32>
    %3 = arith.truncf %2 : vector<256x128xf32> to vector<256x128xbf16>
    %c0_3 = arith.constant 0 : index
    %c0_4 = arith.constant 0 : index
    %4 = vector.load %arg3[%c0_3, %c0_4] : memref<256x128xbf16, #tpu.memory_space<vmem>>, vector<256x128xbf16>
    tpu.vector_store %arg3[%c0_3, %c0_4], %3 {strides = array<i32>} : memref<256x128xbf16, #tpu.memory_space<vmem>>, vector<256x128xbf16>,
    return
  }
  func.func @transform_0(%arg0: i32) -> (i32, i32) {
    %c0_i32 = arith.constant 0 : i32
    %c0_i32_0 = arith.constant 0 : i32
    return %arg0, %c0_i32 : i32, i32
  }
  func.func @transform_1(%arg0: i32) -> (i32, i32) {
    %c0_i32 = arith.constant 0 : i32
    %c0_i32_0 = arith.constant 0 : i32
    %c0_i32_1 = arith.constant 0 : i32
    return %c0_i32, %c0_i32_0 : i32, i32
  }
  func.func @transform_2(%arg0: i32) -> (i32, i32) {
    %c0_i32 = arith.constant 0 : i32
    %c0_i32_0 = arith.constant 0 : i32
    return %arg0, %c0_i32 : i32, i32
  }
}

module attributes {stable_mosaic.version = 11 : i64} {
  func.func @_edge_kernel(%arg0: i32, %arg1: i32, %arg2: memref<256x256xi8, #tpu.memory_space<vmem>>, %arg3: memref<256x128xbf16, #tpu.memory_space<vmem>>, %arg4: memref<128x128xbf16, #tpu.memory_space<vmem>>, %arg5: memref<256x1xf32, #tpu.memory_space<vmem>>, %arg6: memref<256x128xbf16, #tpu.memory_space<vmem>>, %arg7: memref<256x128xf32, #tpu.memory_space<vmem>>, %arg8: memref<256x128xf32, #tpu.memory_space<vmem>>) attributes {dimension_semantics = [#tpu.dimension_semantics<parallel>, #tpu.dimension_semantics<arbitrary>], iteration_bounds = array<i64: 1, 1>, scalar_prefetch = 0 : i64, scratch_operands = 1 : i64, tpu.core_type = #tpu.core_type<tc>, window_params = [{transform_indices = @transform_0, window_bounds = array<i64: 256, 256>}, {transform_indices = @transform_1, window_bounds = array<i64: 256, 128>}, {pipeline_mode = #tpu.pipeline_mode<synchronous>, transform_indices = @transform_2, window_bounds = array<i64: 128, 128>}, {transform_indices = @transform_3, window_bounds = array<i64: 256, 1>}, {transform_indices = @transform_4, window_bounds = array<i64: 256, 128>}, {transform_indices = @transform_5, window_bounds = array<i64: 256, 128>}]} {
    %c0_i32 = arith.constant 0 : i32
    %0 = arith.cmpi eq, %arg1, %c0_i32 : i32
    %1 = arith.extui %0 : i1 to i32
    %c0_i32_0 = arith.constant 0 : i32
    %2 = arith.cmpi ne, %1, %c0_i32_0 : i32
    scf.if %2 {
      %cst_10 = arith.constant 0.000000e+00 : f32
      %14 = vector.broadcast %cst_10 : f32 to vector<256x128xf32>
      %c0_11 = arith.constant 0 : index
      %c0_12 = arith.constant 0 : index
      %15 = vector.load %arg8[%c0_11, %c0_12] : memref<256x128xf32, #tpu.memory_space<vmem>>, vector<256x128xf32>
      tpu.vector_store %arg8[%c0_11, %c0_12], %14 {strides = array<i32>} : memref<256x128xf32, #tpu.memory_space<vmem>>, vector<256x128xf32>,
    } else {
    }
    %c0 = arith.constant 0 : index
    %c0_1 = arith.constant 0 : index
    %3 = vector.load %arg2[%c0, %c0_1] : memref<256x256xi8, #tpu.memory_space<vmem>>, vector<256x256xi8>
    %4 = arith.sitofp %3 : vector<256x256xi8> to vector<256x256xf32>
    %5 = arith.truncf %4 : vector<256x256xf32> to vector<256x256xbf16>
    %c0_2 = arith.constant 0 : index
    %c0_3 = arith.constant 0 : index
    %6 = vector.load %arg8[%c0_2, %c0_3] : memref<256x128xf32, #tpu.memory_space<vmem>>, vector<256x128xf32>
    %c0_4 = arith.constant 0 : index
    %c0_5 = arith.constant 0 : index
    %7 = vector.load %arg3[%c0_4, %c0_5] : memref<256x128xbf16, #tpu.memory_space<vmem>>, vector<256x128xbf16>
    %cst = arith.constant dense<0.000000e+00> : vector<256x128xf32>
    %8 = tpu.matmul %5, %7, %cst {dimension_numbers = #tpu.dot_dimension_numbers<[1], [0], [0], [1], [0, 0, 1, 1], [], []>} : vector<256x256xbf16>, vector<256x128xbf16>, vector<256x128xf32> -> vector<256x128xf32>
    %9 = arith.addf %6, %8 : vector<256x128xf32>
    %c0_6 = arith.constant 0 : index
    %c0_7 = arith.constant 0 : index
    %10 = vector.load %arg8[%c0_6, %c0_7] : memref<256x128xf32, #tpu.memory_space<vmem>>, vector<256x128xf32>
    tpu.vector_store %arg8[%c0_6, %c0_7], %9 {strides = array<i32>} : memref<256x128xf32, #tpu.memory_space<vmem>>, vector<256x128xf32>,
    %c0_i32_8 = arith.constant 0 : i32
    %11 = arith.cmpi eq, %arg1, %c0_i32_8 : i32
    %12 = arith.extui %11 : i1 to i32
    %c0_i32_9 = arith.constant 0 : i32
    %13 = arith.cmpi ne, %12, %c0_i32_9 : i32
    scf.if %13 {
      %c0_10 = arith.constant 0 : index
      %c0_11 = arith.constant 0 : index
      %14 = vector.load %arg8[%c0_10, %c0_11] : memref<256x128xf32, #tpu.memory_space<vmem>>, vector<256x128xf32>
      %c0_12 = arith.constant 0 : index
      %c0_13 = arith.constant 0 : index
      %15 = vector.load %arg5[%c0_12, %c0_13] : memref<256x1xf32, #tpu.memory_space<vmem>>, vector<256x1xf32>
      %16 = vector.broadcast %15 : vector<256x1xf32> to vector<256x128xf32>
      %17 = arith.mulf %14, %16 : vector<256x128xf32>
      %18 = arith.truncf %17 : vector<256x128xf32> to vector<256x128xbf16>
      %c0_14 = arith.constant 0 : index
      %c0_15 = arith.constant 0 : index
      %19 = vector.load %arg6[%c0_14, %c0_15] : memref<256x128xbf16, #tpu.memory_space<vmem>>, vector<256x128xbf16>
      tpu.vector_store %arg6[%c0_14, %c0_15], %18 {strides = array<i32>} : memref<256x128xbf16, #tpu.memory_space<vmem>>, vector<256x128xbf16>,
      %c0_16 = arith.constant 0 : index
      %c0_17 = arith.constant 0 : index
      %20 = vector.load %arg4[%c0_16, %c0_17] : memref<128x128xbf16, #tpu.memory_space<vmem>>, vector<128x128xbf16>
      %cst_18 = arith.constant dense<0.000000e+00> : vector<256x128xf32>
      %21 = tpu.matmul %18, %20, %cst_18 {dimension_numbers = #tpu.dot_dimension_numbers<[1], [0], [0], [1], [0, 0, 1, 1], [], []>} : vector<256x128xbf16>, vector<128x128xbf16>, vector<256x128xf32> -> vector<256x128xf32>
      %cst_19 = arith.constant 0.000000e+00 : f32
      %22 = vector.broadcast %cst_19 : f32 to vector<256x128xf32>
      %23 = arith.cmpf oge, %21, %22 : vector<256x128xf32>
      %cst_20 = arith.constant 2.000000e-01 : f32
      %24 = vector.broadcast %cst_20 : f32 to vector<256x128xf32>
      %25 = arith.mulf %24, %21 : vector<256x128xf32>
      %26 = arith.select %23, %21, %25 : vector<256x128xi1>, vector<256x128xf32>
      %c0_21 = arith.constant 0 : index
      %c0_22 = arith.constant 0 : index
      %27 = vector.load %arg7[%c0_21, %c0_22] : memref<256x128xf32, #tpu.memory_space<vmem>>, vector<256x128xf32>
      tpu.vector_store %arg7[%c0_21, %c0_22], %26 {strides = array<i32>} : memref<256x128xf32, #tpu.memory_space<vmem>>, vector<256x128xf32>,
    } else {
    }
    return
  }
  func.func @transform_0(%arg0: i32, %arg1: i32) -> (i32, i32) {
    %c0_i32 = arith.constant 0 : i32
    return %arg0, %arg1 : i32, i32
  }
  func.func @transform_1(%arg0: i32, %arg1: i32) -> (i32, i32) {
    %c0_i32 = arith.constant 0 : i32
    %c0_i32_0 = arith.constant 0 : i32
    return %arg1, %c0_i32 : i32, i32
  }
  func.func @transform_2(%arg0: i32, %arg1: i32) -> (i32, i32) {
    %c0_i32 = arith.constant 0 : i32
    %c0_i32_0 = arith.constant 0 : i32
    %c0_i32_1 = arith.constant 0 : i32
    return %c0_i32, %c0_i32_0 : i32, i32
  }
  func.func @transform_3(%arg0: i32, %arg1: i32) -> (i32, i32) {
    %c0_i32 = arith.constant 0 : i32
    %c0_i32_0 = arith.constant 0 : i32
    return %arg0, %c0_i32 : i32, i32
  }
  func.func @transform_4(%arg0: i32, %arg1: i32) -> (i32, i32) {
    %c0_i32 = arith.constant 0 : i32
    %c0_i32_0 = arith.constant 0 : i32
    return %arg0, %c0_i32 : i32, i32
  }
  func.func @transform_5(%arg0: i32, %arg1: i32) -> (i32, i32) {
    %c0_i32 = arith.constant 0 : i32
    %c0_i32_0 = arith.constant 0 : i32
    return %arg0, %c0_i32 : i32, i32
  }
}

module attributes {stable_mosaic.version = 11 : i64} {
  func.func @_node_kernel(%arg0: i32, %arg1: i32, %arg2: memref<256x256xi8, #tpu.memory_space<vmem>>, %arg3: memref<256x256xbf16, #tpu.memory_space<vmem>>, %arg4: memref<256x128xbf16, #tpu.memory_space<vmem>>, %arg5: memref<256x128xf32, #tpu.memory_space<vmem>>, %arg6: memref<256x256xf32, #tpu.memory_space<vmem>>) attributes {dimension_semantics = [#tpu.dimension_semantics<parallel>, #tpu.dimension_semantics<arbitrary>], iteration_bounds = array<i64: 1, 1>, scalar_prefetch = 0 : i64, scratch_operands = 1 : i64, tpu.core_type = #tpu.core_type<tc>, window_params = [{transform_indices = @transform_0, window_bounds = array<i64: 256, 256>}, {transform_indices = @transform_1, window_bounds = array<i64: 256, 256>}, {transform_indices = @transform_2, window_bounds = array<i64: 256, 128>}, {transform_indices = @transform_3, window_bounds = array<i64: 256, 128>}]} {
    %c0_i32 = arith.constant 0 : i32
    %0 = arith.cmpi eq, %arg1, %c0_i32 : i32
    %1 = arith.extui %0 : i1 to i32
    %c0_i32_0 = arith.constant 0 : i32
    %2 = arith.cmpi ne, %1, %c0_i32_0 : i32
    scf.if %2 {
      %cst_10 = arith.constant 0.000000e+00 : f32
      %14 = vector.broadcast %cst_10 : f32 to vector<256x256xf32>
      %c0_11 = arith.constant 0 : index
      %c0_12 = arith.constant 0 : index
      %15 = vector.load %arg6[%c0_11, %c0_12] : memref<256x256xf32, #tpu.memory_space<vmem>>, vector<256x256xf32>
      tpu.vector_store %arg6[%c0_11, %c0_12], %14 {strides = array<i32>} : memref<256x256xf32, #tpu.memory_space<vmem>>, vector<256x256xf32>,
    } else {
    }
    %c0 = arith.constant 0 : index
    %c0_1 = arith.constant 0 : index
    %3 = vector.load %arg2[%c0, %c0_1] : memref<256x256xi8, #tpu.memory_space<vmem>>, vector<256x256xi8>
    %4 = arith.sitofp %3 : vector<256x256xi8> to vector<256x256xf32>
    %5 = arith.truncf %4 : vector<256x256xf32> to vector<256x256xbf16>
    %c0_2 = arith.constant 0 : index
    %c0_3 = arith.constant 0 : index
    %6 = vector.load %arg6[%c0_2, %c0_3] : memref<256x256xf32, #tpu.memory_space<vmem>>, vector<256x256xf32>
    %c0_4 = arith.constant 0 : index
    %c0_5 = arith.constant 0 : index
    %7 = vector.load %arg3[%c0_4, %c0_5] : memref<256x256xbf16, #tpu.memory_space<vmem>>, vector<256x256xbf16>
    %cst = arith.constant dense<0.000000e+00> : vector<256x256xf32>
    %8 = tpu.matmul %5, %7, %cst {dimension_numbers = #tpu.dot_dimension_numbers<[0], [0], [1], [1], [0, 1, 1, 1], [], []>} : vector<256x256xbf16>, vector<256x256xbf16>, vector<256x256xf32> -> vector<256x256xf32>
    %9 = arith.addf %6, %8 : vector<256x256xf32>
    %c0_6 = arith.constant 0 : index
    %c0_7 = arith.constant 0 : index
    %10 = vector.load %arg6[%c0_6, %c0_7] : memref<256x256xf32, #tpu.memory_space<vmem>>, vector<256x256xf32>
    tpu.vector_store %arg6[%c0_6, %c0_7], %9 {strides = array<i32>} : memref<256x256xf32, #tpu.memory_space<vmem>>, vector<256x256xf32>,
    %c0_i32_8 = arith.constant 0 : i32
    %11 = arith.cmpi eq, %arg1, %c0_i32_8 : i32
    %12 = arith.extui %11 : i1 to i32
    %c0_i32_9 = arith.constant 0 : i32
    %13 = arith.cmpi ne, %12, %c0_i32_9 : i32
    scf.if %13 {
      %c0_10 = arith.constant 0 : index
      %c0_11 = arith.constant 0 : index
      %14 = vector.load %arg6[%c0_10, %c0_11] : memref<256x256xf32, #tpu.memory_space<vmem>>, vector<256x256xf32>
      %15 = vector.extract_strided_slice %14 {offsets = [0, 0], sizes = [256, 128], strides = [1, 1]} : vector<256x256xf32> to vector<256x128xf32>
      %16 = vector.extract_strided_slice %14 {offsets = [0, 128], sizes = [256, 128], strides = [1, 1]} : vector<256x256xf32> to vector<256x128xf32>
      %17 = tpu.reciprocal %16 {approx = true} : vector<256x128xf32> -> vector<256x128xf32>
      %cst_12 = arith.constant 0.000000e+00 : f32
      %18 = vector.broadcast %cst_12 : f32 to vector<256x128xf32>
      %19 = arith.cmpf ogt, %16, %18 : vector<256x128xf32>
      %20 = arith.mulf %15, %17 : vector<256x128xf32>
      %cst_13 = arith.constant 0.000000e+00 : f32
      %21 = vector.broadcast %cst_13 : f32 to vector<256x128xf32>
      %22 = arith.select %19, %20, %21 : vector<256x128xi1>, vector<256x128xf32>
      %23 = arith.mulf %22, %22 : vector<256x128xf32>
      %cst_14 = arith.constant dense<0.000000e+00> : vector<256xf32>
      %24 = vector.multi_reduction <add>, %23, %cst_14 [1] : vector<256x128xf32> to vector<256xf32>
      %25 = vector.shape_cast %24 : vector<256xf32> to vector<256x1xf32>
      %cst_15 = arith.constant 0.000000e+00 : f32
      %26 = vector.broadcast %cst_15 : f32 to vector<256x1xf32>
      %27 = arith.cmpf ogt, %25, %26 : vector<256x1xf32>
      %28 = math.rsqrt %25 : vector<256x1xf32>
      %cst_16 = arith.constant 0.000000e+00 : f32
      %29 = vector.broadcast %cst_16 : f32 to vector<256x1xf32>
      %30 = arith.select %27, %28, %29 : vector<256x1xi1>, vector<256x1xf32>
      %31 = vector.broadcast %30 : vector<256x1xf32> to vector<256x128xf32>
      %32 = arith.mulf %22, %31 : vector<256x128xf32>
      %c0_17 = arith.constant 0 : index
      %c0_18 = arith.constant 0 : index
      %33 = vector.load %arg4[%c0_17, %c0_18] : memref<256x128xbf16, #tpu.memory_space<vmem>>, vector<256x128xbf16>
      %34 = arith.extf %33 : vector<256x128xbf16> to vector<256x128xf32>
      %35 = arith.addf %32, %34 : vector<256x128xf32>
      %c0_19 = arith.constant 0 : index
      %c0_20 = arith.constant 0 : index
      %36 = vector.load %arg5[%c0_19, %c0_20] : memref<256x128xf32, #tpu.memory_space<vmem>>, vector<256x128xf32>
      tpu.vector_store %arg5[%c0_19, %c0_20], %35 {strides = array<i32>} : memref<256x128xf32, #tpu.memory_space<vmem>>, vector<256x128xf32>,
    } else {
    }
    return
  }
  func.func @transform_0(%arg0: i32, %arg1: i32) -> (i32, i32) {
    %c0_i32 = arith.constant 0 : i32
    return %arg1, %arg0 : i32, i32
  }
  func.func @transform_1(%arg0: i32, %arg1: i32) -> (i32, i32) {
    %c0_i32 = arith.constant 0 : i32
    %c0_i32_0 = arith.constant 0 : i32
    return %arg1, %c0_i32 : i32, i32
  }
  func.func @transform_2(%arg0: i32, %arg1: i32) -> (i32, i32) {
    %c0_i32 = arith.constant 0 : i32
    %c0_i32_0 = arith.constant 0 : i32
    return %arg0, %c0_i32 : i32, i32
  }
  func.func @transform_3(%arg0: i32, %arg1: i32) -> (i32, i32) {
    %c0_i32 = arith.constant 0 : i32
    %c0_i32_0 = arith.constant 0 : i32
    return %arg0, %c0_i32 : i32, i32
  }
}

</mosaic_0001>

<bundles_post_ra>
// kernel: mul.20
= control target key start
LH: loop header
LB: loop body
LE: loop exit
PB: predicated region body
PF: predicated region fallthrough
CT: control target
= control target key end

     0   :  { %s67_s10 = smov 112   ;;  %s68_s11 = smov 80   ;;  %vm3_vm0 = vcmask 130048   ;;  %vm9_vm1 = vcmask 1048448   ;;  %vm15_vm2 = vcmask 917248   ;;  %vm21_vm3 = vcmask 786048   ;;  %s111_s0 = inlined_call_operand.vmem [shape: f32[8,16], index: 0, kind: input, shape index: {}]   ;;  %s112_s1 = inlined_call_operand.vmem [shape: f32[128], index: 1, kind: output, shape index: {}]  }
   0x1   :  { %v53_v0 = vld [vmem:[%s111_s0 + $0x7] sm:$0x1]   ;;  %v55_v1 = vld [vmem:[%s111_s0 + $0x5] sm:$0x1]   ;;  %v57_v2 = vld [vmem:[%s111_s0 + $0x3] sm:$0x1]  }
   0x2   :  { %7 = vrot.lane.b32.xlu0 %v53_v0, %s67_s10  ;;  %19 = vrot.lane.b32.xlu1 %v55_v1, %s68_s11  ;;  %s69_s14 = smov 48   ;;  %v54_v3 = vld [vmem:[%s111_s0 + $0x6] sm:$0x1]   ;;  %v56_v4 = vld [vmem:[%s111_s0 + $0x4] sm:$0x1]   ;;  %s70_s21 = smov 96  }
   0x3   :  { %31 = vrot.lane.b32.xlu2 %v57_v2, %s69_s14  ;;  %v58_v5 = vld [vmem:[%s111_s0 + $0x2] sm:$0x1]   ;;  %s71_s22 = smov 64   ;;  %s72_s23 = smov 32   ;;  %v59_v6 = vld [vmem:[%s111_s0 + $0x1] sm:$0x1]  }
   0x4   :  { %s73_s26 = smov 16   ;;  %v2_v7 = vld [vmem:[%s111_s0] sm:$0x1]   ;;  %vm27_vm4 = vcmask 654848   ;;  %vm33_vm5 = vcmask 523648   ;;  %vm39_vm6 = vcmask 392448  }
   0x5   :  { %4 = vst.msk [vmem:[#allocation0] sm:$0x1] %vm3_vm0, %v2_v7   ;;  %vm45_vm7 = vcmask 261248  }
   0xa   :  { %13 = vrot.lane.b32.xlu0 %v54_v3, %s70_s21  ;;  %25 = vrot.lane.b32.xlu1 %v56_v4, %s71_s22 }
   0xb   :  { %37 = vrot.lane.b32.xlu2 %v58_v5, %s72_s23 }
  0x12   :  { %43 = vrot.lane.b32.xlu0 %v59_v6, %s73_s26 }
  0x5d   :  { %v32_v8 = vpop.permute.xlu2 %31  }
  0x65   :  { %v38_v9 = vpop.permute.xlu2 %37  }
  0x74   :  { %v8_v10 = vpop.permute.xlu0 %7   ;;  %v20_v11 = vpop.permute.xlu1 %19  }
  0x75   :  { %10 = vst.msk [vmem:[#allocation0] sm:$0x1] %vm9_vm1, %v8_v10  }
  0x7c   :  { %v14_v12 = vpop.permute.xlu0 %13   ;;  %v26_v13 = vpop.permute.xlu1 %25  }
  0x7d   :  { %16 = vst.msk [vmem:[#allocation0] sm:$0x1] %vm15_vm2, %v14_v12  }
  0x7e   :  { %22 = vst.msk [vmem:[#allocation0] sm:$0x1] %vm21_vm3, %v20_v11  }
  0x7f   :  { %28 = vst.msk [vmem:[#allocation0] sm:$0x1] %vm27_vm4, %v26_v13  }
  0x80   :  { %34 = vst.msk [vmem:[#allocation0] sm:$0x1] %vm33_vm5, %v32_v8  }
  0x81   :  { %40 = vst.msk [vmem:[#allocation0] sm:$0x1] %vm39_vm6, %v38_v9  }
  0x84   :  { %v44_v14 = vpop.permute.xlu0 %43  }
  0x85   :  { %46 = vst.msk [vmem:[#allocation0] sm:$0x1] %vm45_vm7, %v44_v14  }
  0x8c   :  { %v49_v15 = vld [vmem:[#allocation0] sm:$0x1] }
  0x8d   :  { %52 = vst [vmem:[%s112_s1] sm:$0x1] %v49_v15 }

// kernel: unigat_conv.3
= control target key start
LH: loop header
LB: loop body
LE: loop exit
PB: predicated region body
PF: predicated region fallthrough
CT: control target
= control target key end

     0   :  { %vm156_vm0 = vcmask 523264   ;;  %s724_s1 = inlined_call_operand.vmem [shape: bf16[64,128], index: 1, kind: input, shape index: {}]   ;;  %s725_s0 = inlined_call_operand.vmem [shape: bf16[256,64], index: 0, kind: input, shape index: {}]   ;;  %s726_s2 = inlined_call_operand.vmem [shape: bf16[256,128], index: 2, kind: output, shape index: {}]  }
   0x1   :  { %v477_v0 = vld [vmem:[%s724_s1 + $0x18] sm:$0xff]  ;;  %v476_v1 = vld [vmem:[%s724_s1 + $0x10] sm:$0xff]  ;;  %v475_v2 = vld [vmem:[%s724_s1 + $0x8] sm:$0xff] }
   0x2   :  { %209 = vmatpush.bf16.msra.mxu0 %v477_v0  ;;  %573 = vmatpush.bf16.msra.mxu1 %v477_v0  ;;  %v474_v3 = vld [vmem:[%s724_s1] sm:$0xff]  ;;  %v459_v8 = vld [vmem:[%s725_s0 + $0x8] sm:$0xff]  ;;  %v460_v12 = vld [vmem:[%s725_s0 + $0x10] sm:$0xff] }
   0x3   :  { %574 = vmatpush.bf16.msra.mxu2 %v477_v0  ;;  %575 = vmatpush.bf16.msra.mxu3 %v477_v0  ;;  %v458_v4 = vld [vmem:[%s725_s0] sm:$0xff]  ;;  %v463_v9 = vld [vmem:[%s725_s0 + $0x28] sm:$0xff]  ;;  %v464_v13 = vld [vmem:[%s725_s0 + $0x30] sm:$0xff] }
   0x4   :  { %v462_v5 = vld [vmem:[%s725_s0 + $0x20] sm:$0xff]  ;;  %v467_v10 = vld [vmem:[%s725_s0 + $0x48] sm:$0xff]  ;;  %v468_v14 = vld [vmem:[%s725_s0 + $0x50] sm:$0xff] }
   0x5   :  { %v466_v6 = vld [vmem:[%s725_s0 + $0x40] sm:$0xff]  ;;  %v471_v11 = vld [vmem:[%s725_s0 + $0x68] sm:$0xff]  ;;  %v472_v15 = vld [vmem:[%s725_s0 + $0x70] sm:$0xff] }
   0x6   :  { %210 = vmatpush.bf16.msra.mxu0 %v476_v1  ;;  %576 = vmatpush.bf16.msra.mxu1 %v476_v1  ;;  %v470_v7 = vld [vmem:[%s725_s0 + $0x60] sm:$0xff]  ;;  %v461_v16 = vld [vmem:[%s725_s0 + $0x18] sm:$0xff] }
   0x7   :  { %577 = vmatpush.bf16.msra.mxu2 %v476_v1  ;;  %578 = vmatpush.bf16.msra.mxu3 %v476_v1  ;;  %v465_v17 = vld [vmem:[%s725_s0 + $0x38] sm:$0xff] }
   0x8   :  { %v469_v18 = vld [vmem:[%s725_s0 + $0x58] sm:$0xff] }
   0x9   :  { %v473_v19 = vld [vmem:[%s725_s0 + $0x78] sm:$0xff] }
   0xa   :  { %211 = vmatpush.bf16.msra.mxu0 %v475_v2  ;;  %579 = vmatpush.bf16.msra.mxu1 %v475_v2 }
   0xb   :  { %580 = vmatpush.bf16.msra.mxu2 %v475_v2  ;;  %581 = vmatpush.bf16.msra.mxu3 %v475_v2 }
   0xe   :  { %212 = vmatpush.bf16.msra.mxu0 %v474_v3  ;;  %582 = vmatpush.bf16.msra.mxu1 %v474_v3 }
   0xf   :  { %583 = vmatpush.bf16.msra.mxu2 %v474_v3  ;;  %584 = vmatpush.bf16.msra.mxu3 %v474_v3 }
  0x11   :  { %442 = vmatmul.msk.bf16.vlgmr.msra.gmra.mxu0 %vm156_vm0, %v458_v4  ;;  %446 = vmatmul.msk.bf16.vlgmr.msra.gmra.mxu1 %vm156_vm0, %v462_v5 }
  0x12   :  { %450 = vmatmul.msk.bf16.vlgmr.msra.gmra.mxu2 %vm156_vm0, %v466_v6  ;;  %454 = vmatmul.msk.bf16.vlgmr.msra.gmra.mxu3 %vm156_vm0, %v470_v7 }
  0x21   :  { %443 = vmatmul.msk.bf16.gmra.mxu0 %vm156_vm0, %v459_v8  ;;  %447 = vmatmul.msk.bf16.gmra.mxu1 %vm156_vm0, %v463_v9 }
  0x22   :  { %451 = vmatmul.msk.bf16.gmra.mxu2 %vm156_vm0, %v467_v10  ;;  %455 = vmatmul.msk.bf16.gmra.mxu3 %vm156_vm0, %v471_v11 }
  0x31   :  { %444 = vmatmul.msk.bf16.gmra.mxu0 %vm156_vm0, %v460_v12  ;;  %448 = vmatmul.msk.bf16.gmra.mxu1 %vm156_vm0, %v464_v13 }
  0x32   :  { %452 = vmatmul.msk.bf16.gmra.mxu2 %vm156_vm0, %v468_v14  ;;  %456 = vmatmul.msk.bf16.gmra.mxu3 %vm156_vm0, %v472_v15 }
  0x41   :  { %445 = vmatmul.msk.bf16.gmra.mxu0 %vm156_vm0, %v461_v16  ;;  %449 = vmatmul.msk.bf16.gmra.mxu1 %vm156_vm0, %v465_v17 }
  0x42   :  { %453 = vmatmul.msk.bf16.gmra.mxu2 %vm156_vm0, %v469_v18  ;;  %457 = vmatmul.msk.bf16.gmra.mxu3 %vm156_vm0, %v473_v19 }
  0x8e   :  { %v214_v20 = vpop.f32.mrf.mxu0  ;;  %v234_v21 = vpop.f32.mrf.mxu1 }
  0x95   :  { %v254_v22 = vpop.f32.mrf.mxu2  ;;  %v274_v23 = vpop.f32.mrf.mxu3 }
  0x96   :  { %v216_v24 = vpop.f32.mrf.mxu0  ;;  %v236_v25 = vpop.f32.mrf.mxu1 }
  0x97   :  { %v481_v26 = vpack.c.bf16 %v216_v24, %v214_v20  ;;  %v501_v27 = vpack.c.bf16 %v236_v25, %v234_v21 }
  0x99   :  { %482 = vst [vmem:[%s726_s2] sm:$0xff] %v481_v26  }
  0x9a   :  { %561 = vst [vmem:[%s726_s2 + $0x20] sm:$0xff] %v501_v27  }
  0x9d   :  { %v256_v28 = vpop.f32.mrf.mxu2  ;;  %v276_v29 = vpop.f32.mrf.mxu3 }
  0x9e   :  { %v521_v30 = vpack.c.bf16 %v256_v28, %v254_v22  ;;  %v541_v31 = vpack.c.bf16 %v276_v29, %v274_v23  ;;  %v219_v32 = vpop.f32.mrf.mxu0  ;;  %v239_v33 = vpop.f32.mrf.mxu1 }
  0xa0   :  { %565 = vst [vmem:[%s726_s2 + $0x40] sm:$0xff] %v521_v30  }
  0xa1   :  { %569 = vst [vmem:[%s726_s2 + $0x60] sm:$0xff] %v541_v31  }
  0xa5   :  { %v259_v34 = vpop.f32.mrf.mxu2  ;;  %v279_v35 = vpop.f32.mrf.mxu3 }
  0xa6   :  { %v221_v36 = vpop.f32.mrf.mxu0  ;;  %v241_v37 = vpop.f32.mrf.mxu1 }
  0xa7   :  { %v486_v38 = vpack.c.bf16 %v221_v36, %v219_v32  ;;  %v506_v39 = vpack.c.bf16 %v241_v37, %v239_v33 }
  0xa9   :  { %558 = vst [vmem:[%s726_s2 + $0x8] sm:$0xff] %v486_v38  }
  0xaa   :  { %562 = vst [vmem:[%s726_s2 + $0x28] sm:$0xff] %v506_v39  }
  0xad   :  { %v261_v40 = vpop.f32.mrf.mxu2  ;;  %v281_v41 = vpop.f32.mrf.mxu3 }
  0xae   :  { %v526_v42 = vpack.c.bf16 %v261_v40, %v259_v34  ;;  %v546_v43 = vpack.c.bf16 %v281_v41, %v279_v35  ;;  %v224_v44 = vpop.f32.mrf.mxu0  ;;  %v244_v45 = vpop.f32.mrf.mxu1 }
  0xb0   :  { %566 = vst [vmem:[%s726_s2 + $0x48] sm:$0xff] %v526_v42  }
  0xb1   :  { %570 = vst [vmem:[%s726_s2 + $0x68] sm:$0xff] %v546_v43  }
  0xb5   :  { %v264_v46 = vpop.f32.mrf.mxu2  ;;  %v284_v47 = vpop.f32.mrf.mxu3 }
  0xb6   :  { %v226_v48 = vpop.f32.mrf.mxu0  ;;  %v246_v49 = vpop.f32.mrf.mxu1 }
  0xb7   :  { %v491_v50 = vpack.c.bf16 %v226_v48, %v224_v44  ;;  %v511_v51 = vpack.c.bf16 %v246_v49, %v244_v45 }
  0xb9   :  { %559 = vst [vmem:[%s726_s2 + $0x10] sm:$0xff] %v491_v50  }
  0xba   :  { %563 = vst [vmem:[%s726_s2 + $0x30] sm:$0xff] %v511_v51  }
  0xbd   :  { %v266_v52 = vpop.f32.mrf.mxu2  ;;  %v286_v53 = vpop.f32.mrf.mxu3 }
  0xbe   :  { %v531_v54 = vpack.c.bf16 %v266_v52, %v264_v46  ;;  %v551_v55 = vpack.c.bf16 %v286_v53, %v284_v47  ;;  %v229_v56 = vpop.f32.mrf.mxu0  ;;  %v249_v57 = vpop.f32.mrf.mxu1 }
  0xc0   :  { %567 = vst [vmem:[%s726_s2 + $0x50] sm:$0xff] %v531_v54  }
  0xc1   :  { %571 = vst [vmem:[%s726_s2 + $0x70] sm:$0xff] %v551_v55  }
  0xc5   :  { %v269_v58 = vpop.f32.mrf.mxu2  ;;  %v289_v59 = vpop.f32.mrf.mxu3 }
  0xc6   :  { %v231_v60 = vpop.f32.mrf.mxu0  ;;  %v251_v61 = vpop.f32.mrf.mxu1 }
  0xc7   :  { %v496_v62 = vpack.c.bf16 %v231_v60, %v229_v56  ;;  %v516_v63 = vpack.c.bf16 %v251_v61, %v249_v57 }
  0xc9   :  { %560 = vst [vmem:[%s726_s2 + $0x18] sm:$0xff] %v496_v62  }
  0xca   :  { %564 = vst [vmem:[%s726_s2 + $0x38] sm:$0xff] %v516_v63  }
  0xcd   :  { %v271_v0 = vpop.f32.mrf.mxu2  ;;  %v291_v1 = vpop.f32.mrf.mxu3 }
  0xce   :  { %v536_v2 = vpack.c.bf16 %v271_v0, %v269_v58  ;;  %v556_v3 = vpack.c.bf16 %v291_v1, %v289_v59 }
  0xd0   :  { %568 = vst [vmem:[%s726_s2 + $0x58] sm:$0xff] %v536_v2  }
  0xd1   :  { %572 = vst [vmem:[%s726_s2 + $0x78] sm:$0xff] %v556_v3  }

// kernel: unigat_conv.4
= control target key start
LH: loop header
LB: loop body
LE: loop exit
PB: predicated region body
PF: predicated region fallthrough
CT: control target
= control target key end

     0   :  { %v1584_v0 = vmov 0   ;;  %s2082_s3 = inlined_call_operand.vmem [shape: f32[256,1], index: 3, kind: input, shape index: {}]   ;;  %s2083_s1 = inlined_call_operand.vmem [shape: bf16[256,128], index: 1, kind: input, shape index: {}]   ;;  %s2084_s0 = inlined_call_operand.vmem [shape: s8[256,256], index: 0, kind: input, shape index: {}]   ;;  %s2085_s2 = inlined_call_operand.vmem [shape: bf16[128,128], index: 2, kind: input, shape index: {}]   ;;  %s2086_s4 = inlined_call_operand.vmem [shape: bf16[256,128], index: 4, kind: output, shape index: {0}]   ;;  %s2087_s5 = inlined_call_operand.vmem [shape: f32[256,128], index: 5, kind: output, shape index: {1}]  }
   0x1   :  { %1582 = vset.pattern.permute.xlu1 %v1584_v0  ;;  %1581 = vset.pattern.permute.xlu0 %v1584_v0  ;;  %v670_v1 = vld [vmem:[%s2082_s3 + $0x10] sm:$0xff]  ;;  %v668_v2 = vld [vmem:[%s2082_s3] sm:$0xff]  ;;  %v1444_v3 = vld [vmem:[%s2083_s1 + $0x38] sm:$0xff] }
   0x2   :  { %712 = vperm.xlu1 %1582, %v670_v1   ;;  %702 = vperm.xlu0 %1581, %v668_v2   ;;  %v1627_v4 = vld [vmem:[%s2083_s1 + $0x78] sm:$0xff]  ;;  %v1443_v5 = vld [vmem:[%s2083_s1 + $0x30] sm:$0xff]  ;;  %v669_v8 = vld [vmem:[%s2082_s3 + $0x8] sm:$0xff] }
   0x3   :  { %391 = vmatpush.bf16.msra.mxu0 %v1444_v3  ;;  %1556 = vmatpush.bf16.msra.mxu3 %v1444_v3  ;;  %v1636_v6 = vld [vmem:[%s2083_s1 + $0x70] sm:$0xff]  ;;  %v671_v7 = vld [vmem:[%s2082_s3 + $0x18] sm:$0xff]  ;;  %v1442_v9 = vld [vmem:[%s2083_s1 + $0x28] sm:$0xff] }
   0x4   :  { %480 = vmatpush.bf16.msra.mxu1 %v1627_v4  ;;  %1583 = vset.pattern.permute.xlu2 %v1584_v0  ;;  %v1651_v10 = vld [vmem:[%s2083_s1 + $0x68] sm:$0xff]  ;;  %v672_v11 = vld [vmem:[%s2082_s3 + $0x20] sm:$0xff]  ;;  %v675_v15 = vld [vmem:[%s2082_s3 + $0x38] sm:$0xff] }
   0x5   :  { %722 = vperm.xlu2 %1583, %v672_v11   ;;  %v1441_v12 = vld [vmem:[%s2083_s1 + $0x20] sm:$0xff]  ;;  %v673_v14 = vld [vmem:[%s2082_s3 + $0x28] sm:$0xff]  ;;  %v674_v16 = vld [vmem:[%s2082_s3 + $0x30] sm:$0xff] }
   0x6   :  { %v1663_v13 = vld [vmem:[%s2083_s1 + $0x60] sm:$0xff]  ;;  %v1440_v17 = vld [vmem:[%s2083_s1 + $0x18] sm:$0xff]  ;;  %v1439_v19 = vld [vmem:[%s2083_s1 + $0x10] sm:$0xff] }
   0x7   :  { %392 = vmatpush.bf16.msra.mxu0 %v1443_v5  ;;  %1557 = vmatpush.bf16.msra.mxu3 %v1443_v5  ;;  %v1681_v18 = vld [vmem:[%s2083_s1 + $0x58] sm:$0xff]  ;;  %v1690_v20 = vld [vmem:[%s2083_s1 + $0x50] sm:$0xff]  ;;  %v55_v21 = vld [vmem:[%s2084_s0] sm:$0xff] }
   0x8   :  { %481 = vmatpush.bf16.msra.mxu1 %v1636_v6  ;;  %v1698_v22 = vld [vmem:[%s2084_s0 + $0x60] sm:$0xff]  ;;  %v1703_v23 = vld [vmem:[%s2084_s0 + $0x8] sm:$0xff]  ;;  %v678_v25 = vld [vmem:[%s2082_s3 + $0x50] sm:$0xff]  ;;  %v71_v28 = vunpack.c.0.s8 %v55_v21  ;;  %v73_v29 = vunpack.c.1.s8 %v55_v21  ;;  %v75_v52 = vunpack.c.2.s8 %v55_v21  ;;  %v77_v53 = vunpack.c.3.s8 %v55_v21 }
   0x9   :  { %v676_v24 = vld [vmem:[%s2082_s3 + $0x40] sm:$0xff]  ;;  %v677_v26 = vld [vmem:[%s2082_s3 + $0x48] sm:$0xff]  ;;  %v119_v30 = vunpack.c.0.s8 %v1698_v22  ;;  %v121_v31 = vunpack.c.1.s8 %v1698_v22  ;;  %v72_v33 = vunpack.c.0.s8 %v1703_v23  ;;  %v74_v34 = vunpack.c.1.s8 %v1703_v23  ;;  %v679_v43 = vld [vmem:[%s2082_s3 + $0x58] sm:$0xff] }
   0xa   :  { %717 = vperm.xlu1 %1582, %v671_v7   ;;  %707 = vperm.xlu0 %1581, %v669_v8   ;;  %v1438_v27 = vld [vmem:[%s2083_s1 + $0x8] sm:$0xff]  ;;  %v1437_v35 = vld [vmem:[%s2083_s1] sm:$0xff]  ;;  %v135_v36 = vcvt.s32.f32 %v71_v28  ;;  %v137_v37 = vcvt.s32.f32 %v73_v29  ;;  %v682_v49 = vld [vmem:[%s2082_s3 + $0x70] sm:$0xff]  ;;  %v123_v54 = vunpack.c.2.s8 %v1698_v22  ;;  %v125_v55 = vunpack.c.3.s8 %v1698_v22 }
   0xb   :  { %393 = vmatpush.bf16.msra.mxu0 %v1442_v9  ;;  %1558 = vmatpush.bf16.msra.mxu3 %v1442_v9  ;;  %v1723_v32 = vld [vmem:[%s2083_s1 + $0x48] sm:$0xff]  ;;  %v183_v38 = vcvt.s32.f32 %v119_v30  ;;  %v185_v39 = vcvt.s32.f32 %v121_v31  ;;  %v1734_v40 = vld [vmem:[%s2083_s1 + $0x40] sm:$0xff]  ;;  %v136_v41 = vcvt.s32.f32 %v72_v33  ;;  %v138_v42 = vcvt.s32.f32 %v74_v34  ;;  %v683_v51 = vld [vmem:[%s2082_s3 + $0x78] sm:$0xff] }
   0xc   :  { %482 = vmatpush.bf16.msra.mxu1 %v1651_v10  ;;  %v681_v44 = vld [vmem:[%s2082_s3 + $0x68] sm:$0xff]  ;;  %v680_v45 = vld [vmem:[%s2082_s3 + $0x60] sm:$0xff]  ;;  %v199_v46 = vpack.c.bf16 %v137_v37, %v135_v36  ;;  %v76_v56 = vunpack.c.2.s8 %v1703_v23  ;;  %v78_v57 = vunpack.c.3.s8 %v1703_v23  ;;  %v139_v58 = vcvt.s32.f32 %v75_v52  ;;  %v69_v7 = vld [vmem:[%s2084_s0 + $0x70] sm:$0xff] }
   0xd   :  { %727 = vperm.xlu2 %1583, %v673_v14   ;;  %v223_v47 = vpack.c.bf16 %v185_v39, %v183_v38  ;;  %v200_v48 = vpack.c.bf16 %v138_v42, %v136_v41  ;;  %v684_v50 = vld [vmem:[%s2082_s3 + $0x80] sm:$0xff]  ;;  %v141_v59 = vcvt.s32.f32 %v77_v53  ;;  %v187_v60 = vcvt.s32.f32 %v123_v54  ;;  %v685_v0 = vld [vmem:[%s2082_s3 + $0x88] sm:$0xff]  ;;  %v58_v8 = vld [vmem:[%s2084_s0 + $0x18] sm:$0xff] }
   0xe   :  { %v189_v61 = vcvt.s32.f32 %v125_v55  ;;  %v140_v62 = vcvt.s32.f32 %v76_v56  ;;  %v142_v63 = vcvt.s32.f32 %v78_v57  ;;  %v693_v1 = vld [vmem:[%s2082_s3 + $0xc8] sm:$0xff]  ;;  %v692_v2 = vld [vmem:[%s2082_s3 + $0xc0] sm:$0xff]  ;;  %v686_v9 = vld [vmem:[%s2082_s3 + $0x90] sm:$0xff]  ;;  %v127_v14 = vunpack.c.0.s8 %v69_v7 }
   0xf   :  { %394 = vmatpush.bf16.msra.mxu0 %v1441_v12  ;;  %1559 = vmatpush.bf16.msra.mxu3 %v1441_v12  ;;  %v201_v3 = vpack.c.bf16 %v141_v59, %v139_v58  ;;  %v687_v11 = vld [vmem:[%s2082_s3 + $0x98] sm:$0xff]  ;;  %v696_v30 = vld [vmem:[%s2082_s3 + $0xe0] sm:$0xff]  ;;  %v690_v31 = vld [vmem:[%s2082_s3 + $0xb0] sm:$0xff]  ;;  %v133_v36 = vunpack.c.3.s8 %v69_v7  ;;  %v84_v37 = vunpack.c.2.s8 %v58_v8  ;;  %v86_v38 = vunpack.c.3.s8 %v58_v8 }
  0x10   :  { %483 = vmatpush.bf16.msra.mxu1 %v1663_v13  ;;  %v202_v5 = vpack.c.bf16 %v142_v63, %v140_v62  ;;  %v68_v52 = vld [vmem:[%s2084_s0 + $0x68] sm:$0xff] }
  0x11   :  { %v197_v42 = vcvt.s32.f32 %v133_v36  ;;  %v60_v53 = vld [vmem:[%s2084_s0 + $0x28] sm:$0xff]  ;;  %v120_v56 = vunpack.c.0.s8 %v68_v52  ;;  %v122_v57 = vunpack.c.1.s8 %v68_v52 }
  0x12   :  { %737 = vperm.xlu1 %1582, %v675_v15   ;;  %732 = vperm.xlu0 %1581, %v674_v16   ;;  %v129_v15 = vunpack.c.1.s8 %v69_v7  ;;  %v80_v16 = vunpack.c.0.s8 %v58_v8  ;;  %v88_v58 = vunpack.c.0.s8 %v60_v53  ;;  %v90_v59 = vunpack.c.1.s8 %v60_v53 }
  0x13   :  { %395 = vmatpush.bf16.msra.mxu0 %v1440_v17  ;;  %1560 = vmatpush.bf16.msra.mxu3 %v1440_v17  ;;  %v82_v17 = vunpack.c.1.s8 %v58_v8  ;;  %v184_v62 = vcvt.s32.f32 %v120_v56  ;;  %v186_v63 = vcvt.s32.f32 %v122_v57  ;;  %v126_v8 = vunpack.c.3.s8 %v68_v52 }
  0x14   :  { %484 = vmatpush.bf16.msra.mxu1 %v1681_v18  ;;  %v193_v21 = vcvt.s32.f32 %v129_v15  ;;  %v144_v22 = vcvt.s32.f32 %v80_v16 }
  0x15   :  { %742 = vperm.xlu2 %1583, %v676_v24   ;;  %v146_v23 = vcvt.s32.f32 %v82_v17  ;;  %v695_v24 = vld [vmem:[%s2082_s3 + $0xd8] sm:$0xff] }
  0x17   :  { %396 = vmatpush.bf16.msra.mxu0 %v1439_v19  ;;  %1561 = vmatpush.bf16.msra.mxu3 %v1439_v19  ;;  %v204_v29 = vpack.c.bf16 %v146_v23, %v144_v22  ;;  %v70_v22 = vld [vmem:[%s2084_s0 + $0x78] sm:$0xff] }
  0x18   :  { %485 = vmatpush.bf16.msra.mxu1 %v1690_v20  ;;  %v62_v23 = vld [vmem:[%s2084_s0 + $0x38] sm:$0xff] }
  0x1a   :  { %752 = vperm.xlu1 %1582, %v678_v25   ;;  %747 = vperm.xlu0 %1581, %v677_v26   ;;  %v689_v25 = vld [vmem:[%s2082_s3 + $0xa8] sm:$0xff]  ;;  %v688_v26 = vld [vmem:[%s2082_s3 + $0xa0] sm:$0xff] }
  0x1b   :  { %397 = vmatpush.bf16.msra.mxu0 %v1438_v27  ;;  %1562 = vmatpush.bf16.msra.mxu3 %v1438_v27 }
  0x1c   :  { %486 = vmatpush.bf16.msra.mxu1 %v1723_v32 }
  0x1d   :  { %757 = vperm.xlu2 %1583, %v679_v43   ;;  %v148_v43 = vcvt.s32.f32 %v84_v37 }
  0x1f   :  { %398 = vmatpush.bf16.msra.mxu0 %v1437_v35  ;;  %1563 = vmatpush.bf16.msra.mxu3 %v1437_v35  ;;  %v131_v35 = vunpack.c.2.s8 %v69_v7  ;;  %v124_v7 = vunpack.c.2.s8 %v68_v52 }
  0x20   :  { %487 = vmatpush.bf16.msra.mxu1 %v1734_v40 }
  0x21   :  { %v195_v41 = vcvt.s32.f32 %v131_v35  ;;  %v1458_v35 = vld [vmem:[%s2085_s2 + $0x28] sm:$0xff] }
  0x22   :  { %767 = vperm.xlu1 %1582, %v681_v44   ;;  %762 = vperm.xlu0 %1581, %v680_v45   ;;  %v150_v44 = vcvt.s32.f32 %v86_v38  ;;  %v691_v45 = vld [vmem:[%s2082_s3 + $0xb8] sm:$0xff] }
  0x23   :  { %1564 = vmatpush.bf16.msrb.mxu3 %v1627_v4  ;;  %399 = vmatmul.bf16.vlgmr.msra.gmra.mxu0 %v199_v46  ;;  %v225_v4 = vpack.c.bf16 %v189_v61, %v187_v60  ;;  %v699_v46 = vld [vmem:[%s2082_s3 + $0xf8] sm:$0xff] }
  0x24   :  { %459 = vmatmul.bf16.vlgmr.msra.gmra.mxu3 %v223_v47  ;;  %488 = vmatmul.bf16.vlgmr.msra.gmra.mxu1 %v200_v48  ;;  %v698_v47 = vld [vmem:[%s2082_s3 + $0xf0] sm:$0xff] }
  0x25   :  { %772 = vperm.xlu2 %1583, %v682_v49   ;;  %v229_v49 = vpack.c.bf16 %v197_v42, %v195_v41  ;;  %v1456_v42 = vld [vmem:[%s2085_s2 + $0x18] sm:$0xff] }
  0x27   :  { %1565 = vmatpush.bf16.msrb.mxu3 %v1636_v6  ;;  %v57_v6 = vld [vmem:[%s2084_s0 + $0x10] sm:$0xff] }
  0x28   :  { %v79_v12 = vunpack.c.0.s8 %v57_v6  ;;  %v83_v33 = vunpack.c.2.s8 %v57_v6  ;;  %v85_v34 = vunpack.c.3.s8 %v57_v6 }
  0x2a   :  { %782 = vperm.xlu1 %1582, %v684_v50   ;;  %777 = vperm.xlu0 %1581, %v683_v51   ;;  %v147_v39 = vcvt.s32.f32 %v83_v33  ;;  %v206_v50 = vpack.c.bf16 %v150_v44, %v148_v43  ;;  %v59_v51 = vld [vmem:[%s2084_s0 + $0x20] sm:$0xff] }
  0x2b   :  { %1566 = vmatpush.bf16.msrb.mxu3 %v1651_v10  ;;  %v694_v10 = vld [vmem:[%s2082_s3 + $0xd0] sm:$0xff]  ;;  %v87_v54 = vunpack.c.0.s8 %v59_v51  ;;  %v89_v55 = vunpack.c.1.s8 %v59_v51 }
  0x2d   :  { %787 = vperm.xlu2 %1583, %v685_v0   ;;  %v151_v60 = vcvt.s32.f32 %v87_v54  ;;  %v153_v61 = vcvt.s32.f32 %v89_v55  ;;  %v152_v0 = vcvt.s32.f32 %v88_v58  ;;  %v1454_v54 = vld [vmem:[%s2085_s2 + $0x8] sm:$0xff] }
  0x2f   :  { %1567 = vmatpush.bf16.msrb.mxu3 %v1663_v13  ;;  %v81_v13 = vunpack.c.1.s8 %v57_v6  ;;  %v93_v6 = vunpack.c.3.s8 %v59_v51 }
  0x31   :  { %v145_v19 = vcvt.s32.f32 %v81_v13  ;;  %v188_v13 = vcvt.s32.f32 %v124_v7 }
  0x32   :  { %827 = vperm.xlu1 %1582, %v693_v1   ;;  %822 = vperm.xlu0 %1581, %v692_v2   ;;  %v154_v1 = vcvt.s32.f32 %v90_v59  ;;  %v207_v2 = vpack.c.bf16 %v153_v61, %v151_v60  ;;  %v1453_v59 = vld [vmem:[%s2085_s2] sm:$0xff] }
  0x33   :  { %1568 = vmatpush.bf16.msrb.mxu3 %v1681_v18  ;;  %404 = vmatmul.bf16.gmra.mxu0 %v201_v3  ;;  %v143_v18 = vcvt.s32.f32 %v79_v12  ;;  %v224_v3 = vpack.c.bf16 %v186_v63, %v184_v62  ;;  %v157_v12 = vcvt.s32.f32 %v93_v6  ;;  %v63_v61 = vld [vmem:[%s2084_s0 + $0x40] sm:$0xff]  ;;  %v64_v62 = vld [vmem:[%s2084_s0 + $0x48] sm:$0xff] }
  0x34   :  { %464 = vmatmul.bf16.gmra.mxu3 %v225_v4  ;;  %493 = vmatmul.bf16.gmra.mxu1 %v202_v5  ;;  %v208_v4 = vpack.c.bf16 %v154_v1, %v152_v0  ;;  %v91_v5 = vunpack.c.2.s8 %v59_v51  ;;  %v103_v63 = vunpack.c.0.s8 %v63_v61  ;;  %v105_v0 = vunpack.c.1.s8 %v63_v61 }
  0x35   :  { %792 = vperm.xlu2 %1583, %v686_v9   ;;  %v203_v27 = vpack.c.bf16 %v145_v19, %v143_v18  ;;  %v92_v9 = vunpack.c.2.s8 %v60_v53  ;;  %v104_v1 = vunpack.c.0.s8 %v64_v62 }
  0x37   :  { %1569 = vmatpush.bf16.msrb.mxu3 %v1690_v20  ;;  %v191_v20 = vcvt.s32.f32 %v127_v14  ;;  %v190_v14 = vcvt.s32.f32 %v126_v8  ;;  %v156_v15 = vcvt.s32.f32 %v92_v9 }
  0x39   :  { %v227_v28 = vpack.c.bf16 %v193_v21, %v191_v20  ;;  %v226_v18 = vpack.c.bf16 %v190_v14, %v188_v13  ;;  %v1460_v20 = vld [vmem:[%s2085_s2 + $0x38] sm:$0xff]  ;;  %v61_v21 = vld [vmem:[%s2084_s0 + $0x30] sm:$0xff]  ;;  %v107_v14 = vunpack.c.2.s8 %v63_v61 }
  0x3a   :  { %832 = vperm.xlu1 %1582, %v694_v10   ;;  %797 = vperm.xlu0 %1581, %v687_v11   ;;  %v94_v10 = vunpack.c.3.s8 %v60_v53  ;;  %v155_v11 = vcvt.s32.f32 %v91_v5  ;;  %v99_v43 = vunpack.c.2.s8 %v61_v21  ;;  %v101_v44 = vunpack.c.3.s8 %v61_v21 }
  0x3b   :  { %1570 = vmatpush.bf16.msrb.mxu3 %v1723_v32  ;;  %v697_v32 = vld [vmem:[%s2082_s3 + $0xe8] sm:$0xff]  ;;  %1116 = vmatpush.bf16.msra.mxu2 %v1460_v20  ;;  %v168_v5 = vcvt.s32.f32 %v104_v1 }
  0x3c   :  { %v158_v16 = vcvt.s32.f32 %v94_v10  ;;  %v209_v17 = vpack.c.bf16 %v157_v12, %v155_v11  ;;  %v165_v51 = vcvt.s32.f32 %v101_v44 }
  0x3d   :  { %837 = vperm.xlu2 %1583, %v695_v24   ;;  %v1459_v24 = vld [vmem:[%s2085_s2 + $0x30] sm:$0xff] }
  0x3e   :  { %v210_v19 = vpack.c.bf16 %v158_v16, %v156_v15  ;;  %v109_v15 = vunpack.c.3.s8 %v63_v61 }
  0x3f   :  { %1571 = vmatpush.bf16.msrb.mxu3 %v1734_v40  ;;  %v149_v40 = vcvt.s32.f32 %v85_v34  ;;  %1117 = vmatpush.bf16.msra.mxu2 %v1459_v24 }
  0x41   :  { %v205_v48 = vpack.c.bf16 %v149_v40, %v147_v39  ;;  %v1457_v40 = vld [vmem:[%s2085_s2 + $0x20] sm:$0xff] }
  0x42   :  { %807 = vperm.xlu1 %1582, %v689_v25   ;;  %802 = vperm.xlu0 %1581, %v688_v26   ;;  %v95_v25 = vunpack.c.0.s8 %v61_v21  ;;  %v97_v26 = vunpack.c.1.s8 %v61_v21 }
  0x43   :  { %409 = vmatmul.bf16.gmra.mxu0 %v203_v27  ;;  %1572 = vmatpush.bf16.msra.mxu3 %v1460_v20  ;;  %v128_v27 = vunpack.c.0.s8 %v70_v22 }
  0x44   :  { %469 = vmatmul.bf16.gmra.mxu3 %v227_v28  ;;  %498 = vmatmul.bf16.gmra.mxu1 %v204_v29  ;;  %v130_v28 = vunpack.c.1.s8 %v70_v22  ;;  %v96_v29 = vunpack.c.0.s8 %v62_v23 }
  0x45   :  { %842 = vperm.xlu2 %1583, %v696_v30   ;;  %v98_v30 = vunpack.c.1.s8 %v62_v23  ;;  %v192_v33 = vcvt.s32.f32 %v128_v27  ;;  %1118 = vmatpush.bf16.msra.mxu2 %v1458_v35 }
  0x46   :  { %v194_v34 = vcvt.s32.f32 %v130_v28  ;;  %v160_v36 = vcvt.s32.f32 %v96_v29 }
  0x47   :  { %1573 = vmatpush.bf16.msra.mxu3 %v1459_v24  ;;  %v162_v37 = vcvt.s32.f32 %v98_v30  ;;  %v173_v24 = vcvt.s32.f32 %v109_v15 }
  0x48   :  { %v228_v39 = vpack.c.bf16 %v194_v34, %v192_v33 }
  0x49   :  { %v212_v41 = vpack.c.bf16 %v162_v37, %v160_v36  ;;  %1119 = vmatpush.bf16.msra.mxu2 %v1457_v40 }
  0x4a   :  { %812 = vperm.xlu1 %1582, %v690_v31   ;;  %847 = vperm.xlu0 %1581, %v697_v32   ;;  %v159_v31 = vcvt.s32.f32 %v95_v25  ;;  %v161_v32 = vcvt.s32.f32 %v97_v26 }
  0x4b   :  { %1574 = vmatpush.bf16.msra.mxu3 %v1458_v35 }
  0x4c   :  { %v211_v38 = vpack.c.bf16 %v161_v32, %v159_v31 }
  0x4d   :  { %817 = vperm.xlu2 %1583, %v691_v45   ;;  %1120 = vmatpush.bf16.msra.mxu2 %v1456_v42  ;;  %v132_v45 = vunpack.c.2.s8 %v70_v22 }
  0x4f   :  { %1575 = vmatpush.bf16.msra.mxu3 %v1457_v40  ;;  %v196_v52 = vcvt.s32.f32 %v132_v45 }
  0x52   :  { %857 = vperm.xlu1 %1582, %v699_v46   ;;  %852 = vperm.xlu0 %1581, %v698_v47   ;;  %v134_v46 = vunpack.c.3.s8 %v70_v22  ;;  %v1455_v47 = vld [vmem:[%s2085_s2 + $0x10] sm:$0xff] }
  0x53   :  { %414 = vmatmul.bf16.gmra.mxu0 %v205_v48  ;;  %1576 = vmatpush.bf16.msra.mxu3 %v1456_v42  ;;  %v100_v48 = vunpack.c.2.s8 %v62_v23  ;;  %v66_v42 = vld [vmem:[%s2084_s0 + $0x58] sm:$0xff] }
  0x54   :  { %474 = vmatmul.bf16.gmra.mxu3 %v229_v49  ;;  %503 = vmatmul.bf16.gmra.mxu1 %v206_v50  ;;  %v102_v49 = vunpack.c.3.s8 %v62_v23  ;;  %v163_v50 = vcvt.s32.f32 %v99_v43  ;;  %v198_v53 = vcvt.s32.f32 %v134_v46  ;;  %v171_v23 = vcvt.s32.f32 %v107_v14 }
  0x55   :  { %1121 = vmatpush.bf16.msra.mxu2 %v1455_v47  ;;  %v164_v55 = vcvt.s32.f32 %v100_v48  ;;  %v112_v48 = vunpack.c.0.s8 %v66_v42 }
  0x56   :  { %v166_v56 = vcvt.s32.f32 %v102_v49  ;;  %v213_v57 = vpack.c.bf16 %v165_v51, %v163_v50  ;;  %v230_v58 = vpack.c.bf16 %v198_v53, %v196_v52  ;;  %v217_v32 = vpack.c.bf16 %v173_v24, %v171_v23 }
  0x57   :  { %1577 = vmatpush.bf16.msra.mxu3 %v1455_v47  ;;  %v114_v49 = vunpack.c.1.s8 %v66_v42 }
  0x58   :  { %v214_v60 = vpack.c.bf16 %v166_v56, %v164_v55 }
  0x59   :  { %1122 = vmatpush.bf16.msra.mxu2 %v1454_v54 }
  0x5b   :  { %1578 = vmatpush.bf16.msra.mxu3 %v1454_v54 }
  0x5d   :  { %1123 = vmatpush.bf16.msra.mxu2 %v1453_v59 }
  0x5f   :  { %1579 = vmatpush.bf16.msra.mxu3 %v1453_v59  ;;  %v723_v50 = vpop.permute.xlu2 %722 }
  0x63   :  { %419 = vmatmul.bf16.gmra.mxu0 %v207_v2  ;;  %v106_v2 = vunpack.c.1.s8 %v64_v62 }
  0x64   :  { %548 = vmatmul.bf16.vlgmr.msrb.gmra.mxu3 %v224_v3  ;;  %508 = vmatmul.bf16.gmra.mxu1 %v208_v4  ;;  %v167_v3 = vcvt.s32.f32 %v103_v63  ;;  %v169_v4 = vcvt.s32.f32 %v105_v0 }
  0x65   :  { %v170_v6 = vcvt.s32.f32 %v106_v2 }
  0x66   :  { %v215_v7 = vpack.c.bf16 %v169_v4, %v167_v3 }
  0x67   :  { %v216_v9 = vpack.c.bf16 %v170_v6, %v168_v5  ;;  %v728_v6 = vpop.permute.xlu2 %727 }
  0x73   :  { %424 = vmatmul.bf16.gmra.mxu0 %v209_v17 }
  0x74   :  { %553 = vmatmul.bf16.gmra.mxu3 %v226_v18  ;;  %513 = vmatmul.bf16.gmra.mxu1 %v210_v19  ;;  %v703_v10 = vpop.permute.xlu0 %702  ;;  %v108_v18 = vunpack.c.2.s8 %v64_v62  ;;  %v110_v19 = vunpack.c.3.s8 %v64_v62  ;;  %v713_v37 = vpop.permute.xlu1 %712 }
  0x76   :  { %v172_v26 = vcvt.s32.f32 %v108_v18  ;;  %v174_v27 = vcvt.s32.f32 %v110_v19 }
  0x78   :  { %v218_v34 = vpack.c.bf16 %v174_v27, %v172_v26  ;;  %v743_v26 = vpop.permute.xlu2 %742 }
  0x7c   :  { %v708_v22 = vpop.permute.xlu0 %707  ;;  %v718_v53 = vpop.permute.xlu1 %717 }
  0x83   :  { %429 = vmatmul.bf16.gmra.mxu0 %v211_v38 }
  0x84   :  { %558 = vmatmul.bf16.gmra.mxu3 %v228_v39  ;;  %518 = vmatmul.bf16.gmra.mxu1 %v212_v41  ;;  %v65_v41 = vld [vmem:[%s2084_s0 + $0x50] sm:$0xff] }
  0x85   :  { %v111_v44 = vunpack.c.0.s8 %v65_v41  ;;  %v113_v45 = vunpack.c.1.s8 %v65_v41 }
  0x87   :  { %v175_v54 = vcvt.s32.f32 %v111_v44  ;;  %v177_v55 = vcvt.s32.f32 %v113_v45 }
  0x89   :  { %v219_v63 = vpack.c.bf16 %v177_v55, %v175_v54 }
  0x93   :  { %434 = vmatmul.bf16.gmra.mxu0 %v213_v57  ;;  %v176_v57 = vcvt.s32.f32 %v112_v48 }
  0x94   :  { %563 = vmatmul.bf16.gmra.mxu3 %v230_v58  ;;  %523 = vmatmul.bf16.gmra.mxu1 %v214_v60  ;;  %v178_v58 = vcvt.s32.f32 %v114_v49 }
  0x96   :  { %v220_v1 = vpack.c.bf16 %v178_v58, %v176_v57 }
  0xa0   :  { %v400_v8 = vpop.f32.mrf.mxu0 }
  0xa1   :  { %v489_v11 = vpop.f32.mrf.mxu1 }
  0xa2   :  { %v490_v12 = vadd.f32 %v489_v11, %v400_v8  ;;  %v117_v11 = vunpack.c.3.s8 %v65_v41 }
  0xa3   :  { %439 = vmatmul.bf16.gmra.mxu0 %v215_v7  ;;  %v733_v7 = vpop.permute.xlu0 %732 }
  0xa4   :  { %528 = vmatmul.bf16.gmra.mxu1 %v216_v9  ;;  %v860_v16 = vmul.f32 %v703_v10, %v490_v12  ;;  %v115_v10 = vunpack.c.2.s8 %v65_v41  ;;  %v738_v12 = vpop.permute.xlu1 %737 }
  0xa6   :  { %v892_v28 = vpack.c.bf16 %v860_v16, %v860_v16 }
  0xa7   :  { %v1869_v13 = vpop.f32.mrf.mxu3 }
  0xa8   :  { %v402_v17 = vpop.f32.mrf.mxu0  ;;  %v1004_v35 = vunpack.c.l.b16 %v892_v28 }
  0xa9   :  { %v491_v20 = vpop.f32.mrf.mxu1 }
  0xaa   :  { %v492_v21 = vadd.f32 %v491_v20, %v402_v17  ;;  %v118_v17 = vunpack.c.3.s8 %v66_v42  ;;  %v179_v20 = vcvt.s32.f32 %v115_v10 }
  0xab   :  { %v748_v27 = vpop.permute.xlu0 %747 }
  0xac   :  { %v861_v25 = vmul.f32 %v708_v22, %v492_v21  ;;  %v181_v21 = vcvt.s32.f32 %v117_v11  ;;  %v182_v24 = vcvt.s32.f32 %v118_v17 }
  0xae   :  { %v1464_v29 = vpack.c.bf16 %v861_v25, %v860_v16  ;;  %v893_v31 = vpack.c.bf16 %v861_v25, %v861_v25  ;;  %v116_v16 = vunpack.c.2.s8 %v66_v42  ;;  %v1900_v42 = vpop.permute.xlu2 %757 }
  0xaf   :  { %v1871_v30 = vpop.f32.mrf.mxu3 }
  0xb0   :  { %1465 = vst [vmem:[%s2086_s4] sm:$0xff] %v1464_v29   ;;  %v405_v33 = vpop.f32.mrf.mxu0  ;;  %v1005_v36 = vunpack.c.l.b16 %v893_v31  ;;  %v180_v23 = vcvt.s32.f32 %v116_v16 }
  0xb1   :  { %v494_v38 = vpop.f32.mrf.mxu1 }
  0xb2   :  { %v1036_v39 = vpack.c.b16 %v1005_v36, %v1004_v35  ;;  %v495_v40 = vadd.f32 %v494_v38, %v405_v33  ;;  %v1896_v38 = vpop.permute.xlu1 %752 }
  0xb3   :  { %444 = vmatmul.bf16.gmra.mxu0 %v217_v32  ;;  %v221_v32 = vpack.c.bf16 %v181_v21, %v179_v20  ;;  %v1902_v44 = vpop.permute.xlu0 %762 }
  0xb4   :  { %533 = vmatmul.bf16.gmra.mxu1 %v218_v34  ;;  %1124 = vmatmul.bf16.vlgmr.msra.gmra.mxu2 %v1036_v39  ;;  %v862_v46 = vmul.f32 %v713_v37, %v495_v40  ;;  %v222_v34 = vpack.c.bf16 %v182_v24, %v180_v23 }
  0xb6   :  { %v894_v59 = vpack.c.bf16 %v862_v46, %v862_v46 }
  0xb7   :  { %v1882_v43 = vpop.f32.mrf.mxu3 }
  0xb8   :  { %v407_v47 = vpop.f32.mrf.mxu0  ;;  %v1006_v2 = vunpack.c.l.b16 %v894_v59  ;;  %v1911_v59 = vpop.permute.xlu2 %772 }
  0xb9   :  { %v496_v51 = vpop.f32.mrf.mxu1 }
  0xba   :  { %v497_v52 = vadd.f32 %v496_v51, %v407_v47  ;;  %v1904_v49 = vpop.permute.xlu1 %767 }
  0xbc   :  { %v863_v56 = vmul.f32 %v718_v53, %v497_v52 }
  0xbe   :  { %v1469_v60 = vpack.c.bf16 %v863_v56, %v862_v46  ;;  %v895_v62 = vpack.c.bf16 %v863_v56, %v863_v56 }
  0xbf   :  { %v1884_v61 = vpop.f32.mrf.mxu3 }
  0xc0   :  { %1541 = vst [vmem:[%s2086_s4 + $0x8] sm:$0xff] %v1469_v60   ;;  %v410_v0 = vpop.f32.mrf.mxu0  ;;  %v1007_v3 = vunpack.c.l.b16 %v895_v62  ;;  %v1913_v60 = vpop.permute.xlu0 %777 }
  0xc1   :  { %v499_v4 = vpop.f32.mrf.mxu1 }
  0xc2   :  { %v1037_v5 = vpack.c.b16 %v1007_v3, %v1006_v2  ;;  %v500_v8 = vadd.f32 %v499_v4, %v410_v0  ;;  %v1915_v0 = vpop.permute.xlu1 %782 }
  0xc3   :  { %449 = vmatmul.bf16.gmra.mxu0 %v219_v63 }
  0xc4   :  { %538 = vmatmul.bf16.gmra.mxu1 %v220_v1  ;;  %1129 = vmatmul.bf16.gmra.mxu2 %v1037_v5  ;;  %v864_v14 = vmul.f32 %v723_v50, %v500_v8 }
  0xc6   :  { %v896_v25 = vpack.c.bf16 %v864_v14, %v864_v14 }
  0xc7   :  { %v1889_v9 = vpop.f32.mrf.mxu3 }
  0xc8   :  { %v412_v15 = vpop.f32.mrf.mxu0  ;;  %v1008_v35 = vunpack.c.l.b16 %v896_v25  ;;  %v823_v8 = vpop.permute.xlu0 %822 }
  0xc9   :  { %v501_v18 = vpop.f32.mrf.mxu1 }
  0xca   :  { %v502_v19 = vadd.f32 %v501_v18, %v412_v15  ;;  %v828_v18 = vpop.permute.xlu1 %827 }
  0xcc   :  { %v865_v22 = vmul.f32 %v728_v6, %v502_v19 }
  0xce   :  { %v1474_v28 = vpack.c.bf16 %v865_v22, %v864_v14  ;;  %v897_v31 = vpack.c.bf16 %v865_v22, %v865_v22 }
  0xcf   :  { %v1891_v29 = vpop.f32.mrf.mxu3 }
  0xd0   :  { %1542 = vst [vmem:[%s2086_s4 + $0x10] sm:$0xff] %v1474_v28   ;;  %v415_v33 = vpop.f32.mrf.mxu0  ;;  %v1009_v36 = vunpack.c.l.b16 %v897_v31 }
  0xd1   :  { %v504_v37 = vpop.f32.mrf.mxu1 }
  0xd2   :  { %v1038_v39 = vpack.c.b16 %v1009_v36, %v1008_v35  ;;  %v505_v40 = vadd.f32 %v504_v37, %v415_v33 }
  0xd3   :  { %454 = vmatmul.bf16.gmra.mxu0 %v221_v32 }
  0xd4   :  { %543 = vmatmul.bf16.gmra.mxu1 %v222_v34  ;;  %1134 = vmatmul.bf16.gmra.mxu2 %v1038_v39  ;;  %v866_v45 = vmul.f32 %v733_v7, %v505_v40  ;;  %v1918_v7 = vpop.permute.xlu2 %787  ;;  %v833_v40 = vpop.permute.xlu1 %832 }
  0xd6   :  { %v898_v51 = vpack.c.bf16 %v866_v45, %v866_v45 }
  0xd7   :  { %v1898_v41 = vpop.f32.mrf.mxu3 }
  0xd8   :  { %v417_v46 = vpop.f32.mrf.mxu0  ;;  %v1010_v56 = vunpack.c.l.b16 %v898_v51 }
  0xd9   :  { %v506_v47 = vpop.f32.mrf.mxu1 }
  0xda   :  { %v507_v48 = vadd.f32 %v506_v47, %v417_v46 }
  0xdc   :  { %v867_v50 = vmul.f32 %v738_v12, %v507_v48  ;;  %v1927_v31 = vpop.permute.xlu2 %792 }
  0xde   :  { %v1479_v52 = vpack.c.bf16 %v867_v50, %v866_v45  ;;  %v899_v54 = vpack.c.bf16 %v867_v50, %v867_v50  ;;  %v1931_v45 = vpop.permute.xlu0 %797 }
  0xdf   :  { %v1906_v53 = vpop.f32.mrf.mxu3 }
  0xe0   :  { %1543 = vst [vmem:[%s2086_s4 + $0x18] sm:$0xff] %v1479_v52   ;;  %v420_v55 = vpop.f32.mrf.mxu0  ;;  %v1011_v57 = vunpack.c.l.b16 %v899_v54 }
  0xe1   :  { %v509_v58 = vpop.f32.mrf.mxu1 }
  0xe2   :  { %v1039_v62 = vpack.c.b16 %v1011_v57, %v1010_v56  ;;  %v510_v63 = vadd.f32 %v509_v58, %v420_v55 }
  0xe4   :  { %1139 = vmatmul.bf16.gmra.mxu2 %v1039_v62  ;;  %v868_v2 = vmul.f32 %v743_v26, %v510_v63  ;;  %v838_v55 = vpop.permute.xlu2 %837 }
  0xe6   :  { %v900_v11 = vpack.c.bf16 %v868_v2, %v868_v2 }
  0xe7   :  { %v549_v1 = vpop.f32.mrf.mxu3 }
  0xe8   :  { %v422_v3 = vpop.f32.mrf.mxu0  ;;  %v550_v4 = vadd.f32 %v549_v1, %v1869_v13  ;;  %v1012_v13 = vunpack.c.l.b16 %v900_v11 }
  0xe9   :  { %v511_v5 = vpop.f32.mrf.mxu1 }
  0xea   :  { %v512_v6 = vadd.f32 %v511_v5, %v422_v3  ;;  %v884_v12 = vmul.f32 %v823_v8, %v550_v4  ;;  %v1941_v4 = vpop.permute.xlu0 %802 }
  0xec   :  { %v869_v10 = vmul.f32 %v748_v27, %v512_v6  ;;  %v916_v21 = vpack.c.bf16 %v884_v12, %v884_v12 }
  0xee   :  { %v1484_v14 = vpack.c.bf16 %v869_v10, %v868_v2  ;;  %v901_v16 = vpack.c.bf16 %v869_v10, %v869_v10  ;;  %v1028_v28 = vunpack.c.l.b16 %v916_v21 }
  0xef   :  { %v551_v15 = vpop.f32.mrf.mxu3 }
  0xf0   :  { %v552_v17 = vadd.f32 %v551_v15, %v1871_v30  ;;  %1544 = vst [vmem:[%s2086_s4 + $0x20] sm:$0xff] %v1484_v14   ;;  %v425_v19 = vpop.f32.mrf.mxu0  ;;  %v1013_v20 = vunpack.c.l.b16 %v901_v16  ;;  %v1945_v15 = vpop.permute.xlu1 %807 }
  0xf1   :  { %v514_v23 = vpop.f32.mrf.mxu1  ;;  %v843_v16 = vpop.permute.xlu2 %842 }
  0xf2   :  { %v885_v22 = vmul.f32 %v828_v18, %v552_v17  ;;  %v1040_v24 = vpack.c.b16 %v1013_v20, %v1012_v13  ;;  %v515_v27 = vadd.f32 %v514_v23, %v425_v19  ;;  %v848_v23 = vpop.permute.xlu0 %847 }
  0xf4   :  { %v917_v25 = vpack.c.bf16 %v885_v22, %v885_v22  ;;  %v1524_v26 = vpack.c.bf16 %v885_v22, %v884_v12  ;;  %1144 = vmatmul.bf16.gmra.mxu2 %v1040_v24  ;;  %v870_v34 = vmul.f32 %v1896_v38, %v515_v27 }
  0xf6   :  { %1552 = vst [vmem:[%s2086_s4 + $0x60] sm:$0xff] %v1524_v26   ;;  %v1029_v30 = vunpack.c.l.b16 %v917_v25  ;;  %v902_v47 = vpack.c.bf16 %v870_v34, %v870_v34 }
  0xf7   :  { %v554_v32 = vpop.f32.mrf.mxu3 }
  0xf8   :  { %v1048_v33 = vpack.c.b16 %v1029_v30, %v1028_v28  ;;  %v427_v35 = vpop.f32.mrf.mxu0  ;;  %v555_v36 = vadd.f32 %v554_v32, %v1882_v43  ;;  %v1014_v38 = vunpack.c.l.b16 %v902_v47 }
  0xf9   :  { %v516_v37 = vpop.f32.mrf.mxu1 }
  0xfa   :  { %1184 = vmatmul.bf16.vlgmr.msra.gmra.mxu3 %v1048_v33  ;;  %v517_v39 = vadd.f32 %v516_v37, %v427_v35  ;;  %v886_v48 = vmul.f32 %v833_v40, %v555_v36 }
  0xfc   :  { %v871_v46 = vmul.f32 %v1900_v42, %v517_v39  ;;  %v918_v62 = vpack.c.bf16 %v886_v48, %v886_v48 }
  0xfe   :  { %v1489_v50 = vpack.c.bf16 %v871_v46, %v870_v34  ;;  %v903_v52 = vpack.c.bf16 %v871_v46, %v871_v46  ;;  %v1955_v34 = vpop.permute.xlu1 %812 }
  0xff   :  { %v556_v51 = vpop.f32.mrf.mxu3 }
 0x100   :  { %v557_v54 = vadd.f32 %v556_v51, %v1884_v61  ;;  %1545 = vst [vmem:[%s2086_s4 + $0x28] sm:$0xff] %v1489_v50   ;;  %v430_v43 = vpop.f32.mrf.mxu0  ;;  %v1015_v56 = vunpack.c.l.b16 %v903_v52  ;;  %v1030_v61 = vunpack.c.l.b16 %v918_v62 }
 0x101   :  { %v519_v58 = vpop.f32.mrf.mxu1 }
 0x102   :  { %v887_v57 = vmul.f32 %v838_v55, %v557_v54  ;;  %v1041_v63 = vpack.c.b16 %v1015_v56, %v1014_v38  ;;  %v520_v2 = vadd.f32 %v519_v58, %v430_v43 }
 0x104   :  { %v1529_v42 = vpack.c.bf16 %v887_v57, %v886_v48  ;;  %v919_v1 = vpack.c.bf16 %v887_v57, %v887_v57  ;;  %1149 = vmatmul.bf16.gmra.mxu2 %v1041_v63  ;;  %v872_v8 = vmul.f32 %v1902_v44, %v520_v2  ;;  %v853_v48 = vpop.permute.xlu0 %852 }
 0x106   :  { %1553 = vst [vmem:[%s2086_s4 + $0x68] sm:$0xff] %v1529_v42   ;;  %v1031_v3 = vunpack.c.l.b16 %v919_v1  ;;  %v904_v18 = vpack.c.bf16 %v872_v8, %v872_v8  ;;  %v858_v56 = vpop.permute.xlu1 %857 }
 0x107   :  { %v559_v5 = vpop.f32.mrf.mxu3 }
 0x108   :  { %v1049_v6 = vpack.c.b16 %v1031_v3, %v1030_v61  ;;  %v432_v10 = vpop.f32.mrf.mxu0  ;;  %v560_v11 = vadd.f32 %v559_v5, %v1889_v9  ;;  %v1016_v44 = vunpack.c.l.b16 %v904_v18 }
 0x109   :  { %v521_v12 = vpop.f32.mrf.mxu1 }
 0x10a   :  { %1189 = vmatmul.bf16.gmra.mxu3 %v1049_v6  ;;  %v522_v14 = vadd.f32 %v521_v12, %v432_v10  ;;  %v888_v19 = vmul.f32 %v843_v16, %v560_v11 }
 0x10c   :  { %v873_v17 = vmul.f32 %v1904_v49, %v522_v14  ;;  %v920_v27 = vpack.c.bf16 %v888_v19, %v888_v19 }
 0x10e   :  { %v1494_v13 = vpack.c.bf16 %v873_v17, %v872_v8  ;;  %v905_v21 = vpack.c.bf16 %v873_v17, %v873_v17 }
 0x10f   :  { %v561_v20 = vpop.f32.mrf.mxu3 }
 0x110   :  { %v562_v22 = vadd.f32 %v561_v20, %v1891_v29  ;;  %1546 = vst [vmem:[%s2086_s4 + $0x30] sm:$0xff] %v1494_v13   ;;  %v435_v9 = vpop.f32.mrf.mxu0  ;;  %v1017_v24 = vunpack.c.l.b16 %v905_v21  ;;  %v1032_v29 = vunpack.c.l.b16 %v920_v27 }
 0x111   :  { %v524_v26 = vpop.f32.mrf.mxu1 }
 0x112   :  { %v889_v25 = vmul.f32 %v848_v23, %v562_v22  ;;  %v1042_v28 = vpack.c.b16 %v1017_v24, %v1016_v44  ;;  %v525_v32 = vadd.f32 %v524_v26, %v435_v9 }
 0x114   :  { %v1534_v49 = vpack.c.bf16 %v889_v25, %v888_v19  ;;  %v921_v30 = vpack.c.bf16 %v889_v25, %v889_v25  ;;  %1154 = vmatmul.bf16.gmra.mxu2 %v1042_v28  ;;  %v874_v37 = vmul.f32 %v1911_v59, %v525_v32 }
 0x116   :  { %1554 = vst [vmem:[%s2086_s4 + $0x70] sm:$0xff] %v1534_v49   ;;  %v1033_v33 = vunpack.c.l.b16 %v921_v30  ;;  %v906_v51 = vpack.c.bf16 %v874_v37, %v874_v37 }
 0x117   :  { %v564_v35 = vpop.f32.mrf.mxu3 }
 0x118   :  { %v1050_v36 = vpack.c.b16 %v1033_v33, %v1032_v29  ;;  %v437_v39 = vpop.f32.mrf.mxu0  ;;  %v565_v40 = vadd.f32 %v564_v35, %v1898_v41  ;;  %v1018_v41 = vunpack.c.l.b16 %v906_v51 }
 0x119   :  { %v526_v46 = vpop.f32.mrf.mxu1 }
 0x11a   :  { %1194 = vmatmul.bf16.gmra.mxu3 %v1050_v36  ;;  %v527_v47 = vadd.f32 %v526_v46, %v437_v39  ;;  %v890_v52 = vmul.f32 %v853_v48, %v565_v40 }
 0x11c   :  { %v875_v50 = vmul.f32 %v1913_v60, %v527_v47  ;;  %v922_v63 = vpack.c.bf16 %v890_v52, %v890_v52 }
 0x11e   :  { %v1499_v54 = vpack.c.bf16 %v875_v50, %v874_v37  ;;  %v907_v43 = vpack.c.bf16 %v875_v50, %v875_v50 }
 0x11f   :  { %v566_v55 = vpop.f32.mrf.mxu3 }
 0x120   :  { %v567_v38 = vadd.f32 %v566_v55, %v1906_v53  ;;  %1547 = vst [vmem:[%s2086_s4 + $0x38] sm:$0xff] %v1499_v54   ;;  %v440_v59 = vpop.f32.mrf.mxu0  ;;  %v1019_v57 = vunpack.c.l.b16 %v907_v43  ;;  %v1034_v53 = vunpack.c.l.b16 %v922_v63 }
 0x121   :  { %v529_v62 = vpop.f32.mrf.mxu1 }
 0x122   :  { %v891_v58 = vmul.f32 %v858_v56, %v567_v38  ;;  %v1043_v42 = vpack.c.b16 %v1019_v57, %v1018_v41  ;;  %v530_v2 = vadd.f32 %v529_v62, %v440_v59 }
 0x124   :  { %v1539_v60 = vpack.c.bf16 %v891_v58, %v890_v52  ;;  %v923_v1 = vpack.c.bf16 %v891_v58, %v891_v58  ;;  %1159 = vmatmul.bf16.gmra.mxu2 %v1043_v42  ;;  %v876_v5 = vmul.f32 %v1915_v0, %v530_v2 }
 0x126   :  { %1555 = vst [vmem:[%s2086_s4 + $0x78] sm:$0xff] %v1539_v60   ;;  %v1035_v61 = vunpack.c.l.b16 %v923_v1  ;;  %v908_v12 = vpack.c.bf16 %v876_v5, %v876_v5 }
 0x128   :  { %v1051_v3 = vpack.c.b16 %v1035_v61, %v1034_v53  ;;  %v442_v6 = vpop.f32.mrf.mxu0  ;;  %v1020_v18 = vunpack.c.l.b16 %v908_v12  ;;  %v818_v61 = vpop.permute.xlu2 %817 }
 0x129   :  { %v531_v8 = vpop.f32.mrf.mxu1 }
 0x12a   :  { %1199 = vmatmul.bf16.gmra.mxu3 %v1051_v3  ;;  %v532_v10 = vadd.f32 %v531_v8, %v442_v6 }
 0x12c   :  { %v877_v11 = vmul.f32 %v1918_v7, %v532_v10 }
 0x12e   :  { %v1504_v14 = vpack.c.bf16 %v877_v11, %v876_v5  ;;  %v909_v16 = vpack.c.bf16 %v877_v11, %v877_v11 }
 0x130   :  { %1548 = vst [vmem:[%s2086_s4 + $0x40] sm:$0xff] %v1504_v14   ;;  %v445_v17 = vpop.f32.mrf.mxu0  ;;  %v1021_v19 = vunpack.c.l.b16 %v909_v16 }
 0x131   :  { %v534_v13 = vpop.f32.mrf.mxu1 }
 0x132   :  { %v1044_v20 = vpack.c.b16 %v1021_v19, %v1020_v18  ;;  %v535_v21 = vadd.f32 %v534_v13, %v445_v17 }
 0x134   :  { %1164 = vmatmul.bf16.gmra.mxu2 %v1044_v20  ;;  %v878_v22 = vmul.f32 %v1927_v31, %v535_v21 }
 0x136   :  { %v910_v26 = vpack.c.bf16 %v878_v22, %v878_v22 }
 0x137   :  { %v1125_v0 = vpop.f32.mrf.mxu2 }
 0x138   :  { %vm1205_vm0 = vcmp.ge.f32.partialorder %v1125_v0, 0.0  ;;  %v1237_v23 = vmul.f32 0.2, %v1125_v0  ;;  %v447_v7 = vpop.f32.mrf.mxu0  ;;  %v1022_v32 = vunpack.c.l.b16 %v910_v26 }
 0x139   :  { %v536_v9 = vpop.f32.mrf.mxu1 }
 0x13a   :  { %v1269_v44 = vsel %vm1205_vm0, %v1125_v0, %v1237_v23  ;;  %v537_v24 = vadd.f32 %v536_v9, %v447_v7 }
 0x13b   :  { %1301 = vst [vmem:[%s2087_s5] sm:$0xff] %v1269_v44 }
 0x13c   :  { %v879_v25 = vmul.f32 %v1931_v45, %v537_v24 }
 0x13e   :  { %v1509_v27 = vpack.c.bf16 %v879_v25, %v878_v22  ;;  %v911_v28 = vpack.c.bf16 %v879_v25, %v879_v25 }
 0x13f   :  { %v1127_v49 = vpop.f32.mrf.mxu2 }
 0x140   :  { %1549 = vst [vmem:[%s2086_s4 + $0x48] sm:$0xff] %v1509_v27   ;;  %vm1206_vm1 = vcmp.ge.f32.partialorder %v1127_v49, 0.0  ;;  %v1238_v31 = vmul.f32 0.2, %v1127_v49  ;;  %v450_v30 = vpop.f32.mrf.mxu0  ;;  %v1023_v29 = vunpack.c.l.b16 %v911_v28 }
 0x141   :  { %v539_v33 = vpop.f32.mrf.mxu1 }
 0x142   :  { %v1270_v35 = vsel %vm1206_vm1, %v1127_v49, %v1238_v31  ;;  %v1045_v36 = vpack.c.b16 %v1023_v29, %v1022_v32  ;;  %v540_v45 = vadd.f32 %v539_v33, %v450_v30 }
 0x143   :  { %1302 = vst [vmem:[%s2087_s5 + $0x8] sm:$0xff] %v1270_v35 }
 0x144   :  { %1169 = vmatmul.bf16.gmra.mxu2 %v1045_v36  ;;  %v880_v39 = vmul.f32 %v1941_v4, %v540_v45 }
 0x146   :  { %v912_v52 = vpack.c.bf16 %v880_v39, %v880_v39 }
 0x147   :  { %v1130_v37 = vpop.f32.mrf.mxu2 }
 0x148   :  { %vm1207_vm2 = vcmp.ge.f32.partialorder %v1130_v37, 0.0  ;;  %v1239_v40 = vmul.f32 0.2, %v1130_v37  ;;  %v452_v46 = vpop.f32.mrf.mxu0  ;;  %v1024_v56 = vunpack.c.l.b16 %v912_v52 }
 0x149   :  { %v541_v47 = vpop.f32.mrf.mxu1 }
 0x14a   :  { %v1271_v48 = vsel %vm1207_vm2, %v1130_v37, %v1239_v40  ;;  %v542_v50 = vadd.f32 %v541_v47, %v452_v46 }
 0x14b   :  { %1303 = vst [vmem:[%s2087_s5 + $0x10] sm:$0xff] %v1271_v48 }
 0x14c   :  { %v881_v51 = vmul.f32 %v1945_v15, %v542_v50 }
 0x14e   :  { %v1514_v54 = vpack.c.bf16 %v881_v51, %v880_v39  ;;  %v913_v55 = vpack.c.bf16 %v881_v51, %v881_v51 }
 0x14f   :  { %v1132_v43 = vpop.f32.mrf.mxu2 }
 0x150   :  { %1550 = vst [vmem:[%s2086_s4 + $0x50] sm:$0xff] %v1514_v54   ;;  %vm1208_vm3 = vcmp.ge.f32.partialorder %v1132_v43, 0.0  ;;  %v1240_v4 = vmul.f32 0.2, %v1132_v43  ;;  %v455_v38 = vpop.f32.mrf.mxu0  ;;  %v1025_v59 = vunpack.c.l.b16 %v913_v55 }
 0x151   :  { %v544_v41 = vpop.f32.mrf.mxu1 }
 0x152   :  { %v1272_v57 = vsel %vm1208_vm3, %v1132_v43, %v1240_v4  ;;  %v1046_v58 = vpack.c.b16 %v1025_v59, %v1024_v56  ;;  %v545_v15 = vadd.f32 %v544_v41, %v455_v38 }
 0x153   :  { %1304 = vst [vmem:[%s2087_s5 + $0x18] sm:$0xff] %v1272_v57 }
 0x154   :  { %1174 = vmatmul.bf16.gmra.mxu2 %v1046_v58  ;;  %v882_v63 = vmul.f32 %v1955_v34, %v545_v15 }
 0x156   :  { %v914_v5 = vpack.c.bf16 %v882_v63, %v882_v63 }
 0x157   :  { %v1135_v62 = vpop.f32.mrf.mxu2 }
 0x158   :  { %vm1209_vm4 = vcmp.ge.f32.partialorder %v1135_v62, 0.0  ;;  %v1241_v42 = vmul.f32 0.2, %v1135_v62  ;;  %v457_v60 = vpop.f32.mrf.mxu0  ;;  %v1026_v11 = vunpack.c.l.b16 %v914_v5 }
 0x159   :  { %v546_v1 = vpop.f32.mrf.mxu1 }
 0x15a   :  { %v1273_v2 = vsel %vm1209_vm4, %v1135_v62, %v1241_v42  ;;  %v547_v53 = vadd.f32 %v546_v1, %v457_v60 }
 0x15b   :  { %1305 = vst [vmem:[%s2087_s5 + $0x20] sm:$0xff] %v1273_v2 }
 0x15c   :  { %v883_v3 = vmul.f32 %v818_v61, %v547_v53 }
 0x15e   :  { %v1519_v6 = vpack.c.bf16 %v883_v3, %v882_v63  ;;  %v915_v8 = vpack.c.bf16 %v883_v3, %v883_v3 }
 0x15f   :  { %v1137_v10 = vpop.f32.mrf.mxu2 }
 0x160   :  { %1551 = vst [vmem:[%s2086_s4 + $0x58] sm:$0xff] %v1519_v6   ;;  %vm1210_vm5 = vcmp.ge.f32.partialorder %v1137_v10, 0.0  ;;  %v1242_v34 = vmul.f32 0.2, %v1137_v10  ;;  %v1027_v12 = vunpack.c.l.b16 %v915_v8 }
 0x162   :  { %v1274_v14 = vsel %vm1210_vm5, %v1137_v10, %v1242_v34  ;;  %v1047_v16 = vpack.c.b16 %v1027_v12, %v1026_v11 }
 0x163   :  { %1306 = vst [vmem:[%s2087_s5 + $0x28] sm:$0xff] %v1274_v14 }
 0x164   :  { %1179 = vmatmul.bf16.gmra.mxu2 %v1047_v16 }
 0x167   :  { %v1140_v17 = vpop.f32.mrf.mxu2 }
 0x168   :  { %vm1211_vm6 = vcmp.ge.f32.partialorder %v1140_v17, 0.0  ;;  %v1243_v18 = vmul.f32 0.2, %v1140_v17 }
 0x16a   :  { %v1275_v19 = vsel %vm1211_vm6, %v1140_v17, %v1243_v18 }
 0x16b   :  { %1307 = vst [vmem:[%s2087_s5 + $0x30] sm:$0xff] %v1275_v19 }
 0x16f   :  { %v1142_v13 = vpop.f32.mrf.mxu2 }
 0x170   :  { %vm1212_vm7 = vcmp.ge.f32.partialorder %v1142_v13, 0.0  ;;  %v1244_v20 = vmul.f32 0.2, %v1142_v13 }
 0x172   :  { %v1276_v21 = vsel %vm1212_vm7, %v1142_v13, %v1244_v20 }
 0x173   :  { %1308 = vst [vmem:[%s2087_s5 + $0x38] sm:$0xff] %v1276_v21 }
 0x177   :  { %v1145_v0 = vpop.f32.mrf.mxu2 }
 0x178   :  { %vm1213_vm8 = vcmp.ge.f32.partialorder %v1145_v0, 0.0  ;;  %v1245_v22 = vmul.f32 0.2, %v1145_v0 }
 0x17a   :  { %v1277_v23 = vsel %vm1213_vm8, %v1145_v0, %v1245_v22 }
 0x17b   :  { %1309 = vst [vmem:[%s2087_s5 + $0x40] sm:$0xff] %v1277_v23 }
 0x17d   :  { %v1185_v7 = vpop.f32.mrf.mxu3 }
 0x17e   :  { %vm1229_vm9 = vcmp.ge.f32.partialorder %v1185_v7, 0.0  ;;  %v1261_v9 = vmul.f32 0.2, %v1185_v7 }
 0x17f   :  { %v1147_v24 = vpop.f32.mrf.mxu2 }
 0x180   :  { %v1293_v44 = vsel %vm1229_vm9, %v1185_v7, %v1261_v9  ;;  %vm1214_vm10 = vcmp.ge.f32.partialorder %v1147_v24, 0.0  ;;  %v1246_v25 = vmul.f32 0.2, %v1147_v24 }
 0x181   :  { %1325 = vst [vmem:[%s2087_s5 + $0xc0] sm:$0xff] %v1293_v44 }
 0x182   :  { %v1278_v26 = vsel %vm1214_vm10, %v1147_v24, %v1246_v25 }
 0x183   :  { %1310 = vst [vmem:[%s2087_s5 + $0x48] sm:$0xff] %v1278_v26 }
 0x185   :  { %v1187_v27 = vpop.f32.mrf.mxu3 }
 0x186   :  { %vm1230_vm11 = vcmp.ge.f32.partialorder %v1187_v27, 0.0  ;;  %v1262_v28 = vmul.f32 0.2, %v1187_v27 }
 0x187   :  { %v1150_v31 = vpop.f32.mrf.mxu2 }
 0x188   :  { %v1294_v49 = vsel %vm1230_vm11, %v1187_v27, %v1262_v28  ;;  %vm1215_vm12 = vcmp.ge.f32.partialorder %v1150_v31, 0.0  ;;  %v1247_v30 = vmul.f32 0.2, %v1150_v31 }
 0x189   :  { %1326 = vst [vmem:[%s2087_s5 + $0xc8] sm:$0xff] %v1294_v49 }
 0x18a   :  { %v1279_v32 = vsel %vm1215_vm12, %v1150_v31, %v1247_v30 }
 0x18b   :  { %1311 = vst [vmem:[%s2087_s5 + $0x50] sm:$0xff] %v1279_v32 }
 0x18d   :  { %v1190_v29 = vpop.f32.mrf.mxu3 }
 0x18e   :  { %vm1231_vm13 = vcmp.ge.f32.partialorder %v1190_v29, 0.0  ;;  %v1263_v33 = vmul.f32 0.2, %v1190_v29 }
 0x18f   :  { %v1152_v36 = vpop.f32.mrf.mxu2 }
 0x190   :  { %v1295_v35 = vsel %vm1231_vm13, %v1190_v29, %v1263_v33  ;;  %vm1216_vm14 = vcmp.ge.f32.partialorder %v1152_v36, 0.0  ;;  %v1248_v45 = vmul.f32 0.2, %v1152_v36 }
 0x191   :  { %1327 = vst [vmem:[%s2087_s5 + $0xd0] sm:$0xff] %v1295_v35 }
 0x192   :  { %v1280_v37 = vsel %vm1216_vm14, %v1152_v36, %v1248_v45 }
 0x193   :  { %1312 = vst [vmem:[%s2087_s5 + $0x58] sm:$0xff] %v1280_v37 }
 0x195   :  { %v1192_v39 = vpop.f32.mrf.mxu3 }
 0x196   :  { %vm1232_vm15 = vcmp.ge.f32.partialorder %v1192_v39, 0.0  ;;  %v1264_v40 = vmul.f32 0.2, %v1192_v39 }
 0x197   :  { %v1155_v47 = vpop.f32.mrf.mxu2 }
 0x198   :  { %v1296_v46 = vsel %vm1232_vm15, %v1192_v39, %v1264_v40  ;;  %vm1217_vm0 = vcmp.ge.f32.partialorder %v1155_v47, 0.0  ;;  %v1249_v48 = vmul.f32 0.2, %v1155_v47 }
 0x199   :  { %1328 = vst [vmem:[%s2087_s5 + $0xd8] sm:$0xff] %v1296_v46 }
 0x19a   :  { %v1281_v50 = vsel %vm1217_vm0, %v1155_v47, %v1249_v48 }
 0x19b   :  { %1313 = vst [vmem:[%s2087_s5 + $0x60] sm:$0xff] %v1281_v50 }
 0x19d   :  { %v1195_v51 = vpop.f32.mrf.mxu3 }
 0x19e   :  { %vm1233_vm1 = vcmp.ge.f32.partialorder %v1195_v51, 0.0  ;;  %v1265_v52 = vmul.f32 0.2, %v1195_v51 }
 0x19f   :  { %v1157_v55 = vpop.f32.mrf.mxu2 }
 0x1a0   :  { %v1297_v54 = vsel %vm1233_vm1, %v1195_v51, %v1265_v52  ;;  %vm1218_vm2 = vcmp.ge.f32.partialorder %v1157_v55, 0.0  ;;  %v1250_v43 = vmul.f32 0.2, %v1157_v55 }
 0x1a1   :  { %1329 = vst [vmem:[%s2087_s5 + $0xe0] sm:$0xff] %v1297_v54 }
 0x1a2   :  { %v1282_v4 = vsel %vm1218_vm2, %v1157_v55, %v1250_v43 }
 0x1a3   :  { %1314 = vst [vmem:[%s2087_s5 + $0x68] sm:$0xff] %v1282_v4 }
 0x1a5   :  { %v1197_v38 = vpop.f32.mrf.mxu3 }
 0x1a6   :  { %vm1234_vm3 = vcmp.ge.f32.partialorder %v1197_v38, 0.0  ;;  %v1266_v56 = vmul.f32 0.2, %v1197_v38 }
 0x1a7   :  { %v1160_v41 = vpop.f32.mrf.mxu2 }
 0x1a8   :  { %v1298_v59 = vsel %vm1234_vm3, %v1197_v38, %v1266_v56  ;;  %vm1219_vm4 = vcmp.ge.f32.partialorder %v1160_v41, 0.0  ;;  %v1251_v57 = vmul.f32 0.2, %v1160_v41 }
 0x1a9   :  { %1330 = vst [vmem:[%s2087_s5 + $0xe8] sm:$0xff] %v1298_v59 }
 0x1aa   :  { %v1283_v58 = vsel %vm1219_vm4, %v1160_v41, %v1251_v57 }
 0x1ab   :  { %1315 = vst [vmem:[%s2087_s5 + $0x70] sm:$0xff] %v1283_v58 }
 0x1ad   :  { %v1200_v15 = vpop.f32.mrf.mxu3 }
 0x1ae   :  { %vm1235_vm5 = vcmp.ge.f32.partialorder %v1200_v15, 0.0  ;;  %v1267_v62 = vmul.f32 0.2, %v1200_v15 }
 0x1af   :  { %v1162_v42 = vpop.f32.mrf.mxu2 }
 0x1b0   :  { %v1299_v63 = vsel %vm1235_vm5, %v1200_v15, %v1267_v62  ;;  %vm1220_vm6 = vcmp.ge.f32.partialorder %v1162_v42, 0.0  ;;  %v1252_v60 = vmul.f32 0.2, %v1162_v42 }
 0x1b1   :  { %1331 = vst [vmem:[%s2087_s5 + $0xf0] sm:$0xff] %v1299_v63 }
 0x1b2   :  { %v1284_v1 = vsel %vm1220_vm6, %v1162_v42, %v1252_v60 }
 0x1b3   :  { %1316 = vst [vmem:[%s2087_s5 + $0x78] sm:$0xff] %v1284_v1 }
 0x1b5   :  { %v1202_v2 = vpop.f32.mrf.mxu3 }
 0x1b6   :  { %vm1236_vm7 = vcmp.ge.f32.partialorder %v1202_v2, 0.0  ;;  %v1268_v53 = vmul.f32 0.2, %v1202_v2 }
 0x1b7   :  { %v1165_v3 = vpop.f32.mrf.mxu2 }
 0x1b8   :  { %v1300_v61 = vsel %vm1236_vm7, %v1202_v2, %v1268_v53  ;;  %vm1221_vm8 = vcmp.ge.f32.partialorder %v1165_v3, 0.0  ;;  %v1253_v5 = vmul.f32 0.2, %v1165_v3 }
 0x1b9   :  { %1332 = vst [vmem:[%s2087_s5 + $0xf8] sm:$0xff] %v1300_v61 }
 0x1ba   :  { %v1285_v6 = vsel %vm1221_vm8, %v1165_v3, %v1253_v5 }
 0x1bb   :  { %1317 = vst [vmem:[%s2087_s5 + $0x80] sm:$0xff] %v1285_v6 }
 0x1bf   :  { %v1167_v8 = vpop.f32.mrf.mxu2 }
 0x1c0   :  { %vm1222_vm9 = vcmp.ge.f32.partialorder %v1167_v8, 0.0  ;;  %v1254_v10 = vmul.f32 0.2, %v1167_v8 }
 0x1c2   :  { %v1286_v34 = vsel %vm1222_vm9, %v1167_v8, %v1254_v10 }
 0x1c3   :  { %1318 = vst [vmem:[%s2087_s5 + $0x88] sm:$0xff] %v1286_v34 }
 0x1c7   :  { %v1170_v11 = vpop.f32.mrf.mxu2 }
 0x1c8   :  { %vm1223_vm10 = vcmp.ge.f32.partialorder %v1170_v11, 0.0  ;;  %v1255_v12 = vmul.f32 0.2, %v1170_v11 }
 0x1ca   :  { %v1287_v14 = vsel %vm1223_vm10, %v1170_v11, %v1255_v12 }
 0x1cb   :  { %1319 = vst [vmem:[%s2087_s5 + $0x90] sm:$0xff] %v1287_v14 }
 0x1cf   :  { %v1172_v16 = vpop.f32.mrf.mxu2 }
 0x1d0   :  { %vm1224_vm11 = vcmp.ge.f32.partialorder %v1172_v16, 0.0  ;;  %v1256_v17 = vmul.f32 0.2, %v1172_v16 }
 0x1d2   :  { %v1288_v18 = vsel %vm1224_vm11, %v1172_v16, %v1256_v17 }
 0x1d3   :  { %1320 = vst [vmem:[%s2087_s5 + $0x98] sm:$0xff] %v1288_v18 }
 0x1d7   :  { %v1175_v19 = vpop.f32.mrf.mxu2 }
 0x1d8   :  { %vm1225_vm12 = vcmp.ge.f32.partialorder %v1175_v19, 0.0  ;;  %v1257_v13 = vmul.f32 0.2, %v1175_v19 }
 0x1da   :  { %v1289_v20 = vsel %vm1225_vm12, %v1175_v19, %v1257_v13 }
 0x1db   :  { %1321 = vst [vmem:[%s2087_s5 + $0xa0] sm:$0xff] %v1289_v20 }
 0x1df   :  { %v1177_v21 = vpop.f32.mrf.mxu2 }
 0x1e0   :  { %vm1226_vm13 = vcmp.ge.f32.partialorder %v1177_v21, 0.0  ;;  %v1258_v0 = vmul.f32 0.2, %v1177_v21 }
 0x1e2   :  { %v1290_v22 = vsel %vm1226_vm13, %v1177_v21, %v1258_v0 }
 0x1e3   :  { %1322 = vst [vmem:[%s2087_s5 + $0xa8] sm:$0xff] %v1290_v22 }
 0x1e7   :  { %v1180_v23 = vpop.f32.mrf.mxu2 }
 0x1e8   :  { %vm1227_vm14 = vcmp.ge.f32.partialorder %v1180_v23, 0.0  ;;  %v1259_v7 = vmul.f32 0.2, %v1180_v23 }
 0x1ea   :  { %v1291_v9 = vsel %vm1227_vm14, %v1180_v23, %v1259_v7 }
 0x1eb   :  { %1323 = vst [vmem:[%s2087_s5 + $0xb0] sm:$0xff] %v1291_v9 }
 0x1ef   :  { %v1182_v44 = vpop.f32.mrf.mxu2 }
 0x1f0   :  { %vm1228_vm15 = vcmp.ge.f32.partialorder %v1182_v44, 0.0  ;;  %v1260_v24 = vmul.f32 0.2, %v1182_v44 }
 0x1f2   :  { %v1292_v25 = vsel %vm1228_vm15, %v1182_v44, %v1260_v24 }
 0x1f3   :  { %1324 = vst [vmem:[%s2087_s5 + $0xb8] sm:$0xff] %v1292_v25 }

// kernel: unigat_conv.5
= control target key start
LH: loop header
LB: loop body
LE: loop exit
PB: predicated region body
PF: predicated region fallthrough
CT: control target
= control target key end

     0   :  { %s2948_s0 = inlined_call_operand.vmem [shape: s8[256,256], index: 0, kind: input, shape index: {}]   ;;  %s2949_s1 = inlined_call_operand.vmem [shape: bf16[256,256], index: 1, kind: input, shape index: {}]   ;;  %s2950_s2 = inlined_call_operand.vmem [shape: bf16[256,128], index: 2, kind: input, shape index: {}]   ;;  %s2951_s3 = inlined_call_operand.hbm [shape: f32[256,128], index: 3, kind: output, shape index: {}]  }
   0x1   :  { %v91_v0 = vld [vmem:[%s2948_s0 + $0x40] sm:$0xff]  ;;  %v92_v1 = vld [vmem:[%s2948_s0 + $0x48] sm:$0xff] }
   0x2   :  { %v83_v2 = vld [vmem:[%s2948_s0] sm:$0xff]  ;;  %v131_v3 = vunpack.c.0.s8 %v91_v0  ;;  %v132_v4 = vunpack.c.0.s8 %v92_v1  ;;  %v133_v5 = vunpack.c.1.s8 %v91_v0  ;;  %v134_v6 = vunpack.c.1.s8 %v92_v1  ;;  %v84_v7 = vld [vmem:[%s2948_s0 + $0x8] sm:$0xff] }
   0x3   :  { %v99_v8 = vunpack.c.0.s8 %v83_v2  ;;  %v100_v9 = vunpack.c.0.s8 %v84_v7  ;;  %v101_v10 = vunpack.c.1.s8 %v83_v2  ;;  %v102_v11 = vunpack.c.1.s8 %v84_v7 }
   0x4   :  { %8 = vsyncpa [#allocation4], 0  ;;  %v195_v12 = vcvt.s32.f32 %v131_v3  ;;  %v196_v13 = vcvt.s32.f32 %v132_v4  ;;  %v197_v14 = vcvt.s32.f32 %v133_v5  ;;  %v198_v15 = vcvt.s32.f32 %v134_v6  ;;  %v93_v44 = vld [vmem:[%s2948_s0 + $0x50] sm:$0xff]  ;;  %v94_v45 = vld [vmem:[%s2948_s0 + $0x58] sm:$0xff]  ;;  %s1888_s10 = sshll.u32 %s2951_s3, 4  ;;  %s2297_s11 = smov 128   ;;  %s1889_s10 = int_to_ptr.hbm [resolvable:$true] %s1888_s10 }
   0x5   :  { %v163_v16 = vcvt.s32.f32 %v99_v8  ;;  %v164_v17 = vcvt.s32.f32 %v100_v9  ;;  %v165_v18 = vcvt.s32.f32 %v101_v10  ;;  %v166_v19 = vcvt.s32.f32 %v102_v11  ;;  %v85_v46 = vld [vmem:[%s2948_s0 + $0x10] sm:$0xff]  ;;  %v86_v47 = vld [vmem:[%s2948_s0 + $0x18] sm:$0xff]  ;;  %s2298_s12 = smov 8  }
   0x6   :  { %v243_v20 = vpack.c.bf16 %v197_v14, %v195_v12  ;;  %v244_v21 = vpack.c.bf16 %v198_v15, %v196_v13  ;;  %v135_v24 = vunpack.c.2.s8 %v91_v0  ;;  %v136_v25 = vunpack.c.2.s8 %v92_v1 }
   0x7   :  { %v227_v22 = vpack.c.bf16 %v165_v18, %v163_v16  ;;  %v228_v23 = vpack.c.bf16 %v166_v19, %v164_v17  ;;  %v137_v26 = vunpack.c.3.s8 %v91_v0  ;;  %v138_v27 = vunpack.c.3.s8 %v92_v1 }
   0x8   :  { %379 = vxpose.binary.xlu1.c.b16.start [1/16] %v244_v21, %v243_v20, 128  ;;  %v103_v28 = vunpack.c.2.s8 %v83_v2  ;;  %v104_v29 = vunpack.c.2.s8 %v84_v7  ;;  %v105_v30 = vunpack.c.3.s8 %v83_v2  ;;  %v106_v31 = vunpack.c.3.s8 %v84_v7 }
   0x9   :  { %355 = vxpose.binary.xlu0.c.b16.start [1/16] %v228_v23, %v227_v22, 128  ;;  %v199_v32 = vcvt.s32.f32 %v135_v24  ;;  %v200_v33 = vcvt.s32.f32 %v136_v25  ;;  %v201_v34 = vcvt.s32.f32 %v137_v26  ;;  %v202_v35 = vcvt.s32.f32 %v138_v27  ;;  %v95_v24 = vld [vmem:[%s2948_s0 + $0x60] sm:$0xff]  ;;  %v96_v25 = vld [vmem:[%s2948_s0 + $0x68] sm:$0xff] }
   0xa   :  { %v167_v36 = vcvt.s32.f32 %v103_v28  ;;  %v168_v37 = vcvt.s32.f32 %v104_v29  ;;  %v169_v38 = vcvt.s32.f32 %v105_v30  ;;  %v170_v39 = vcvt.s32.f32 %v106_v31  ;;  %v87_v26 = vld [vmem:[%s2948_s0 + $0x20] sm:$0xff]  ;;  %v88_v27 = vld [vmem:[%s2948_s0 + $0x28] sm:$0xff] }
   0xb   :  { %v245_v40 = vpack.c.bf16 %v201_v34, %v199_v32  ;;  %v246_v41 = vpack.c.bf16 %v202_v35, %v200_v33  ;;  %v139_v48 = vunpack.c.0.s8 %v93_v44  ;;  %v140_v49 = vunpack.c.0.s8 %v94_v45 }
   0xc   :  { %v229_v42 = vpack.c.bf16 %v169_v38, %v167_v36  ;;  %v230_v43 = vpack.c.bf16 %v170_v39, %v168_v37  ;;  %v141_v50 = vunpack.c.1.s8 %v93_v44  ;;  %v142_v51 = vunpack.c.1.s8 %v94_v45 }
   0xd   :  { %v107_v52 = vunpack.c.0.s8 %v85_v46  ;;  %v108_v53 = vunpack.c.0.s8 %v86_v47  ;;  %v109_v54 = vunpack.c.1.s8 %v85_v46  ;;  %v110_v55 = vunpack.c.1.s8 %v86_v47 }
   0xe   :  { %v203_v56 = vcvt.s32.f32 %v139_v48  ;;  %v204_v57 = vcvt.s32.f32 %v140_v49  ;;  %v205_v58 = vcvt.s32.f32 %v141_v50  ;;  %v206_v59 = vcvt.s32.f32 %v142_v51 }
   0xf   :  { %v171_v60 = vcvt.s32.f32 %v107_v52  ;;  %v172_v61 = vcvt.s32.f32 %v108_v53  ;;  %v173_v62 = vcvt.s32.f32 %v109_v54  ;;  %v174_v63 = vcvt.s32.f32 %v110_v55 }
  0x10   :  { %v247_v0 = vpack.c.bf16 %v205_v58, %v203_v56  ;;  %v248_v1 = vpack.c.bf16 %v206_v59, %v204_v57  ;;  %v143_v4 = vunpack.c.2.s8 %v93_v44  ;;  %v144_v5 = vunpack.c.2.s8 %v94_v45 }
  0x11   :  { %v231_v2 = vpack.c.bf16 %v173_v62, %v171_v60  ;;  %v232_v3 = vpack.c.bf16 %v174_v63, %v172_v61  ;;  %v145_v6 = vunpack.c.3.s8 %v93_v44  ;;  %v146_v7 = vunpack.c.3.s8 %v94_v45 }
  0x12   :  { %v111_v8 = vunpack.c.2.s8 %v85_v46  ;;  %v112_v9 = vunpack.c.2.s8 %v86_v47  ;;  %v113_v10 = vunpack.c.3.s8 %v85_v46  ;;  %v114_v11 = vunpack.c.3.s8 %v86_v47 }
  0x13   :  { %v207_v12 = vcvt.s32.f32 %v143_v4  ;;  %v208_v13 = vcvt.s32.f32 %v144_v5  ;;  %v209_v14 = vcvt.s32.f32 %v145_v6  ;;  %v210_v15 = vcvt.s32.f32 %v146_v7  ;;  %v2358_v4 = vld [vmem:[%s2948_s0 + $0x70] sm:$0xff]  ;;  %v2363_v5 = vld [vmem:[%s2948_s0 + $0x78] sm:$0xff] }
  0x14   :  { %v175_v16 = vcvt.s32.f32 %v111_v8  ;;  %v176_v17 = vcvt.s32.f32 %v112_v9  ;;  %v177_v18 = vcvt.s32.f32 %v113_v10  ;;  %v178_v19 = vcvt.s32.f32 %v114_v11  ;;  %v2368_v6 = vld [vmem:[%s2948_s0 + $0x30] sm:$0xff]  ;;  %v2373_v7 = vld [vmem:[%s2948_s0 + $0x38] sm:$0xff] }
  0x15   :  { %v249_v20 = vpack.c.bf16 %v209_v14, %v207_v12  ;;  %v250_v21 = vpack.c.bf16 %v210_v15, %v208_v13  ;;  %v147_v28 = vunpack.c.0.s8 %v95_v24  ;;  %v148_v29 = vunpack.c.0.s8 %v96_v25  ;;  %v1958_v8 = vld [vmem:[%s2949_s1 + $0x70] sm:$0xf]  ;;  %v2043_v9 = vld [vmem:[%s2949_s1 + $0x74] sm:$0xf0]  ;;  %v2042_v14 = vld [vmem:[%s2949_s1 + $0x74] sm:$0xf] }
  0x16   :  { %v233_v22 = vpack.c.bf16 %v177_v18, %v175_v16  ;;  %v234_v23 = vpack.c.bf16 %v178_v19, %v176_v17  ;;  %v149_v30 = vunpack.c.1.s8 %v95_v24  ;;  %v150_v31 = vunpack.c.1.s8 %v96_v25  ;;  %v2022_v10 = vld [vmem:[%s2949_s1 + $0xf0] sm:$0xf]  ;;  %v2059_v13 = vld [vmem:[%s2949_s1 + $0xf4] sm:$0xf0]  ;;  %v1960_v15 = vld [vmem:[%s2949_s1 + $0x78] sm:$0xf0] }
  0x17   :  { %v115_v32 = vunpack.c.0.s8 %v87_v26  ;;  %v116_v33 = vunpack.c.0.s8 %v88_v27  ;;  %v117_v34 = vunpack.c.1.s8 %v87_v26  ;;  %v118_v35 = vunpack.c.1.s8 %v88_v27 }
  0x18   :  { %380 = vxpose.binary.xlu1.c.b16.cont [2/16] %v246_v41, %v245_v40, 128  ;;  %v211_v36 = vcvt.s32.f32 %v147_v28  ;;  %v212_v37 = vcvt.s32.f32 %v148_v29  ;;  %v213_v38 = vcvt.s32.f32 %v149_v30  ;;  %v214_v39 = vcvt.s32.f32 %v150_v31  ;;  %v2014_v28 = vld [vmem:[%s2949_s1 + $0xe0] sm:$0xf]  ;;  %v2057_v29 = vld [vmem:[%s2949_s1 + $0xe4] sm:$0xf0] }
  0x19   :  { %356 = vxpose.binary.xlu0.c.b16.cont [2/16] %v230_v43, %v229_v42, 128  ;;  %v179_v40 = vcvt.s32.f32 %v115_v32  ;;  %v180_v41 = vcvt.s32.f32 %v116_v33  ;;  %v181_v42 = vcvt.s32.f32 %v117_v34  ;;  %v182_v43 = vcvt.s32.f32 %v118_v35  ;;  %v2040_v34 = vld [vmem:[%s2949_s1 + $0x64] sm:$0xf]  ;;  %v1952_v35 = vld [vmem:[%s2949_s1 + $0x68] sm:$0xf0] }
  0x1a   :  { %v251_v44 = vpack.c.bf16 %v213_v38, %v211_v36  ;;  %v252_v45 = vpack.c.bf16 %v214_v39, %v212_v37  ;;  %v151_v48 = vunpack.c.2.s8 %v95_v24  ;;  %v152_v49 = vunpack.c.2.s8 %v96_v25  ;;  %v2056_v36 = vld [vmem:[%s2949_s1 + $0xe4] sm:$0xf]  ;;  %v2016_v38 = vld [vmem:[%s2949_s1 + $0xe8] sm:$0xf0]  ;;  %v1942_v39 = vld [vmem:[%s2949_s1 + $0x50] sm:$0xf] }
  0x1b   :  { %v235_v46 = vpack.c.bf16 %v181_v42, %v179_v40  ;;  %v236_v47 = vpack.c.bf16 %v182_v43, %v180_v41  ;;  %v153_v50 = vunpack.c.3.s8 %v95_v24  ;;  %v154_v51 = vunpack.c.3.s8 %v96_v25  ;;  %v2039_v40 = vld [vmem:[%s2949_s1 + $0x54] sm:$0xf0] }
  0x1c   :  { %v119_v52 = vunpack.c.2.s8 %v87_v26  ;;  %v120_v53 = vunpack.c.2.s8 %v88_v27  ;;  %v121_v54 = vunpack.c.3.s8 %v87_v26  ;;  %v122_v55 = vunpack.c.3.s8 %v88_v27  ;;  %v2041_v27 = vld [vmem:[%s2949_s1 + $0x64] sm:$0xf0] }
  0x1d   :  { %v215_v56 = vcvt.s32.f32 %v151_v48  ;;  %v216_v57 = vcvt.s32.f32 %v152_v49  ;;  %v217_v58 = vcvt.s32.f32 %v153_v50  ;;  %v218_v59 = vcvt.s32.f32 %v154_v51 }
  0x1e   :  { %v183_v60 = vcvt.s32.f32 %v119_v52  ;;  %v184_v61 = vcvt.s32.f32 %v120_v53  ;;  %v185_v62 = vcvt.s32.f32 %v121_v54  ;;  %v186_v63 = vcvt.s32.f32 %v122_v55  ;;  %v1944_v52 = vld [vmem:[%s2949_s1 + $0x58] sm:$0xf0]  ;;  %v2054_v53 = vld [vmem:[%s2949_s1 + $0xd4] sm:$0xf] }
  0x1f   :  { %v155_v11 = vunpack.c.0.s8 %v2358_v4  ;;  %v1959_v12 = vor.u32 %v2043_v9, %v1958_v8  ;;  %v156_v16 = vunpack.c.0.s8 %v2363_v5  ;;  %v157_v17 = vunpack.c.1.s8 %v2358_v4  ;;  %v2008_v54 = vld [vmem:[%s2949_s1 + $0xd8] sm:$0xf0]  ;;  %v2052_v8 = vld [vmem:[%s2949_s1 + $0xc4] sm:$0xf]  ;;  %v2000_v9 = vld [vmem:[%s2949_s1 + $0xc8] sm:$0xf0] }
  0x20   :  { %v2023_v18 = vor.u32 %v2059_v13, %v2022_v10  ;;  %v1963_v19 = vor.u32 %v2042_v14, %v1960_v15  ;;  %v123_v24 = vunpack.c.0.s8 %v2368_v6  ;;  %v124_v25 = vunpack.c.0.s8 %v2373_v7  ;;  %v1926_v14 = vld [vmem:[%s2949_s1 + $0x30] sm:$0xf]  ;;  %v2035_v15 = vld [vmem:[%s2949_s1 + $0x34] sm:$0xf0] }
  0x21   :  { %563 = vmatpush.bf16.msra.mxu0 %v1959_v12  ;;  %v125_v30 = vunpack.c.1.s8 %v2368_v6  ;;  %v126_v31 = vunpack.c.1.s8 %v2373_v7  ;;  %v2015_v33 = vor.u32 %v2057_v29, %v2014_v28  ;;  %v1955_v37 = vor.u32 %v2040_v34, %v1952_v35 }
  0x22   :  { %652 = vmatpush.bf16.msra.mxu1 %v2023_v18  ;;  %741 = vmatpush.bf16.msra.mxu2 %v1963_v19  ;;  %v219_v41 = vcvt.s32.f32 %v155_v11  ;;  %v220_v42 = vcvt.s32.f32 %v156_v16  ;;  %v221_v43 = vcvt.s32.f32 %v157_v17  ;;  %v187_v49 = vcvt.s32.f32 %v123_v24  ;;  %v1990_v18 = vld [vmem:[%s2949_s1 + $0xb0] sm:$0xf]  ;;  %v2051_v19 = vld [vmem:[%s2949_s1 + $0xb4] sm:$0xf0] }
  0x23   :  { %v188_v50 = vcvt.s32.f32 %v124_v25  ;;  %v1943_v51 = vor.u32 %v2039_v40, %v1942_v39  ;;  %v189_v55 = vcvt.s32.f32 %v125_v30  ;;  %v2003_v17 = vor.u32 %v2052_v8, %v2000_v9  ;;  %v1982_v30 = vld [vmem:[%s2949_s1 + $0xa0] sm:$0xf]  ;;  %v1984_v39 = vld [vmem:[%s2949_s1 + $0xa8] sm:$0xf0]  ;;  %v2028_v8 = vld [vmem:[%s2949_s1 + $0x4] sm:$0xf] }
  0x24   :  { %v1927_v24 = vor.u32 %v2035_v15, %v1926_v14  ;;  %v1991_v25 = vor.u32 %v2051_v19, %v1990_v18  ;;  %v160_v34 = vunpack.c.2.s8 %v2363_v5  ;;  %v161_v35 = vunpack.c.3.s8 %v2358_v4 }
  0x25   :  { %v239_v10 = vpack.c.bf16 %v189_v55, %v187_v49  ;;  %v127_v40 = vunpack.c.2.s8 %v2368_v6  ;;  %v1976_v55 = vld [vmem:[%s2949_s1 + $0x98] sm:$0xf0] }
  0x26   :  { %653 = vmatpush.bf16.msra.mxu1 %v2015_v33  ;;  %742 = vmatpush.bf16.msra.mxu2 %v1955_v37  ;;  %v159_v33 = vunpack.c.2.s8 %v2358_v4  ;;  %v1920_v37 = vld [vmem:[%s2949_s1 + $0x28] sm:$0xf0]  ;;  %v129_v4 = vunpack.c.3.s8 %v2368_v6  ;;  %v1974_v6 = vld [vmem:[%s2949_s1 + $0x90] sm:$0xf] }
  0x28   :  { %381 = vxpose.binary.xlu1.c.b16.cont [3/16] %v248_v1, %v247_v0, 128  ;;  %v253_v0 = vpack.c.bf16 %v217_v58, %v215_v56  ;;  %v254_v1 = vpack.c.bf16 %v218_v59, %v216_v57  ;;  %v190_v56 = vcvt.s32.f32 %v126_v31  ;;  %v2011_v59 = vor.u32 %v2054_v53, %v2008_v54  ;;  %v2049_v31 = vld [vmem:[%s2949_s1 + $0xa4] sm:$0xf0]  ;;  %v1912_v53 = vld [vmem:[%s2949_s1 + $0x18] sm:$0xf0]  ;;  %v2046_v54 = vld [vmem:[%s2949_s1 + $0x94] sm:$0xf] }
  0x29   :  { %357 = vxpose.binary.xlu0.c.b16.cont [3/16] %v232_v3, %v231_v2, 128  ;;  %v237_v2 = vpack.c.bf16 %v185_v62, %v183_v60  ;;  %v238_v3 = vpack.c.bf16 %v186_v63, %v184_v61  ;;  %v1934_v60 = vld [vmem:[%s2949_s1 + $0x40] sm:$0xf]  ;;  %v2037_v61 = vld [vmem:[%s2949_s1 + $0x44] sm:$0xf0]  ;;  %v223_v49 = vcvt.s32.f32 %v159_v33 }
  0x2a   :  { %v1998_v62 = vld [vmem:[%s2949_s1 + $0xc0] sm:$0xf]  ;;  %v2053_v63 = vld [vmem:[%s2949_s1 + $0xc4] sm:$0xf0]  ;;  %v240_v11 = vpack.c.bf16 %v190_v56, %v188_v50  ;;  %v1935_v12 = vor.u32 %v2037_v61, %v1934_v60  ;;  %v224_v50 = vcvt.s32.f32 %v160_v34  ;;  %v191_v56 = vcvt.s32.f32 %v127_v40 }
  0x2b   :  { %v1999_v13 = vor.u32 %v2053_v63, %v1998_v62  ;;  %v1902_v62 = vld [vmem:[%s2949_s1] sm:$0xf]  ;;  %v2029_v63 = vld [vmem:[%s2949_s1 + $0x4] sm:$0xf0] }
  0x38   :  { %382 = vxpose.binary.xlu1.c.b16.cont [4/16] %v250_v21, %v249_v20, 128  ;;  %v2058_v20 = vld [vmem:[%s2949_s1 + $0xf4] sm:$0xf]  ;;  %v2024_v21 = vld [vmem:[%s2949_s1 + $0xf8] sm:$0xf0] }
  0x39   :  { %358 = vxpose.binary.xlu0.c.b16.cont [4/16] %v234_v23, %v233_v22, 128  ;;  %v1950_v22 = vld [vmem:[%s2949_s1 + $0x60] sm:$0xf]  ;;  %v158_v23 = vunpack.c.1.s8 %v2363_v5  ;;  %v2027_v26 = vor.u32 %v2058_v20, %v2024_v21  ;;  %v2034_v20 = vld [vmem:[%s2949_s1 + $0x34] sm:$0xf]  ;;  %v1928_v21 = vld [vmem:[%s2949_s1 + $0x38] sm:$0xf0] }
  0x3a   :  { %v1951_v32 = vor.u32 %v2041_v27, %v1950_v22  ;;  %v2050_v22 = vld [vmem:[%s2949_s1 + $0xb4] sm:$0xf]  ;;  %v2033_v27 = vld [vmem:[%s2949_s1 + $0x24] sm:$0xf0]  ;;  %v1931_v28 = vor.u32 %v2034_v20, %v1928_v21 }
  0x3b   :  { %830 = vmatpush.bf16.msra.mxu3 %v2027_v26  ;;  %v222_v48 = vcvt.s32.f32 %v158_v23  ;;  %v1992_v23 = vld [vmem:[%s2949_s1 + $0xb8] sm:$0xf0]  ;;  %v1918_v26 = vld [vmem:[%s2949_s1 + $0x20] sm:$0xf] }
  0x3c   :  { %564 = vmatpush.bf16.msra.mxu0 %v1951_v32  ;;  %v1995_v29 = vor.u32 %v2050_v22, %v1992_v23  ;;  %v2032_v32 = vld [vmem:[%s2949_s1 + $0x24] sm:$0xf] }
  0x40   :  { %565 = vmatpush.bf16.msra.mxu0 %v1943_v51  ;;  %v225_v51 = vcvt.s32.f32 %v161_v35 }
  0x42   :  { %v257_v9 = vpack.c.bf16 %v225_v51, %v223_v49 }
  0x44   :  { %566 = vmatpush.bf16.msra.mxu0 %v1935_v12  ;;  %v2044_v12 = vld [vmem:[%s2949_s1 + $0x84] sm:$0xf] }
  0x48   :  { %383 = vxpose.binary.xlu1.c.b16.cont [5/16] %v252_v45, %v251_v44, 128  ;;  %v2019_v44 = vor.u32 %v2056_v36, %v2016_v38  ;;  %v2006_v45 = vld [vmem:[%s2949_s1 + $0xd0] sm:$0xf]  ;;  %v162_v36 = vunpack.c.3.s8 %v2363_v5  ;;  %v2048_v38 = vld [vmem:[%s2949_s1 + $0xa4] sm:$0xf]  ;;  %v130_v5 = vunpack.c.3.s8 %v2373_v7 }
  0x49   :  { %359 = vxpose.binary.xlu0.c.b16.cont [5/16] %v236_v47, %v235_v46, 128  ;;  %v2055_v46 = vld [vmem:[%s2949_s1 + $0xd4] sm:$0xf0]  ;;  %v2038_v47 = vld [vmem:[%s2949_s1 + $0x54] sm:$0xf] }
  0x4a   :  { %v2007_v57 = vor.u32 %v2055_v46, %v2006_v45  ;;  %v1947_v58 = vor.u32 %v2038_v47, %v1944_v52  ;;  %831 = vmatpush.bf16.msra.mxu3 %v2019_v44  ;;  %567 = vmatpush.bf16.msra.mxu0 %v1927_v24  ;;  %v1910_v44 = vld [vmem:[%s2949_s1 + $0x10] sm:$0xf]  ;;  %v2031_v45 = vld [vmem:[%s2949_s1 + $0x14] sm:$0xf0]  ;;  %v1923_v46 = vor.u32 %v2032_v32, %v1920_v37  ;;  %v226_v52 = vcvt.s32.f32 %v162_v36 }
  0x4b   :  { %v1987_v47 = vor.u32 %v2048_v38, %v1984_v39  ;;  %v1911_v60 = vor.u32 %v2031_v45, %v1910_v44 }
  0x4c   :  { %654 = vmatpush.bf16.msra.mxu1 %v2007_v57  ;;  %743 = vmatpush.bf16.msra.mxu2 %v1947_v58  ;;  %v193_v58 = vcvt.s32.f32 %v129_v4 }
  0x4e   :  { %832 = vmatpush.bf16.msra.mxu3 %v2011_v59  ;;  %v194_v59 = vcvt.s32.f32 %v130_v5  ;;  %v241_v14 = vpack.c.bf16 %v193_v58, %v191_v56 }
  0x50   :  { %655 = vmatpush.bf16.msra.mxu1 %v1999_v13  ;;  %v1968_v13 = vld [vmem:[%s2949_s1 + $0x88] sm:$0xf0] }
  0x51   :  { %v1971_v19 = vor.u32 %v2044_v12, %v1968_v13 }
  0x52   :  { %833 = vmatpush.bf16.msra.mxu3 %v2003_v17 }
  0x54   :  { %656 = vmatpush.bf16.msra.mxu1 %v1991_v25 }
  0x56   :  { %834 = vmatpush.bf16.msra.mxu3 %v1995_v29 }
  0x58   :  { %384 = vxpose.binary.xlu1.c.b16.cont [6/16] %v254_v1, %v253_v0, 128  ;;  %v2036_v0 = vld [vmem:[%s2949_s1 + $0x44] sm:$0xf]  ;;  %v255_v1 = vpack.c.bf16 %v221_v43, %v219_v41  ;;  %v128_v41 = vunpack.c.2.s8 %v2373_v7  ;;  %v1983_v43 = vor.u32 %v2049_v31, %v1982_v30  ;;  %v2047_v7 = vld [vmem:[%s2949_s1 + $0x94] sm:$0xf0] }
  0x59   :  { %360 = vxpose.binary.xlu0.c.b16.cont [6/16] %v238_v3, %v237_v2, 128  ;;  %v256_v2 = vpack.c.bf16 %v222_v48, %v220_v42  ;;  %v1936_v3 = vld [vmem:[%s2949_s1 + $0x48] sm:$0xf0]  ;;  %v1919_v42 = vor.u32 %v2033_v27, %v1918_v26  ;;  %v2030_v48 = vld [vmem:[%s2949_s1 + $0x14] sm:$0xf]  ;;  %v1975_v61 = vor.u32 %v2047_v7, %v1974_v6 }
  0x5a   :  { %v1939_v16 = vor.u32 %v2036_v0, %v1936_v3  ;;  %v192_v57 = vcvt.s32.f32 %v128_v41  ;;  %657 = vmatpush.bf16.msra.mxu1 %v1983_v43  ;;  %835 = vmatpush.bf16.msra.mxu3 %v1987_v47  ;;  %v1915_v0 = vor.u32 %v2030_v48, %v1912_v53  ;;  %v2045_v3 = vld [vmem:[%s2949_s1 + $0x84] sm:$0xf0] }
  0x5b   :  { %568 = vmatpush.bf16.msra.mxu0 %v1919_v42 }
  0x5c   :  { %744 = vmatpush.bf16.msra.mxu2 %v1939_v16  ;;  %v242_v15 = vpack.c.bf16 %v194_v59, %v192_v57  ;;  %v1903_v16 = vor.u32 %v2029_v63, %v1902_v62 }
  0x5e   :  { %658 = vmatpush.bf16.msra.mxu1 %v1975_v61 }
  0x5f   :  { %569 = vmatpush.bf16.msra.mxu0 %v1911_v60 }
  0x60   :  { %745 = vmatpush.bf16.msra.mxu2 %v1931_v28 }
  0x63   :  { %570 = vmatpush.bf16.msra.mxu0 %v1903_v16 }
  0x64   :  { %746 = vmatpush.bf16.msra.mxu2 %v1923_v46 }
  0x68   :  { %385 = vxpose.binary.xlu1.c.b16.cont [7/16] %v256_v2, %v255_v1, 128  ;;  %v1979_v1 = vor.u32 %v2046_v54, %v1976_v55  ;;  %v1966_v2 = vld [vmem:[%s2949_s1 + $0x80] sm:$0xf] }
  0x69   :  { %361 = vxpose.binary.xlu0.c.b16.cont [7/16] %v240_v11, %v239_v10, 128  ;;  %v258_v10 = vpack.c.bf16 %v226_v52, %v224_v50  ;;  %v1904_v11 = vld [vmem:[%s2949_s1 + $0x8] sm:$0xf0]  ;;  %v1967_v17 = vor.u32 %v2045_v3, %v1966_v2 }
  0x6a   :  { %747 = vmatpush.bf16.msra.mxu2 %v1915_v0  ;;  %836 = vmatpush.bf16.msra.mxu3 %v1979_v1  ;;  %v1907_v18 = vor.u32 %v2028_v8, %v1904_v11 }
  0x6b   :  { %659 = vmatpush.bf16.msra.mxu1 %v1967_v17 }
  0x6e   :  { %748 = vmatpush.bf16.msra.mxu2 %v1907_v18  ;;  %837 = vmatpush.bf16.msra.mxu3 %v1971_v19 }
  0x78   :  { %386 = vxpose.binary.xlu1.c.b16.end [8/16] %v258_v10, %v257_v9, 128 }
  0x79   :  { %362 = vxpose.binary.xlu0.c.b16.end [8/16] %v242_v15, %v241_v14, 128 }
  0xb4   :  { %v387_v20 = vpop.trf.xlu1 }
  0xb5   :  { %v363_v21 = vpop.trf.xlu0  ;;  %660 = vmatmul.bf16.vlgmr.msra.gmra.mxu1 %v387_v20  ;;  %838 = vmatmul.bf16.vlgmr.msra.gmra.mxu3 %v387_v20 }
  0xb6   :  { %571 = vmatmul.bf16.vlgmr.msra.gmra.mxu0 %v363_v21  ;;  %749 = vmatmul.bf16.vlgmr.msra.gmra.mxu2 %v363_v21 }
  0xbc   :  { %v388_v22 = vpop.trf.xlu1 }
  0xbd   :  { %v364_v23 = vpop.trf.xlu0 }
  0xc4   :  { %v389_v24 = vpop.trf.xlu1 }
  0xc5   :  { %v365_v25 = vpop.trf.xlu0  ;;  %665 = vmatmul.bf16.gmra.mxu1 %v389_v24  ;;  %843 = vmatmul.bf16.gmra.mxu3 %v389_v24 }
  0xc6   :  { %576 = vmatmul.bf16.gmra.mxu0 %v365_v25  ;;  %754 = vmatmul.bf16.gmra.mxu2 %v365_v25 }
  0xcc   :  { %v2583_v26 = vpop.trf.xlu1 }
  0xcd   :  { %v2585_v27 = vpop.trf.xlu0 }
  0xd4   :  { %v391_v28 = vpop.trf.xlu1 }
  0xd5   :  { %v367_v29 = vpop.trf.xlu0  ;;  %670 = vmatmul.bf16.gmra.mxu1 %v391_v28  ;;  %848 = vmatmul.bf16.gmra.mxu3 %v391_v28 }
  0xd6   :  { %581 = vmatmul.bf16.gmra.mxu0 %v367_v29  ;;  %759 = vmatmul.bf16.gmra.mxu2 %v367_v29 }
  0xdc   :  { %v2587_v30 = vpop.trf.xlu1 }
  0xdd   :  { %v2589_v31 = vpop.trf.xlu0 }
  0xe4   :  { %v393_v32 = vpop.trf.xlu1 }
  0xe5   :  { %v369_v33 = vpop.trf.xlu0  ;;  %675 = vmatmul.bf16.gmra.mxu1 %v393_v32  ;;  %853 = vmatmul.bf16.gmra.mxu3 %v393_v32 }
  0xe6   :  { %586 = vmatmul.bf16.gmra.mxu0 %v369_v33  ;;  %764 = vmatmul.bf16.gmra.mxu2 %v369_v33 }
  0xec   :  { %v2591_v34 = vpop.trf.xlu1 }
  0xed   :  { %v2593_v35 = vpop.trf.xlu0 }
  0xf4   :  { %v395_v36 = vpop.trf.xlu1 }
  0xf5   :  { %v371_v37 = vpop.trf.xlu0  ;;  %680 = vmatmul.bf16.gmra.mxu1 %v395_v36  ;;  %858 = vmatmul.bf16.gmra.mxu3 %v395_v36 }
  0xf6   :  { %591 = vmatmul.bf16.gmra.mxu0 %v371_v37  ;;  %769 = vmatmul.bf16.gmra.mxu2 %v371_v37 }
  0xfc   :  { %v2595_v38 = vpop.trf.xlu1 }
  0xfd   :  { %v2597_v39 = vpop.trf.xlu0 }
 0x104   :  { %v397_v40 = vpop.trf.xlu1 }
 0x105   :  { %v373_v41 = vpop.trf.xlu0  ;;  %685 = vmatmul.bf16.gmra.mxu1 %v397_v40  ;;  %863 = vmatmul.bf16.gmra.mxu3 %v397_v40 }
 0x106   :  { %596 = vmatmul.bf16.gmra.mxu0 %v373_v41  ;;  %774 = vmatmul.bf16.gmra.mxu2 %v373_v41 }
 0x10c   :  { %v2599_v4 = vpop.trf.xlu1 }
 0x10d   :  { %v2601_v5 = vpop.trf.xlu0 }
 0x114   :  { %v399_v42 = vpop.trf.xlu1 }
 0x115   :  { %v375_v43 = vpop.trf.xlu0  ;;  %690 = vmatmul.bf16.gmra.mxu1 %v399_v42  ;;  %868 = vmatmul.bf16.gmra.mxu3 %v399_v42 }
 0x116   :  { %601 = vmatmul.bf16.gmra.mxu0 %v375_v43  ;;  %779 = vmatmul.bf16.gmra.mxu2 %v375_v43 }
 0x11c   :  { %v2603_v44 = vpop.trf.xlu1 }
 0x11d   :  { %v2605_v45 = vpop.trf.xlu0 }
 0x124   :  { %v401_v46 = vpop.trf.xlu1 }
 0x125   :  { %v377_v47 = vpop.trf.xlu0  ;;  %695 = vmatmul.bf16.gmra.mxu1 %v401_v46  ;;  %873 = vmatmul.bf16.gmra.mxu3 %v401_v46 }
 0x126   :  { %606 = vmatmul.bf16.gmra.mxu0 %v377_v47  ;;  %784 = vmatmul.bf16.gmra.mxu2 %v377_v47 }
 0x132   :  { %v661_v6 = vpop.f32.mrf.mxu1 }
 0x133   :  { %v572_v7 = vpop.f32.mrf.mxu0 }
 0x134   :  { %v662_v54 = vadd.f32 %v661_v6, %v572_v7 }
 0x135   :  { %700 = vmatmul.bf16.gmra.mxu1 %v388_v22  ;;  %878 = vmatmul.bf16.gmra.mxu3 %v388_v22 }
 0x136   :  { %611 = vmatmul.bf16.gmra.mxu0 %v364_v23  ;;  %789 = vmatmul.bf16.gmra.mxu2 %v364_v23 }
 0x138   :  { %v839_v48 = vpop.f32.mrf.mxu3 }
 0x139   :  { %v750_v49 = vpop.f32.mrf.mxu2 }
 0x13a   :  { %v840_v50 = vadd.f32 %v839_v48, %v750_v49  ;;  %v663_v51 = vpop.f32.mrf.mxu1 }
 0x13b   :  { %v574_v52 = vpop.f32.mrf.mxu0 }
 0x13c   :  { %2142 = vrcp.f32 %v840_v50  ;;  %vm1146_vm0 = vcmp.gt.f32.partialorder %v840_v50, 0.0  ;;  %v664_v0 = vadd.f32 %v663_v51, %v574_v52 }
 0x140   :  { %v841_v53 = vpop.f32.mrf.mxu3 }
 0x141   :  { %v752_v55 = vpop.f32.mrf.mxu2 }
 0x142   :  { %v2143_v56 = vpop.eup %2142  ;;  %v842_v57 = vadd.f32 %v841_v53, %v752_v55  ;;  %v666_v58 = vpop.f32.mrf.mxu1 }
 0x143   :  { %v577_v59 = vpop.f32.mrf.mxu0  ;;  %v1178_v60 = vmul.f32 %v2143_v56, %v662_v54 }
 0x144   :  { %2144 = vrcp.f32 %v842_v57  ;;  %vm1147_vm1 = vcmp.gt.f32.partialorder %v842_v57, 0.0  ;;  %v667_v14 = vadd.f32 %v666_v58, %v577_v59 }
 0x145   :  { %705 = vmatmul.bf16.gmra.mxu1 %v2583_v26  ;;  %883 = vmatmul.bf16.gmra.mxu3 %v2583_v26  ;;  %v2609_v61 = vsel %vm1146_vm0, %v1178_v60, 0.0 }
 0x146   :  { %616 = vmatmul.bf16.gmra.mxu0 %v2585_v27  ;;  %794 = vmatmul.bf16.gmra.mxu2 %v2585_v27  ;;  %v1242_v62 = vmul.f32 %v2609_v61, %v2609_v61 }
 0x148   :  { %1274 = vadd.xlane.f32.xlu2 %v1242_v62  ;;  %v844_v63 = vpop.f32.mrf.mxu3 }
 0x149   :  { %v755_v1 = vpop.f32.mrf.mxu2 }
 0x14a   :  { %v2145_v2 = vpop.eup %2144  ;;  %v845_v3 = vadd.f32 %v844_v63, %v755_v1  ;;  %v668_v8 = vpop.f32.mrf.mxu1 }
 0x14b   :  { %v579_v9 = vpop.f32.mrf.mxu0  ;;  %v1179_v10 = vmul.f32 %v2145_v2, %v664_v0 }
 0x14c   :  { %2146 = vrcp.f32 %v845_v3  ;;  %vm1148_vm2 = vcmp.gt.f32.partialorder %v845_v3, 0.0  ;;  %v669_v24 = vadd.f32 %v668_v8, %v579_v9 }
 0x14d   :  { %v2615_v11 = vsel %vm1147_vm1, %v1179_v10, 0.0 }
 0x14e   :  { %v1243_v12 = vmul.f32 %v2615_v11, %v2615_v11 }
 0x150   :  { %1276 = vadd.xlane.f32.xlu2 %v1243_v12  ;;  %v846_v13 = vpop.f32.mrf.mxu3 }
 0x151   :  { %v757_v15 = vpop.f32.mrf.mxu2 }
 0x152   :  { %v2147_v16 = vpop.eup %2146  ;;  %v847_v17 = vadd.f32 %v846_v13, %v757_v15  ;;  %v671_v18 = vpop.f32.mrf.mxu1 }
 0x153   :  { %v582_v19 = vpop.f32.mrf.mxu0  ;;  %v1180_v20 = vmul.f32 %v2147_v16, %v667_v14 }
 0x154   :  { %2148 = vrcp.f32 %v847_v17  ;;  %vm1149_vm3 = vcmp.gt.f32.partialorder %v847_v17, 0.0  ;;  %v672_v36 = vadd.f32 %v671_v18, %v582_v19 }
 0x155   :  { %710 = vmatmul.bf16.gmra.mxu1 %v2587_v30  ;;  %888 = vmatmul.bf16.gmra.mxu3 %v2587_v30  ;;  %v2621_v21 = vsel %vm1148_vm2, %v1180_v20, 0.0 }
 0x156   :  { %621 = vmatmul.bf16.gmra.mxu0 %v2589_v31  ;;  %799 = vmatmul.bf16.gmra.mxu2 %v2589_v31  ;;  %v1244_v22 = vmul.f32 %v2621_v21, %v2621_v21 }
 0x158   :  { %1278 = vadd.xlane.f32.xlu2 %v1244_v22  ;;  %v849_v23 = vpop.f32.mrf.mxu3 }
 0x159   :  { %v760_v25 = vpop.f32.mrf.mxu2 }
 0x15a   :  { %v2149_v26 = vpop.eup %2148  ;;  %v850_v27 = vadd.f32 %v849_v23, %v760_v25  ;;  %v673_v28 = vpop.f32.mrf.mxu1 }
 0x15b   :  { %v584_v29 = vpop.f32.mrf.mxu0  ;;  %v1181_v32 = vmul.f32 %v2149_v26, %v669_v24 }
 0x15c   :  { %2150 = vrcp.f32 %v850_v27  ;;  %vm1150_vm4 = vcmp.gt.f32.partialorder %v850_v27, 0.0  ;;  %v674_v48 = vadd.f32 %v673_v28, %v584_v29 }
 0x15d   :  { %v2627_v30 = vsel %vm1149_vm3, %v1181_v32, 0.0 }
 0x15e   :  { %v1245_v33 = vmul.f32 %v2627_v30, %v2627_v30 }
 0x160   :  { %1280 = vadd.xlane.f32.xlu2 %v1245_v33  ;;  %v851_v31 = vpop.f32.mrf.mxu3 }
 0x161   :  { %v762_v37 = vpop.f32.mrf.mxu2 }
 0x162   :  { %v2151_v40 = vpop.eup %2150  ;;  %v852_v41 = vadd.f32 %v851_v31, %v762_v37  ;;  %v676_v42 = vpop.f32.mrf.mxu1 }
 0x163   :  { %v587_v43 = vpop.f32.mrf.mxu0  ;;  %v1182_v46 = vmul.f32 %v2151_v40, %v672_v36 }
 0x164   :  { %2152 = vrcp.f32 %v852_v41  ;;  %vm1151_vm5 = vcmp.gt.f32.partialorder %v852_v41, 0.0  ;;  %v677_v56 = vadd.f32 %v676_v42, %v587_v43 }
 0x165   :  { %715 = vmatmul.bf16.gmra.mxu1 %v2591_v34  ;;  %893 = vmatmul.bf16.gmra.mxu3 %v2591_v34  ;;  %v2633_v47 = vsel %vm1150_vm4, %v1182_v46, 0.0 }
 0x166   :  { %626 = vmatmul.bf16.gmra.mxu0 %v2593_v35  ;;  %804 = vmatmul.bf16.gmra.mxu2 %v2593_v35  ;;  %v1246_v6 = vmul.f32 %v2633_v47, %v2633_v47 }
 0x168   :  { %1282 = vadd.xlane.f32.xlu2 %v1246_v6  ;;  %v854_v7 = vpop.f32.mrf.mxu3 }
 0x169   :  { %v765_v49 = vpop.f32.mrf.mxu2 }
 0x16a   :  { %v2153_v50 = vpop.eup %2152  ;;  %v855_v51 = vadd.f32 %v854_v7, %v765_v49  ;;  %v678_v52 = vpop.f32.mrf.mxu1 }
 0x16b   :  { %v589_v53 = vpop.f32.mrf.mxu0  ;;  %v1183_v54 = vmul.f32 %v2153_v50, %v674_v48 }
 0x16c   :  { %2154 = vrcp.f32 %v855_v51  ;;  %vm1152_vm6 = vcmp.gt.f32.partialorder %v855_v51, 0.0  ;;  %v679_v3 = vadd.f32 %v678_v52, %v589_v53 }
 0x16d   :  { %v2639_v34 = vsel %vm1151_vm5, %v1183_v54, 0.0 }
 0x16e   :  { %v1247_v55 = vmul.f32 %v2639_v34, %v2639_v34 }
 0x170   :  { %1284 = vadd.xlane.f32.xlu2 %v1247_v55  ;;  %v856_v35 = vpop.f32.mrf.mxu3 }
 0x171   :  { %v767_v57 = vpop.f32.mrf.mxu2 }
 0x172   :  { %v2155_v58 = vpop.eup %2154  ;;  %v857_v59 = vadd.f32 %v856_v35, %v767_v57  ;;  %v681_v60 = vpop.f32.mrf.mxu1 }
 0x173   :  { %v592_v62 = vpop.f32.mrf.mxu0  ;;  %v1184_v63 = vmul.f32 %v2155_v58, %v677_v56 }
 0x174   :  { %2156 = vrcp.f32 %v857_v59  ;;  %vm1153_vm7 = vcmp.gt.f32.partialorder %v857_v59, 0.0  ;;  %v682_v16 = vadd.f32 %v681_v60, %v592_v62 }
 0x175   :  { %720 = vmatmul.bf16.gmra.mxu1 %v2595_v38  ;;  %898 = vmatmul.bf16.gmra.mxu3 %v2595_v38  ;;  %v2645_v0 = vsel %vm1152_vm6, %v1184_v63, 0.0 }
 0x176   :  { %631 = vmatmul.bf16.gmra.mxu0 %v2597_v39  ;;  %809 = vmatmul.bf16.gmra.mxu2 %v2597_v39  ;;  %v1248_v1 = vmul.f32 %v2645_v0, %v2645_v0 }
 0x178   :  { %1286 = vadd.xlane.f32.xlu2 %v1248_v1  ;;  %v859_v2 = vpop.f32.mrf.mxu3  ;;  %v402_v1 = vpop.trf.xlu1 }
 0x179   :  { %v770_v8 = vpop.f32.mrf.mxu2 }
 0x17a   :  { %v2157_v9 = vpop.eup %2156  ;;  %v860_v10 = vadd.f32 %v859_v2, %v770_v8  ;;  %v683_v12 = vpop.f32.mrf.mxu1 }
 0x17b   :  { %v594_v13 = vpop.f32.mrf.mxu0  ;;  %v1185_v14 = vmul.f32 %v2157_v9, %v679_v3  ;;  %v378_v3 = vpop.trf.xlu0 }
 0x17c   :  { %2158 = vrcp.f32 %v860_v10  ;;  %vm1154_vm8 = vcmp.gt.f32.partialorder %v860_v10, 0.0  ;;  %v684_v27 = vadd.f32 %v683_v12, %v594_v13 }
 0x17d   :  { %v2651_v38 = vsel %vm1153_vm7, %v1185_v14, 0.0 }
 0x17e   :  { %v1249_v15 = vmul.f32 %v2651_v38, %v2651_v38 }
 0x180   :  { %1288 = vadd.xlane.f32.xlu2 %v1249_v15  ;;  %v861_v39 = vpop.f32.mrf.mxu3 }
 0x181   :  { %v772_v17 = vpop.f32.mrf.mxu2 }
 0x182   :  { %v2159_v18 = vpop.eup %2158  ;;  %v862_v19 = vadd.f32 %v861_v39, %v772_v17  ;;  %v686_v20 = vpop.f32.mrf.mxu1 }
 0x183   :  { %v597_v22 = vpop.f32.mrf.mxu0  ;;  %v1186_v23 = vmul.f32 %v2159_v18, %v682_v16 }
 0x184   :  { %2160 = vrcp.f32 %v862_v19  ;;  %vm1155_vm9 = vcmp.gt.f32.partialorder %v862_v19, 0.0  ;;  %v687_v40 = vadd.f32 %v686_v20, %v597_v22 }
 0x185   :  { %725 = vmatmul.bf16.gmra.mxu1 %v2599_v4  ;;  %903 = vmatmul.bf16.gmra.mxu3 %v2599_v4  ;;  %v2657_v24 = vsel %vm1154_vm8, %v1186_v23, 0.0 }
 0x186   :  { %636 = vmatmul.bf16.gmra.mxu0 %v2601_v5  ;;  %814 = vmatmul.bf16.gmra.mxu2 %v2601_v5  ;;  %v1250_v25 = vmul.f32 %v2657_v24, %v2657_v24 }
 0x188   :  { %1290 = vadd.xlane.f32.xlu2 %v1250_v25  ;;  %v864_v26 = vpop.f32.mrf.mxu3 }
 0x189   :  { %v775_v28 = vpop.f32.mrf.mxu2 }
 0x18a   :  { %v2161_v29 = vpop.eup %2160  ;;  %v865_v32 = vadd.f32 %v864_v26, %v775_v28  ;;  %v688_v33 = vpop.f32.mrf.mxu1 }
 0x18b   :  { %v599_v31 = vpop.f32.mrf.mxu0  ;;  %v1187_v36 = vmul.f32 %v2161_v29, %v684_v27 }
 0x18c   :  { %2162 = vrcp.f32 %v865_v32  ;;  %vm1156_vm10 = vcmp.gt.f32.partialorder %v865_v32, 0.0  ;;  %v689_v51 = vadd.f32 %v688_v33, %v599_v31 }
 0x18d   :  { %v2663_v4 = vsel %vm1155_vm9, %v1187_v36, 0.0 }
 0x18e   :  { %v1251_v37 = vmul.f32 %v2663_v4, %v2663_v4 }
 0x190   :  { %1292 = vadd.xlane.f32.xlu2 %v1251_v37  ;;  %v866_v5 = vpop.f32.mrf.mxu3 }
 0x191   :  { %v777_v41 = vpop.f32.mrf.mxu2 }
 0x192   :  { %v2163_v42 = vpop.eup %2162  ;;  %v867_v43 = vadd.f32 %v866_v5, %v777_v41  ;;  %v691_v46 = vpop.f32.mrf.mxu1 }
 0x193   :  { %v602_v6 = vpop.f32.mrf.mxu0  ;;  %v1188_v7 = vmul.f32 %v2163_v42, %v687_v40 }
 0x194   :  { %2164 = vrcp.f32 %v867_v43  ;;  %vm1157_vm11 = vcmp.gt.f32.partialorder %v867_v43, 0.0  ;;  %v692_v58 = vadd.f32 %v691_v46, %v602_v6 }
 0x195   :  { %730 = vmatmul.bf16.gmra.mxu1 %v2603_v44  ;;  %908 = vmatmul.bf16.gmra.mxu3 %v2603_v44  ;;  %v2669_v48 = vsel %vm1156_vm10, %v1188_v7, 0.0 }
 0x196   :  { %641 = vmatmul.bf16.gmra.mxu0 %v2605_v45  ;;  %819 = vmatmul.bf16.gmra.mxu2 %v2605_v45  ;;  %v1252_v49 = vmul.f32 %v2669_v48, %v2669_v48 }
 0x198   :  { %1294 = vadd.xlane.f32.xlu2 %v1252_v49  ;;  %v869_v50 = vpop.f32.mrf.mxu3 }
 0x199   :  { %v780_v52 = vpop.f32.mrf.mxu2 }
 0x19a   :  { %v2165_v53 = vpop.eup %2164  ;;  %v870_v54 = vadd.f32 %v869_v50, %v780_v52  ;;  %v693_v55 = vpop.f32.mrf.mxu1 }
 0x19b   :  { %v604_v35 = vpop.f32.mrf.mxu0  ;;  %v1189_v56 = vmul.f32 %v2165_v53, %v689_v51 }
 0x19c   :  { %2166 = vrcp.f32 %v870_v54  ;;  %vm1158_vm12 = vcmp.gt.f32.partialorder %v870_v54, 0.0  ;;  %v694_v13 = vadd.f32 %v693_v55, %v604_v35 }
 0x19d   :  { %v2675_v44 = vsel %vm1157_vm11, %v1189_v56, 0.0 }
 0x19e   :  { %v1253_v57 = vmul.f32 %v2675_v44, %v2675_v44 }
 0x1a0   :  { %1296 = vadd.xlane.f32.xlu2 %v1253_v57  ;;  %v871_v45 = vpop.f32.mrf.mxu3 }
 0x1a1   :  { %v782_v59 = vpop.f32.mrf.mxu2 }
 0x1a2   :  { %v2167_v60 = vpop.eup %2166  ;;  %v872_v62 = vadd.f32 %v871_v45, %v782_v59  ;;  %v696_v63 = vpop.f32.mrf.mxu1 }
 0x1a3   :  { %v607_v2 = vpop.f32.mrf.mxu0  ;;  %v1190_v8 = vmul.f32 %v2167_v60, %v692_v58 }
 0x1a4   :  { %2168 = vrcp.f32 %v872_v62  ;;  %vm1159_vm13 = vcmp.gt.f32.partialorder %v872_v62, 0.0  ;;  %v697_v23 = vadd.f32 %v696_v63, %v607_v2 }
 0x1a5   :  { %735 = vmatmul.bf16.gmra.mxu1 %v402_v1  ;;  %913 = vmatmul.bf16.gmra.mxu3 %v402_v1  ;;  %v2679_v9 = vsel %vm1158_vm12, %v1190_v8, 0.0 }
 0x1a6   :  { %646 = vmatmul.bf16.gmra.mxu0 %v378_v3  ;;  %824 = vmatmul.bf16.gmra.mxu2 %v378_v3  ;;  %v1254_v10 = vmul.f32 %v2679_v9, %v2679_v9 }
 0x1a8   :  { %1298 = vadd.xlane.f32.xlu2 %v1254_v10  ;;  %v874_v12 = vpop.f32.mrf.mxu3  ;;  %v2061_v10 = vld [vmem:[%s2950_s2] sm:$0xff]  }
 0x1a9   :  { %v785_v14 = vpop.f32.mrf.mxu2 }
 0x1aa   :  { %v2169_v15 = vpop.eup %2168  ;;  %v875_v39 = vadd.f32 %v874_v12, %v785_v14  ;;  %v698_v16 = vpop.f32.mrf.mxu1 }
 0x1ab   :  { %v609_v17 = vpop.f32.mrf.mxu0  ;;  %v1191_v18 = vmul.f32 %v2169_v15, %v694_v13 }
 0x1ac   :  { %2170 = vrcp.f32 %v875_v39  ;;  %vm1160_vm14 = vcmp.gt.f32.partialorder %v875_v39, 0.0  ;;  %v699_v37 = vadd.f32 %v698_v16, %v609_v17 }
 0x1ad   :  { %v2683_v19 = vsel %vm1159_vm13, %v1191_v18, 0.0 }
 0x1ae   :  { %v1255_v20 = vmul.f32 %v2683_v19, %v2683_v19 }
 0x1b0   :  { %1300 = vadd.xlane.f32.xlu2 %v1255_v20  ;;  %v876_v22 = vpop.f32.mrf.mxu3 }
 0x1b1   :  { %v787_v25 = vpop.f32.mrf.mxu2 }
 0x1b2   :  { %v2171_v26 = vpop.eup %2170  ;;  %v877_v27 = vadd.f32 %v876_v22, %v787_v25  ;;  %v701_v28 = vpop.f32.mrf.mxu1  ;;  %v2062_v22 = vunpack.c.l.bf16 %v2061_v10 }
 0x1b3   :  { %v612_v29 = vpop.f32.mrf.mxu0  ;;  %v1192_v32 = vmul.f32 %v2171_v26, %v697_v23 }
 0x1b4   :  { %2172 = vrcp.f32 %v877_v27  ;;  %vm1161_vm15 = vcmp.gt.f32.partialorder %v877_v27, 0.0  ;;  %v702_v51 = vadd.f32 %v701_v28, %v612_v29 }
 0x1b5   :  { %v2687_v33 = vsel %vm1160_vm14, %v1192_v32, 0.0 }
 0x1b6   :  { %v1256_v31 = vmul.f32 %v2687_v33, %v2687_v33 }
 0x1b8   :  { %1302 = vadd.xlane.f32.xlu2 %v1256_v31  ;;  %v879_v36 = vpop.f32.mrf.mxu3 }
 0x1b9   :  { %v790_v5 = vpop.f32.mrf.mxu2 }
 0x1ba   :  { %v2173_v40 = vpop.eup %2172  ;;  %v880_v41 = vadd.f32 %v879_v36, %v790_v5  ;;  %v703_v42 = vpop.f32.mrf.mxu1 }
 0x1bb   :  { %v1275_v43 = vpop.xlane.xlu2 %1274  ;;  %v614_v46 = vpop.f32.mrf.mxu0  ;;  %v1193_v6 = vmul.f32 %v2173_v40, %v699_v37 }
 0x1bc   :  { %2174 = vrcp.f32 %v880_v41  ;;  %vm1162_vm0 = vcmp.gt.f32.partialorder %v880_v41, 0.0  ;;  %v704_v2 = vadd.f32 %v703_v42, %v614_v46  ;;  %vm1376_vm2 = vweird.f32 %v1275_v43 }
 0x1bd   :  { %2176 = vrsqrt.f32 %v1275_v43  ;;  %v2691_v7 = vsel %vm1161_vm15, %v1193_v6, 0.0  ;;  %vm1338_vm5 = vcmp.gt.f32.partialorder %v1275_v43, 0.0 }
 0x1be   :  { %v1257_v49 = vmul.f32 %v2691_v7, %v2691_v7 }
 0x1c0   :  { %1304 = vadd.xlane.f32.xlu0 %v1257_v49  ;;  %v881_v50 = vpop.f32.mrf.mxu3 }
 0x1c1   :  { %v792_v52 = vpop.f32.mrf.mxu2 }
 0x1c2   :  { %v2175_v53 = vpop.eup %2174  ;;  %v882_v54 = vadd.f32 %v881_v50, %v792_v52  ;;  %v706_v55 = vpop.f32.mrf.mxu1  ;;  %v2063_v52 = vunpack.c.h.bf16 %v2061_v10 }
 0x1c3   :  { %v2177_v35 = vpop.eup %2176  ;;  %v2695_v56 = vpop.xlane.xlu2 %1276  ;;  %v1194_v45 = vmul.f32 %v2175_v53, %v702_v51 }
 0x1c4   :  { %v617_v57 = vpop.f32.mrf.mxu0  ;;  %v1371_v58 = vmul.f32 %v2177_v35, %v1275_v43  ;;  %2178 = vrcp.f32 %v882_v54  ;;  %vm1377_vm1 = vweird.f32 %v2177_v35  ;;  %vm1163_vm4 = vcmp.gt.f32.partialorder %v882_v54, 0.0 }
 0x1c5   :  { %2180 = vrsqrt.f32 %v2695_v56  ;;  %v2698_v60 = vsel %vm1162_vm0, %v1194_v45, 0.0  ;;  %vm1378_vm3 = vmor %vm1376_vm2, %vm1377_vm1  ;;  %v707_v36 = vadd.f32 %v706_v55, %v617_v57  ;;  %vm1386_vm7 = vweird.f32 %v2695_v56 }
 0x1c6   :  { %v1372_v59 = vmul.f32 %v2177_v35, %v1371_v58  ;;  %v1258_v62 = vmul.f32 %v2698_v60, %v2698_v60  ;;  %vm1339_vm10 = vcmp.gt.f32.partialorder %v2695_v56, 0.0 }
 0x1c8   :  { %v1373_v63 = vmul.f32 0.5, %v1372_v59  ;;  %v884_v1 = vpop.f32.mrf.mxu3  ;;  %1306 = vadd.xlane.f32.xlu1 %v1258_v62 }
 0x1c9   :  { %v795_v3 = vpop.f32.mrf.mxu2 }
 0x1ca   :  { %v2179_v8 = vpop.eup %2178  ;;  %v1374_v12 = vsub.f32 1.5, %v1373_v63  ;;  %v885_v13 = vadd.f32 %v884_v1, %v795_v3  ;;  %v708_v14 = vpop.f32.mrf.mxu1 }
 0x1cb   :  { %v2181_v15 = vpop.eup %2180  ;;  %v2705_v39 = vpop.xlane.xlu2 %1278  ;;  %v1195_v17 = vmul.f32 %v2179_v8, %v704_v2 }
 0x1cc   :  { %v619_v16 = vpop.f32.mrf.mxu0  ;;  %v1375_v18 = vmul.f32 %v2177_v35, %v1374_v12  ;;  %v1381_v20 = vmul.f32 %v2181_v15, %v2695_v56  ;;  %2182 = vrcp.f32 %v885_v13  ;;  %vm1387_vm6 = vweird.f32 %v2181_v15  ;;  %v2728_v56 = vld [vmem:[%s2950_s2 + $0x8] sm:$0xff]  }
 0x1cd   :  { %2184 = vrsqrt.f32 %v2705_v39  ;;  %v2709_v26 = vsel %vm1163_vm4, %v1195_v17, 0.0  ;;  %vm1388_vm8 = vmor %vm1386_vm7, %vm1387_vm6  ;;  %vm1164_vm9 = vcmp.gt.f32.partialorder %v885_v13, 0.0  ;;  %v709_v62 = vadd.f32 %v708_v14, %v619_v16 }
 0x1ce   :  { %v1379_v23 = vsel %vm1378_vm3, %v2177_v35, %v1375_v18  ;;  %v1382_v25 = vmul.f32 %v2181_v15, %v1381_v20  ;;  %v1259_v28 = vmul.f32 %v2709_v26, %v2709_v26  ;;  %vm1396_vm12 = vweird.f32 %v2705_v39 }
 0x1cf   :  { %v1690_v27 = vsel %vm1338_vm5, %v1379_v23, 0.0  ;;  %v2066_v17 = vunpack.c.l.bf16 %v2728_v56  ;;  %vm1340_vm15 = vcmp.gt.f32.partialorder %v2705_v39, 0.0 }
 0x1d0   :  { %v1722_v29 = vmul.f32 %v1690_v27, %v2609_v61  ;;  %v1383_v32 = vmul.f32 0.5, %v1382_v25  ;;  %v886_v31 = vpop.f32.mrf.mxu3  ;;  %1308 = vadd.xlane.f32.xlu2 %v1259_v28 }
 0x1d1   :  { %v797_v37 = vpop.f32.mrf.mxu2 }
 0x1d2   :  { %v2183_v5 = vpop.eup %2182  ;;  %v1818_v40 = vadd.f32 %v2062_v22, %v1722_v29  ;;  %v1384_v41 = vsub.f32 1.5, %v1383_v32  ;;  %v887_v42 = vadd.f32 %v886_v31, %v797_v37  ;;  %v711_v43 = vpop.f32.mrf.mxu1 }
 0x1d3   :  { %v2185_v46 = vpop.eup %2184  ;;  %v2714_v6 = vpop.xlane.xlu2 %1280  ;;  %v1196_v50 = vmul.f32 %v2183_v5, %v707_v36 }
 0x1d4   :  { %v622_v49 = vpop.f32.mrf.mxu0  ;;  %1850 = vst [vmem:[#allocation3] sm:$0xff] %v1818_v40  ;;  %v1385_v51 = vmul.f32 %v2181_v15, %v1384_v41  ;;  %v1391_v61 = vmul.f32 %v2185_v46, %v2705_v39  ;;  %2186 = vrcp.f32 %v887_v42  ;;  %vm1397_vm11 = vweird.f32 %v2185_v46 }
 0x1d5   :  { %2188 = vrsqrt.f32 %v2714_v6  ;;  %v2720_v55 = vsel %vm1164_vm9, %v1196_v50, 0.0  ;;  %vm1398_vm13 = vmor %vm1396_vm12, %vm1397_vm11  ;;  %vm1165_vm14 = vcmp.gt.f32.partialorder %v887_v42, 0.0  ;;  %v712_v32 = vadd.f32 %v711_v43, %v622_v49 }
 0x1d6   :  { %v1389_v53 = vsel %vm1388_vm8, %v2181_v15, %v1385_v51  ;;  %v1392_v54 = vmul.f32 %v2185_v46, %v1391_v61  ;;  %v1260_v57 = vmul.f32 %v2720_v55, %v2720_v55  ;;  %vm1406_vm1 = vweird.f32 %v2714_v6 }
 0x1d7   :  { %v1691_v35 = vsel %vm1339_vm10, %v1389_v53, 0.0  ;;  %v2067_v43 = vunpack.c.h.bf16 %v2728_v56  ;;  %vm1341_vm4 = vcmp.gt.f32.partialorder %v2714_v6, 0.0 }
 0x1d8   :  { %v1723_v45 = vmul.f32 %v1691_v35, %v2615_v11  ;;  %v1393_v58 = vmul.f32 0.5, %v1392_v54  ;;  %v889_v59 = vpop.f32.mrf.mxu3  ;;  %1310 = vadd.xlane.f32.xlu2 %v1260_v57 }
 0x1d9   :  { %v800_v63 = vpop.f32.mrf.mxu2 }
 0x1da   :  { %v2187_v1 = vpop.eup %2186  ;;  %v1819_v2 = vadd.f32 %v2063_v52, %v1723_v45  ;;  %v1394_v3 = vsub.f32 1.5, %v1393_v58  ;;  %v890_v8 = vadd.f32 %v889_v59, %v800_v63  ;;  %v713_v10 = vpop.f32.mrf.mxu1 }
 0x1db   :  { %v2189_v12 = vpop.eup %2188  ;;  %v2730_v13 = vpop.xlane.xlu2 %1282  ;;  %v1197_v15 = vmul.f32 %v2187_v1, %v709_v62 }
 0x1dc   :  { %v624_v11 = vpop.f32.mrf.mxu0  ;;  %1851 = vst [vmem:[#allocation3 + $0x8] sm:$0xff] %v1819_v2  ;;  %v1395_v14 = vmul.f32 %v2185_v46, %v1394_v3  ;;  %v1401_v16 = vmul.f32 %v2189_v12, %v2714_v6  ;;  %2190 = vrcp.f32 %v890_v8  ;;  %vm1407_vm0 = vweird.f32 %v2189_v12  ;;  %v2757_v6 = vld [vmem:[%s2950_s2 + $0x10] sm:$0xff]  }
 0x1dd   :  { %2192 = vrsqrt.f32 %v2730_v13  ;;  %v2737_v22 = vsel %vm1165_vm14, %v1197_v15, 0.0  ;;  %vm1408_vm2 = vmor %vm1406_vm1, %vm1407_vm0  ;;  %vm1166_vm3 = vcmp.gt.f32.partialorder %v890_v8, 0.0  ;;  %v714_v58 = vadd.f32 %v713_v10, %v624_v11 }
 0x1de   :  { %v1399_v18 = vsel %vm1398_vm13, %v2185_v46, %v1395_v14  ;;  %v1402_v20 = vmul.f32 %v2189_v12, %v1401_v16  ;;  %v1261_v25 = vmul.f32 %v2737_v22, %v2737_v22  ;;  %vm1416_vm6 = vweird.f32 %v2730_v13 }
 0x1df   :  { %v1692_v23 = vsel %vm1340_vm15, %v1399_v18, 0.0  ;;  %v2070_v15 = vunpack.c.l.bf16 %v2757_v6  ;;  %vm1342_vm9 = vcmp.gt.f32.partialorder %v2730_v13, 0.0 }
 0x1e0   :  { %v1724_v27 = vmul.f32 %v1692_v23, %v2621_v21  ;;  %v1403_v28 = vmul.f32 0.5, %v1402_v20  ;;  %v891_v29 = vpop.f32.mrf.mxu3  ;;  %1312 = vadd.xlane.f32.xlu2 %v1261_v25 }
 0x1e1   :  { %v802_v31 = vpop.f32.mrf.mxu2 }
 0x1e2   :  { %v2191_v36 = vpop.eup %2190  ;;  %v1820_v37 = vadd.f32 %v2066_v17, %v1724_v27  ;;  %v1404_v5 = vsub.f32 1.5, %v1403_v28  ;;  %v892_v39 = vadd.f32 %v891_v29, %v802_v31  ;;  %v716_v40 = vpop.f32.mrf.mxu1 }
 0x1e3   :  { %v2193_v41 = vpop.eup %2192  ;;  %v2742_v42 = vpop.xlane.xlu2 %1284  ;;  %v1198_v50 = vmul.f32 %v2191_v36, %v712_v32 }
 0x1e4   :  { %v627_v46 = vpop.f32.mrf.mxu0  ;;  %1852 = vst [vmem:[#allocation3 + $0x10] sm:$0xff] %v1820_v37  ;;  %v1405_v51 = vmul.f32 %v2189_v12, %v1404_v5  ;;  %v1411_v21 = vmul.f32 %v2193_v41, %v2730_v13  ;;  %2194 = vrcp.f32 %v892_v39  ;;  %vm1417_vm5 = vweird.f32 %v2193_v41 }
 0x1e5   :  { %2196 = vrsqrt.f32 %v2742_v42  ;;  %v2749_v52 = vsel %vm1166_vm3, %v1198_v50, 0.0  ;;  %vm1418_vm7 = vmor %vm1416_vm6, %vm1417_vm5  ;;  %vm1167_vm8 = vcmp.gt.f32.partialorder %v892_v39, 0.0  ;;  %v717_v28 = vadd.f32 %v716_v40, %v627_v46 }
 0x1e6   :  { %v1409_v49 = vsel %vm1408_vm2, %v2189_v12, %v1405_v51  ;;  %v1412_v61 = vmul.f32 %v2193_v41, %v1411_v21  ;;  %v1262_v54 = vmul.f32 %v2749_v52, %v2749_v52  ;;  %vm1426_vm11 = vweird.f32 %v2742_v42 }
 0x1e7   :  { %v1693_v53 = vsel %vm1341_vm4, %v1409_v49, 0.0  ;;  %v2071_v40 = vunpack.c.h.bf16 %v2757_v6  ;;  %vm1343_vm14 = vcmp.gt.f32.partialorder %v2742_v42, 0.0 }
 0x1e8   :  { %v1725_v35 = vmul.f32 %v1693_v53, %v2627_v30  ;;  %v1413_v57 = vmul.f32 0.5, %v1412_v61  ;;  %v894_v45 = vpop.f32.mrf.mxu3  ;;  %1314 = vadd.xlane.f32.xlu2 %v1262_v54 }
 0x1e9   :  { %v805_v59 = vpop.f32.mrf.mxu2 }
 0x1ea   :  { %v2195_v62 = vpop.eup %2194  ;;  %v1821_v63 = vadd.f32 %v2067_v43, %v1725_v35  ;;  %v1414_v1 = vsub.f32 1.5, %v1413_v57  ;;  %v895_v2 = vadd.f32 %v894_v45, %v805_v59  ;;  %v718_v56 = vpop.f32.mrf.mxu1 }
 0x1eb   :  { %v2197_v3 = vpop.eup %2196  ;;  %v2759_v8 = vpop.xlane.xlu2 %1286  ;;  %v1199_v12 = vmul.f32 %v2195_v62, %v714_v58 }
 0x1ec   :  { %v629_v30 = vpop.f32.mrf.mxu0  ;;  %1853 = vst [vmem:[#allocation3 + $0x18] sm:$0xff] %v1821_v63  ;;  %v1415_v10 = vmul.f32 %v2193_v41, %v1414_v1  ;;  %v1421_v11 = vmul.f32 %v2197_v3, %v2742_v42  ;;  %2198 = vrcp.f32 %v895_v2  ;;  %vm1427_vm10 = vweird.f32 %v2197_v3  ;;  %v2786_v42 = vld [vmem:[%s2950_s2 + $0x18] sm:$0xff]  }
 0x1ed   :  { %2200 = vrsqrt.f32 %v2759_v8  ;;  %v2766_v17 = vsel %vm1167_vm8, %v1199_v12, 0.0  ;;  %vm1428_vm12 = vmor %vm1426_vm11, %vm1427_vm10  ;;  %vm1168_vm13 = vcmp.gt.f32.partialorder %v895_v2, 0.0  ;;  %v719_v57 = vadd.f32 %v718_v56, %v629_v30 }
 0x1ee   :  { %v1419_v14 = vsel %vm1418_vm7, %v2193_v41, %v1415_v10  ;;  %v1422_v16 = vmul.f32 %v2197_v3, %v1421_v11  ;;  %v1263_v20 = vmul.f32 %v2766_v17, %v2766_v17  ;;  %vm1436_vm0 = vweird.f32 %v2759_v8 }
 0x1ef   :  { %v1694_v18 = vsel %vm1342_vm9, %v1419_v14, 0.0  ;;  %v2074_v12 = vunpack.c.l.bf16 %v2786_v42  ;;  %vm1344_vm3 = vcmp.gt.f32.partialorder %v2759_v8, 0.0 }
 0x1f0   :  { %v1726_v23 = vmul.f32 %v1694_v18, %v2633_v47  ;;  %v1423_v25 = vmul.f32 0.5, %v1422_v16  ;;  %v896_v27 = vpop.f32.mrf.mxu3  ;;  %1316 = vadd.xlane.f32.xlu2 %v1263_v20 }
 0x1f1   :  { %v807_v29 = vpop.f32.mrf.mxu2 }
 0x1f2   :  { %v2199_v32 = vpop.eup %2198  ;;  %v1822_v31 = vadd.f32 %v2070_v15, %v1726_v23  ;;  %v1424_v36 = vsub.f32 1.5, %v1423_v25  ;;  %v897_v13 = vadd.f32 %v896_v27, %v807_v29  ;;  %v721_v37 = vpop.f32.mrf.mxu1 }
 0x1f3   :  { %v2201_v5 = vpop.eup %2200  ;;  %v2771_v39 = vpop.xlane.xlu2 %1288  ;;  %v1200_v50 = vmul.f32 %v2199_v32, %v717_v28 }
 0x1f4   :  { %v632_v41 = vpop.f32.mrf.mxu0  ;;  %1854 = vst [vmem:[#allocation3 + $0x20] sm:$0xff] %v1822_v31  ;;  %v1425_v51 = vmul.f32 %v2197_v3, %v1424_v36  ;;  %v1431_v47 = vmul.f32 %v2201_v5, %v2759_v8  ;;  %2202 = vrcp.f32 %v897_v13  ;;  %vm1437_vm15 = vweird.f32 %v2201_v5 }
 0x1f5   :  { %2204 = vrsqrt.f32 %v2771_v39  ;;  %v2778_v43 = vsel %vm1168_vm13, %v1200_v50, 0.0  ;;  %vm1438_vm1 = vmor %vm1436_vm0, %vm1437_vm15  ;;  %vm1169_vm2 = vcmp.gt.f32.partialorder %v897_v13, 0.0  ;;  %v722_v25 = vadd.f32 %v721_v37, %v632_v41 }
 0x1f6   :  { %v1429_v46 = vsel %vm1428_vm12, %v2197_v3, %v1425_v51  ;;  %v1432_v21 = vmul.f32 %v2201_v5, %v1431_v47  ;;  %v1264_v61 = vmul.f32 %v2778_v43, %v2778_v43  ;;  %vm1446_vm5 = vweird.f32 %v2771_v39 }
 0x1f7   :  { %v1695_v49 = vsel %vm1343_vm14, %v1429_v46, 0.0  ;;  %v2075_v41 = vunpack.c.h.bf16 %v2786_v42  ;;  %vm1345_vm8 = vcmp.gt.f32.partialorder %v2771_v39, 0.0 }
 0x1f8   :  { %v1727_v53 = vmul.f32 %v1695_v49, %v2639_v34  ;;  %v1433_v54 = vmul.f32 0.5, %v1432_v21  ;;  %v899_v35 = vpop.f32.mrf.mxu3  ;;  %1318 = vadd.xlane.f32.xlu2 %v1264_v61 }
 0x1f9   :  { %v810_v45 = vpop.f32.mrf.mxu2 }
 0x1fa   :  { %v2203_v58 = vpop.eup %2202  ;;  %v1823_v59 = vadd.f32 %v2071_v40, %v1727_v53  ;;  %v1434_v62 = vsub.f32 1.5, %v1433_v54  ;;  %v900_v63 = vadd.f32 %v899_v35, %v810_v45  ;;  %v723_v6 = vpop.f32.mrf.mxu1 }
 0x1fb   :  { %v2205_v1 = vpop.eup %2204  ;;  %v2788_v2 = vpop.xlane.xlu2 %1290  ;;  %v1201_v3 = vmul.f32 %v2203_v58, %v719_v57 }
 0x1fc   :  { %v634_v34 = vpop.f32.mrf.mxu0  ;;  %1855 = vst [vmem:[#allocation3 + $0x28] sm:$0xff] %v1823_v59  ;;  %v1435_v56 = vmul.f32 %v2201_v5, %v1434_v62  ;;  %v1441_v30 = vmul.f32 %v2205_v1, %v2771_v39  ;;  %2206 = vrcp.f32 %v900_v63  ;;  %vm1447_vm4 = vweird.f32 %v2205_v1  ;;  %v2815_v39 = vld [vmem:[%s2950_s2 + $0x20] sm:$0xff]  }
 0x1fd   :  { %2208 = vrsqrt.f32 %v2788_v2  ;;  %v2795_v15 = vsel %vm1169_vm2, %v1201_v3, 0.0  ;;  %vm1448_vm6 = vmor %vm1446_vm5, %vm1447_vm4  ;;  %vm1170_vm7 = vcmp.gt.f32.partialorder %v900_v63, 0.0  ;;  %v724_v54 = vadd.f32 %v723_v6, %v634_v34 }
 0x1fe   :  { %v1439_v10 = vsel %vm1438_vm1, %v2201_v5, %v1435_v56  ;;  %v1442_v11 = vmul.f32 %v2205_v1, %v1441_v30  ;;  %v1265_v16 = vmul.f32 %v2795_v15, %v2795_v15  ;;  %vm1456_vm10 = vweird.f32 %v2788_v2 }
 0x1ff   :  { %v1696_v14 = vsel %vm1344_vm3, %v1439_v10, 0.0  ;;  %vm1346_vm13 = vcmp.gt.f32.partialorder %v2788_v2, 0.0 }
 0x200   :  { %v1728_v18 = vmul.f32 %v1696_v14, %v2645_v0  ;;  %v1443_v20 = vmul.f32 0.5, %v1442_v11  ;;  %v901_v23 = vpop.f32.mrf.mxu3  ;;  %1320 = vadd.xlane.f32.xlu2 %v1265_v16 }
 0x201   :  { %v812_v27 = vpop.f32.mrf.mxu2 }
 0x202   :  { %v2207_v28 = vpop.eup %2206  ;;  %v1824_v29 = vadd.f32 %v2074_v12, %v1728_v18  ;;  %v1444_v32 = vsub.f32 1.5, %v1443_v20  ;;  %v902_v8 = vadd.f32 %v901_v23, %v812_v27  ;;  %v726_v36 = vpop.f32.mrf.mxu1 }
 0x203   :  { %v2209_v31 = vpop.eup %2208  ;;  %v2800_v13 = vpop.xlane.xlu2 %1292  ;;  %v1202_v5 = vmul.f32 %v2207_v28, %v722_v25 }
 0x204   :  { %1856 = vst [vmem:[#allocation3 + $0x30] sm:$0xff] %v1824_v29  ;;  %v1445_v50 = vmul.f32 %v2205_v1, %v1444_v32  ;;  %v1451_v0 = vmul.f32 %v2209_v31, %v2788_v2  ;;  %2210 = vrcp.f32 %v902_v8  ;;  %v637_v37 = vpop.f32.mrf.mxu0  ;;  %vm1457_vm9 = vweird.f32 %v2209_v31 }
 0x205   :  { %2212 = vrsqrt.f32 %v2800_v13  ;;  %v2807_v40 = vsel %vm1170_vm7, %v1202_v5, 0.0  ;;  %vm1458_vm11 = vmor %vm1456_vm10, %vm1457_vm9  ;;  %vm1171_vm12 = vcmp.gt.f32.partialorder %v902_v8, 0.0  ;;  %v727_v20 = vadd.f32 %v726_v36, %v637_v37 }
 0x206   :  { %v1449_v51 = vsel %vm1448_vm6, %v2205_v1, %v1445_v50  ;;  %v1452_v47 = vmul.f32 %v2209_v31, %v1451_v0  ;;  %v1266_v21 = vmul.f32 %v2807_v40, %v2807_v40  ;;  %v2078_v1 = vunpack.c.l.bf16 %v2815_v39 }
 0x207   :  { %v1697_v46 = vsel %vm1345_vm8, %v1449_v51, 0.0  ;;  %vm1466_vm15 = vweird.f32 %v2800_v13  ;;  %v2079_v36 = vunpack.c.h.bf16 %v2815_v39  ;;  %vm1347_vm2 = vcmp.gt.f32.partialorder %v2800_v13, 0.0 }
 0x208   :  { %v1729_v49 = vmul.f32 %v1697_v46, %v2651_v38  ;;  %v1453_v61 = vmul.f32 0.5, %v1452_v47  ;;  %v904_v53 = vpop.f32.mrf.mxu3  ;;  %1322 = vadd.xlane.f32.xlu2 %v1266_v21 }
 0x209   :  { %v815_v35 = vpop.f32.mrf.mxu2 }
 0x20a   :  { %v2211_v57 = vpop.eup %2210  ;;  %v1825_v45 = vadd.f32 %v2075_v41, %v1729_v49  ;;  %v1454_v58 = vsub.f32 1.5, %v1453_v61  ;;  %v905_v59 = vadd.f32 %v904_v53, %v815_v35  ;;  %v728_v34 = vpop.f32.mrf.mxu1 }
 0x20b   :  { %v2213_v42 = vpop.eup %2212  ;;  %v2817_v62 = vpop.xlane.xlu2 %1294  ;;  %v1203_v63 = vmul.f32 %v2211_v57, %v724_v54 }
 0x20c   :  { %1857 = vst [vmem:[#allocation3 + $0x38] sm:$0xff] %v1825_v45  ;;  %v1455_v38 = vmul.f32 %v2209_v31, %v1454_v58  ;;  %v1461_v6 = vmul.f32 %v2213_v42, %v2800_v13  ;;  %2214 = vrcp.f32 %v905_v59  ;;  %v639_v30 = vpop.f32.mrf.mxu0  ;;  %vm1467_vm14 = vweird.f32 %v2213_v42  ;;  %v2128_v13 = vld [vmem:[%s2950_s2 + $0x28] sm:$0xff]  }
 0x20d   :  { %2216 = vrsqrt.f32 %v2817_v62  ;;  %v2824_v12 = vsel %vm1171_vm12, %v1203_v63, 0.0  ;;  %vm1468_vm0 = vmor %vm1466_vm15, %vm1467_vm14  ;;  %vm1172_vm1 = vcmp.gt.f32.partialorder %v905_v59, 0.0  ;;  %v729_v61 = vadd.f32 %v728_v34, %v639_v30 }
 0x20e   :  { %v1459_v3 = vsel %vm1458_vm11, %v2209_v31, %v1455_v38  ;;  %v1462_v56 = vmul.f32 %v2213_v42, %v1461_v6  ;;  %v1267_v11 = vmul.f32 %v2824_v12, %v2824_v12  ;;  %vm1476_vm4 = vweird.f32 %v2817_v62 }
 0x20f   :  { %v1698_v10 = vsel %vm1346_vm13, %v1459_v3, 0.0  ;;  %v2082_v63 = vunpack.c.l.bf16 %v2128_v13  ;;  %vm1348_vm7 = vcmp.gt.f32.partialorder %v2817_v62, 0.0 }
 0x210   :  { %v1730_v14 = vmul.f32 %v1698_v10, %v2657_v24  ;;  %v1463_v16 = vmul.f32 0.5, %v1462_v56  ;;  %v906_v18 = vpop.f32.mrf.mxu3  ;;  %1324 = vadd.xlane.f32.xlu2 %v1267_v11 }
 0x211   :  { %v817_v23 = vpop.f32.mrf.mxu2 }
 0x212   :  { %v2215_v25 = vpop.eup %2214  ;;  %v1826_v27 = vadd.f32 %v2078_v1, %v1730_v14  ;;  %v1464_v28 = vsub.f32 1.5, %v1463_v16  ;;  %v907_v2 = vadd.f32 %v906_v18, %v817_v23  ;;  %v731_v41 = vpop.f32.mrf.mxu1 }
 0x213   :  { %v2217_v29 = vpop.eup %2216  ;;  %v2829_v32 = vpop.xlane.xlu2 %1296  ;;  %v1204_v8 = vmul.f32 %v2215_v25, %v727_v20 }
 0x214   :  { %1858 = vst [vmem:[#allocation3 + $0x40] sm:$0xff] %v1826_v27  ;;  %v1465_v31 = vmul.f32 %v2213_v42, %v1464_v28  ;;  %v1471_v24 = vmul.f32 %v2217_v29, %v2817_v62  ;;  %2218 = vrcp.f32 %v907_v2  ;;  %v642_v21 = vpop.f32.mrf.mxu0  ;;  %vm1477_vm3 = vweird.f32 %v2217_v29 }
 0x215   :  { %2220 = vrsqrt.f32 %v2829_v32  ;;  %v2836_v0 = vsel %vm1172_vm1, %v1204_v8, 0.0  ;;  %vm1478_vm5 = vmor %vm1476_vm4, %vm1477_vm3  ;;  %vm1173_vm6 = vcmp.gt.f32.partialorder %v907_v2, 0.0  ;;  %v732_v11 = vadd.f32 %v731_v41, %v642_v21 }
 0x216   :  { %v1469_v5 = vsel %vm1468_vm0, %v2213_v42, %v1465_v31  ;;  %v1472_v50 = vmul.f32 %v2217_v29, %v1471_v24  ;;  %v1268_v51 = vmul.f32 %v2836_v0, %v2836_v0  ;;  %vm1486_vm9 = vweird.f32 %v2829_v32 }
 0x217   :  { %v1699_v37 = vsel %vm1347_vm2, %v1469_v5, 0.0  ;;  %v2083_v8 = vunpack.c.h.bf16 %v2128_v13  ;;  %vm1349_vm12 = vcmp.gt.f32.partialorder %v2829_v32, 0.0 }
 0x218   :  { %v1731_v47 = vmul.f32 %v1699_v37, %v2663_v4  ;;  %v1473_v46 = vmul.f32 0.5, %v1472_v50  ;;  %v909_v49 = vpop.f32.mrf.mxu3  ;;  %1326 = vadd.xlane.f32.xlu2 %v1268_v51 }
 0x219   :  { %v820_v53 = vpop.f32.mrf.mxu2 }
 0x21a   :  { %v2219_v54 = vpop.eup %2218  ;;  %v1827_v35 = vadd.f32 %v2079_v36, %v1731_v47  ;;  %v1474_v57 = vsub.f32 1.5, %v1473_v46  ;;  %v910_v45 = vadd.f32 %v909_v49, %v820_v53  ;;  %v733_v62 = vpop.f32.mrf.mxu1 }
 0x21b   :  { %v2221_v39 = vpop.eup %2220  ;;  %v2844_v58 = vpop.xlane.xlu2 %1298  ;;  %v1205_v59 = vmul.f32 %v2219_v54, %v729_v61 }
 0x21c   :  { %1859 = vst [vmem:[#allocation3 + $0x48] sm:$0xff] %v1827_v35  ;;  %v1475_v4 = vmul.f32 %v2217_v29, %v1474_v57  ;;  %v1481_v42 = vmul.f32 %v2221_v39, %v2829_v32  ;;  %2222 = vrcp.f32 %v910_v45  ;;  %vm1487_vm8 = vweird.f32 %v2221_v39  ;;  %v644_v23 = vpop.f32.mrf.mxu0  ;;  %v2129_v32 = vld [vmem:[%s2950_s2 + $0x30] sm:$0xff]  }
 0x21d   :  { %2224 = vrsqrt.f32 %v2844_v58  ;;  %v2850_v1 = vsel %vm1173_vm6, %v1205_v59, 0.0  ;;  %vm1488_vm10 = vmor %vm1486_vm9, %vm1487_vm8  ;;  %vm1174_vm11 = vcmp.gt.f32.partialorder %v910_v45, 0.0  ;;  %v734_v47 = vadd.f32 %v733_v62, %v644_v23 }
 0x21e   :  { %v1479_v38 = vsel %vm1478_vm5, %v2217_v29, %v1475_v4  ;;  %v1482_v6 = vmul.f32 %v2221_v39, %v1481_v42  ;;  %v1269_v3 = vmul.f32 %v2850_v1, %v2850_v1  ;;  %vm1496_vm14 = vweird.f32 %v2844_v58 }
 0x21f   :  { %v1700_v34 = vsel %vm1348_vm7, %v1479_v38, 0.0  ;;  %v2086_v59 = vunpack.c.l.bf16 %v2129_v32  ;;  %vm1350_vm1 = vcmp.gt.f32.partialorder %v2844_v58, 0.0 }
 0x220   :  { %v1732_v56 = vmul.f32 %v1700_v34, %v2669_v48  ;;  %v1483_v30 = vmul.f32 0.5, %v1482_v6  ;;  %v911_v10 = vpop.f32.mrf.mxu3  ;;  %1328 = vadd.xlane.f32.xlu2 %v1269_v3 }
 0x221   :  { %v822_v14 = vpop.f32.mrf.mxu2 }
 0x222   :  { %v2223_v16 = vpop.eup %2222  ;;  %v1828_v18 = vadd.f32 %v2082_v63, %v1732_v56  ;;  %v1484_v20 = vsub.f32 1.5, %v1483_v30  ;;  %v912_v25 = vadd.f32 %v911_v10, %v822_v14  ;;  %v736_v57 = vpop.f32.mrf.mxu1 }
 0x223   :  { %v2225_v27 = vpop.eup %2224  ;;  %v2855_v28 = vpop.xlane.xlu2 %1300  ;;  %v1206_v2 = vmul.f32 %v2223_v16, %v732_v11 }
 0x224   :  { %1860 = vst [vmem:[#allocation3 + $0x50] sm:$0xff] %v1828_v18  ;;  %v1485_v29 = vmul.f32 %v2221_v39, %v1484_v20  ;;  %v1491_v48 = vmul.f32 %v2225_v27, %v2844_v58  ;;  %2226 = vrcp.f32 %v912_v25  ;;  %vm1497_vm13 = vweird.f32 %v2225_v27 }
 0x225   :  { %2228 = vrsqrt.f32 %v2855_v28  ;;  %v2861_v36 = vsel %vm1174_vm11, %v1206_v2, 0.0  ;;  %vm1498_vm15 = vmor %vm1496_vm14, %vm1497_vm13  ;;  %vm1175_vm0 = vcmp.gt.f32.partialorder %v912_v25, 0.0  ;;  %vm1506_vm3 = vweird.f32 %v2855_v28 }
 0x226   :  { %v1489_v31 = vsel %vm1488_vm10, %v2221_v39, %v1485_v29  ;;  %v1492_v24 = vmul.f32 %v2225_v27, %v1491_v48  ;;  %v1270_v50 = vmul.f32 %v2861_v36, %v2861_v36  ;;  %v647_v39 = vpop.f32.mrf.mxu0  ;;  %v2087_v25 = vunpack.c.h.bf16 %v2129_v32 }
 0x227   :  { %v1701_v5 = vsel %vm1349_vm12, %v1489_v31, 0.0  ;;  %v737_v30 = vadd.f32 %v736_v57, %v647_v39  ;;  %vm1351_vm6 = vcmp.gt.f32.partialorder %v2855_v28, 0.0 }
 0x228   :  { %v1733_v37 = vmul.f32 %v1701_v5, %v2675_v44  ;;  %v1493_v41 = vmul.f32 0.5, %v1492_v24  ;;  %v914_v51 = vpop.f32.mrf.mxu3  ;;  %1330 = vadd.xlane.f32.xlu2 %v1270_v50 }
 0x229   :  { %v825_v46 = vpop.f32.mrf.mxu2 }
 0x22a   :  { %v2227_v21 = vpop.eup %2226  ;;  %v1829_v49 = vadd.f32 %v2083_v8, %v1733_v37  ;;  %v1494_v61 = vsub.f32 1.5, %v1493_v41  ;;  %v915_v53 = vadd.f32 %v914_v51, %v825_v46  ;;  %v738_v2 = vpop.f32.mrf.mxu1 }
 0x22b   :  { %v2229_v54 = vpop.eup %2228  ;;  %v2869_v35 = vpop.xlane.xlu2 %1302  ;;  %v1207_v13 = vmul.f32 %v2227_v21, %v734_v47 }
 0x22c   :  { %1861 = vst [vmem:[#allocation3 + $0x58] sm:$0xff] %v1829_v49  ;;  %v1495_v44 = vmul.f32 %v2225_v27, %v1494_v61  ;;  %v1501_v45 = vmul.f32 %v2229_v54, %v2855_v28  ;;  %2230 = vrcp.f32 %v915_v53  ;;  %vm1507_vm2 = vweird.f32 %v2229_v54  ;;  %v2130_v28 = vld [vmem:[%s2950_s2 + $0x38] sm:$0xff]  }
 0x22d   :  { %2232 = vrsqrt.f32 %v2869_v35  ;;  %v2875_v63 = vsel %vm1175_vm0, %v1207_v13, 0.0  ;;  %vm1508_vm4 = vmor %vm1506_vm3, %vm1507_vm2  ;;  %vm1176_vm5 = vcmp.gt.f32.partialorder %v915_v53, 0.0  ;;  %vm1516_vm8 = vweird.f32 %v2869_v35 }
 0x22e   :  { %v1499_v4 = vsel %vm1498_vm15, %v2225_v27, %v1495_v44  ;;  %v1502_v42 = vmul.f32 %v2229_v54, %v1501_v45  ;;  %v1271_v6 = vmul.f32 %v2875_v63, %v2875_v63  ;;  %v649_v48 = vpop.f32.mrf.mxu0  ;;  %v2090_v61 = vunpack.c.l.bf16 %v2130_v28 }
 0x22f   :  { %v1702_v38 = vsel %vm1350_vm1, %v1499_v4, 0.0  ;;  %v739_v37 = vadd.f32 %v738_v2, %v649_v48  ;;  %vm1352_vm11 = vcmp.gt.f32.partialorder %v2869_v35, 0.0 }
 0x230   :  { %v1734_v34 = vmul.f32 %v1702_v38, %v2679_v9  ;;  %v1503_v3 = vmul.f32 0.5, %v1502_v42  ;;  %v916_v56 = vpop.f32.mrf.mxu3  ;;  %1332 = vadd.xlane.f32.xlu1 %v1271_v6 }
 0x231   :  { %v827_v10 = vpop.f32.mrf.mxu2 }
 0x232   :  { %v2231_v11 = vpop.eup %2230  ;;  %v1830_v14 = vadd.f32 %v2086_v59, %v1734_v34  ;;  %v1504_v16 = vsub.f32 1.5, %v1503_v3  ;;  %v917_v58 = vadd.f32 %v916_v56, %v827_v10  ;;  %v2091_v34 = vunpack.c.h.bf16 %v2130_v28 }
 0x233   :  { %v2233_v18 = vpop.eup %2232  ;;  %v2880_v20 = vpop.xlane.xlu0 %1304  ;;  %v1208_v62 = vmul.f32 %v2231_v11, %v737_v30 }
 0x234   :  { %1862 = vst [vmem:[#allocation3 + $0x60] sm:$0xff] %v1830_v14  ;;  %v1505_v23 = vmul.f32 %v2229_v54, %v1504_v16  ;;  %v1511_v9 = vmul.f32 %v2233_v18, %v2869_v35  ;;  %2234 = vrcp.f32 %v917_v58  ;;  %vm1517_vm7 = vweird.f32 %v2233_v18 }
 0x235   :  { %2236 = vrsqrt.f32 %v2880_v20  ;;  %v2886_v8 = vsel %vm1176_vm5, %v1208_v62, 0.0  ;;  %vm1177_vm9 = vcmp.gt.f32.partialorder %v917_v58, 0.0  ;;  %vm1518_vm10 = vmor %vm1516_vm8, %vm1517_vm7  ;;  %vm1526_vm13 = vweird.f32 %v2880_v20  ;;  %v2131_v58 = vld [vmem:[%s2950_s2 + $0x40] sm:$0xff]  }
 0x236   :  { %v1509_v27 = vsel %vm1508_vm4, %v2229_v54, %v1505_v23  ;;  %v1512_v29 = vmul.f32 %v2233_v18, %v1511_v9  ;;  %v1272_v24 = vmul.f32 %v2886_v8, %v2886_v8  ;;  %vm1353_vm15 = vcmp.gt.f32.partialorder %v2880_v20, 0.0 }
 0x237   :  { %v1703_v31 = vsel %vm1351_vm6, %v1509_v27, 0.0 }
 0x238   :  { %v1735_v5 = vmul.f32 %v1703_v31, %v2683_v19  ;;  %v1513_v50 = vmul.f32 0.5, %v1512_v29  ;;  %1334 = vadd.xlane.f32.xlu2 %v1272_v24 }
 0x23a   :  { %v2235_v41 = vpop.eup %2234  ;;  %v1831_v51 = vadd.f32 %v2087_v25, %v1735_v5  ;;  %v1514_v47 = vsub.f32 1.5, %v1513_v50 }
 0x23b   :  { %v2237_v46 = vpop.eup %2236  ;;  %v1209_v21 = vmul.f32 %v2235_v41, %v739_v37  ;;  %v1307_v32 = vpop.xlane.xlu1 %1306  ;;  %v2095_v37 = vunpack.c.h.bf16 %v2131_v58 }
 0x23c   :  { %1863 = vst [vmem:[#allocation3 + $0x68] sm:$0xff] %v1831_v51  ;;  %v1515_v49 = vmul.f32 %v2233_v18, %v1514_v47  ;;  %v1521_v19 = vmul.f32 %v2237_v46, %v2880_v20  ;;  %2238 = vrsqrt.f32 %v1307_v32  ;;  %vm1527_vm12 = vweird.f32 %v2237_v46 }
 0x23d   :  { %v2896_v53 = vsel %vm1177_vm9, %v1209_v21, 0.0  ;;  %vm1528_vm14 = vmor %vm1526_vm13, %vm1527_vm12  ;;  %vm1536_vm1 = vweird.f32 %v1307_v32  ;;  %v2094_v20 = vunpack.c.l.bf16 %v2131_v58  ;;  %vm1354_vm3 = vcmp.gt.f32.partialorder %v1307_v32, 0.0 }
 0x23e   :  { %v1519_v54 = vsel %vm1518_vm10, %v2233_v18, %v1515_v49  ;;  %v1522_v13 = vmul.f32 %v2237_v46, %v1521_v19  ;;  %v1273_v44 = vmul.f32 %v2896_v53, %v2896_v53  ;;  %v2132_v19 = vld [vmem:[%s2950_s2 + $0x48] sm:$0xff]  }
 0x23f   :  { %v1704_v57 = vsel %vm1352_vm11, %v1519_v54, 0.0 }
 0x240   :  { %v1736_v45 = vmul.f32 %v1704_v57, %v2687_v33  ;;  %v1523_v39 = vmul.f32 0.5, %v1522_v13  ;;  %1336 = vadd.xlane.f32.xlu1 %v1273_v44  ;;  %v2098_v13 = vunpack.c.l.bf16 %v2132_v19 }
 0x242   :  { %v1832_v59 = vadd.f32 %v2090_v61, %v1736_v45  ;;  %v1524_v4 = vsub.f32 1.5, %v1523_v39  ;;  %v2239_v42 = vpop.eup %2238 }
 0x243   :  { %v1531_v6 = vmul.f32 %v2239_v42, %v1307_v32  ;;  %v1309_v35 = vpop.xlane.xlu2 %1308  ;;  %vm1537_vm0 = vweird.f32 %v2239_v42 }
 0x244   :  { %1864 = vst [vmem:[#allocation3 + $0x70] sm:$0xff] %v1832_v59  ;;  %v1525_v38 = vmul.f32 %v2237_v46, %v1524_v4  ;;  %2240 = vrsqrt.f32 %v1309_v35  ;;  %vm1538_vm2 = vmor %vm1536_vm1, %vm1537_vm0  ;;  %vm1546_vm5 = vweird.f32 %v1309_v35  ;;  %vm1355_vm7 = vcmp.gt.f32.partialorder %v1309_v35, 0.0 }
 0x245   :  { %v1532_v56 = vmul.f32 %v2239_v42, %v1531_v6 }
 0x246   :  { %v1529_v3 = vsel %vm1528_vm14, %v2237_v46, %v1525_v38 }
 0x247   :  { %v1705_v33 = vsel %vm1353_vm15, %v1529_v3, 0.0  ;;  %v1533_v10 = vmul.f32 0.5, %v1532_v56 }
 0x248   :  { %v1737_v30 = vmul.f32 %v1705_v33, %v2691_v7 }
 0x249   :  { %v1534_v14 = vsub.f32 1.5, %v1533_v10 }
 0x24a   :  { %v1833_v11 = vadd.f32 %v2091_v34, %v1737_v30  ;;  %v2241_v16 = vpop.eup %2240  ;;  %v2099_v34 = vunpack.c.h.bf16 %v2132_v19 }
 0x24b   :  { %v1535_v18 = vmul.f32 %v2239_v42, %v1534_v14  ;;  %v1541_v62 = vmul.f32 %v2241_v16, %v1309_v35  ;;  %v1311_v23 = vpop.xlane.xlu2 %1310  ;;  %vm1547_vm4 = vweird.f32 %v2241_v16 }
 0x24c   :  { %1865 = vst [vmem:[#allocation3 + $0x78] sm:$0xff] %v1833_v11  ;;  %2242 = vrsqrt.f32 %v1311_v23  ;;  %vm1548_vm6 = vmor %vm1546_vm5, %vm1547_vm4  ;;  %vm1556_vm9 = vweird.f32 %v1311_v23  ;;  %vm1356_vm11 = vcmp.gt.f32.partialorder %v1311_v23, 0.0 }
 0x24d   :  { %v1539_v9 = vsel %vm1538_vm2, %v2239_v42, %v1535_v18  ;;  %v1542_v7 = vmul.f32 %v2241_v16, %v1541_v62 }
 0x24e   :  { %v1706_v25 = vsel %vm1354_vm3, %v1539_v9, 0.0 }
 0x24f   :  { %v1738_v27 = vmul.f32 %v1706_v25, %v2698_v60  ;;  %v1543_v2 = vmul.f32 0.5, %v1542_v7 }
 0x251   :  { %v1834_v29 = vadd.f32 %v2094_v20, %v1738_v27  ;;  %v1544_v48 = vsub.f32 1.5, %v1543_v2 }
 0x252   :  { %v2243_v31 = vpop.eup %2242 }
 0x253   :  { %1866 = vst [vmem:[#allocation3 + $0x80] sm:$0xff] %v1834_v29  ;;  %v1545_v24 = vmul.f32 %v2241_v16, %v1544_v48  ;;  %v1551_v5 = vmul.f32 %v2243_v31, %v1311_v23  ;;  %v1313_v50 = vpop.xlane.xlu2 %1312  ;;  %vm1557_vm8 = vweird.f32 %v2243_v31 }
 0x254   :  { %2244 = vrsqrt.f32 %v1313_v50  ;;  %vm1558_vm10 = vmor %vm1556_vm9, %vm1557_vm8  ;;  %vm1566_vm13 = vweird.f32 %v1313_v50  ;;  %vm1357_vm15 = vcmp.gt.f32.partialorder %v1313_v50, 0.0 }
 0x255   :  { %v1549_v41 = vsel %vm1548_vm6, %v2241_v16, %v1545_v24  ;;  %v1552_v51 = vmul.f32 %v2243_v31, %v1551_v5  ;;  %v2133_v16 = vld [vmem:[%s2950_s2 + $0x50] sm:$0xff]  }
 0x256   :  { %v1707_v28 = vsel %vm1355_vm7, %v1549_v41, 0.0  ;;  %v2102_v23 = vunpack.c.l.bf16 %v2133_v16  ;;  %v2103_v5 = vunpack.c.h.bf16 %v2133_v16 }
 0x257   :  { %v1739_v47 = vmul.f32 %v1707_v28, %v2709_v26  ;;  %v1553_v60 = vmul.f32 0.5, %v1552_v51 }
 0x259   :  { %v1835_v46 = vadd.f32 %v2095_v37, %v1739_v47  ;;  %v1554_v21 = vsub.f32 1.5, %v1553_v60 }
 0x25a   :  { %v2245_v49 = vpop.eup %2244 }
 0x25b   :  { %1867 = vst [vmem:[#allocation3 + $0x88] sm:$0xff] %v1835_v46  ;;  %v1555_v32 = vmul.f32 %v2243_v31, %v1554_v21  ;;  %v1561_v61 = vmul.f32 %v2245_v49, %v1313_v50  ;;  %v1315_v54 = vpop.xlane.xlu2 %1314  ;;  %vm1567_vm12 = vweird.f32 %v2245_v49  ;;  %v2134_v46 = vld [vmem:[%s2950_s2 + $0x58] sm:$0xff]  }
 0x25c   :  { %2246 = vrsqrt.f32 %v1315_v54  ;;  %vm1568_vm14 = vmor %vm1566_vm13, %vm1567_vm12  ;;  %vm1576_vm1 = vweird.f32 %v1315_v54  ;;  %vm1358_vm3 = vcmp.gt.f32.partialorder %v1315_v54, 0.0 }
 0x25d   :  { %v1559_v44 = vsel %vm1558_vm10, %v2243_v31, %v1555_v32  ;;  %v1562_v26 = vmul.f32 %v2245_v49, %v1561_v61  ;;  %v2106_v32 = vunpack.c.l.bf16 %v2134_v46 }
 0x25e   :  { %v1708_v57 = vsel %vm1356_vm11, %v1559_v44, 0.0 }
 0x25f   :  { %v1740_v45 = vmul.f32 %v1708_v57, %v2720_v55  ;;  %v1563_v39 = vmul.f32 0.5, %v1562_v26 }
 0x261   :  { %v1836_v59 = vadd.f32 %v2098_v13, %v1740_v45  ;;  %v1564_v4 = vsub.f32 1.5, %v1563_v39 }
 0x262   :  { %v2247_v42 = vpop.eup %2246 }
 0x263   :  { %1868 = vst [vmem:[#allocation3 + $0x90] sm:$0xff] %v1836_v59  ;;  %v1565_v38 = vmul.f32 %v2245_v49, %v1564_v4  ;;  %v1571_v6 = vmul.f32 %v2247_v42, %v1315_v54  ;;  %v1317_v35 = vpop.xlane.xlu2 %1316  ;;  %vm1577_vm0 = vweird.f32 %v2247_v42 }
 0x264   :  { %2248 = vrsqrt.f32 %v1317_v35  ;;  %vm1578_vm2 = vmor %vm1576_vm1, %vm1577_vm0  ;;  %vm1586_vm5 = vweird.f32 %v1317_v35  ;;  %vm1359_vm7 = vcmp.gt.f32.partialorder %v1317_v35, 0.0 }
 0x265   :  { %v1569_v3 = vsel %vm1568_vm14, %v2245_v49, %v1565_v38  ;;  %v1572_v56 = vmul.f32 %v2247_v42, %v1571_v6 }
 0x266   :  { %v1709_v33 = vsel %vm1357_vm15, %v1569_v3, 0.0 }
 0x267   :  { %v1741_v30 = vmul.f32 %v1709_v33, %v2737_v22  ;;  %v1573_v55 = vmul.f32 0.5, %v1572_v56 }
 0x269   :  { %v1837_v10 = vadd.f32 %v2099_v34, %v1741_v30  ;;  %v1574_v11 = vsub.f32 1.5, %v1573_v55  ;;  %v2135_v30 = vld [vmem:[%s2950_s2 + $0x60] sm:$0xff]  }
 0x26a   :  { %v2249_v14 = vpop.eup %2248 }
 0x26b   :  { %1869 = vst [vmem:[#allocation3 + $0x98] sm:$0xff] %v1837_v10  ;;  %v1575_v58 = vmul.f32 %v2247_v42, %v1574_v11  ;;  %v1581_v18 = vmul.f32 %v2249_v14, %v1317_v35  ;;  %v1319_v62 = vpop.xlane.xlu2 %1318  ;;  %vm1587_vm4 = vweird.f32 %v2249_v14 }
 0x26c   :  { %2250 = vrsqrt.f32 %v1319_v62  ;;  %vm1588_vm6 = vmor %vm1586_vm5, %vm1587_vm4  ;;  %vm1596_vm9 = vweird.f32 %v1319_v62  ;;  %vm1360_vm11 = vcmp.gt.f32.partialorder %v1319_v62, 0.0 }
 0x26d   :  { %v1579_v20 = vsel %vm1578_vm2, %v2247_v42, %v1575_v58  ;;  %v1582_v22 = vmul.f32 %v2249_v14, %v1581_v18  ;;  %v2107_v42 = vunpack.c.h.bf16 %v2134_v46 }
 0x26e   :  { %v1710_v9 = vsel %vm1358_vm3, %v1579_v20, 0.0 }
 0x26f   :  { %v1742_v7 = vmul.f32 %v1710_v9, %v2749_v52  ;;  %v1583_v25 = vmul.f32 0.5, %v1582_v22 }
 0x271   :  { %v1838_v27 = vadd.f32 %v2102_v23, %v1742_v7  ;;  %v1584_v2 = vsub.f32 1.5, %v1583_v25 }
 0x272   :  { %v2251_v29 = vpop.eup %2250 }
 0x273   :  { %1870 = vst [vmem:[#allocation3 + $0xa0] sm:$0xff] %v1838_v27  ;;  %v1585_v48 = vmul.f32 %v2249_v14, %v1584_v2  ;;  %v1591_v31 = vmul.f32 %v2251_v29, %v1319_v62  ;;  %v1321_v24 = vpop.xlane.xlu2 %1320  ;;  %vm1597_vm8 = vweird.f32 %v2251_v29  ;;  %v2111_v27 = vunpack.c.h.bf16 %v2135_v30 }
 0x274   :  { %2252 = vrsqrt.f32 %v1321_v24  ;;  %vm1598_vm10 = vmor %vm1596_vm9, %vm1597_vm8  ;;  %vm1606_vm13 = vweird.f32 %v1321_v24  ;;  %vm1361_vm15 = vcmp.gt.f32.partialorder %v1321_v24, 0.0 }
 0x275   :  { %v1589_v50 = vsel %vm1588_vm6, %v2249_v14, %v1585_v48  ;;  %v1592_v37 = vmul.f32 %v2251_v29, %v1591_v31  ;;  %v2110_v14 = vunpack.c.l.bf16 %v2135_v30 }
 0x276   :  { %v1711_v41 = vsel %vm1359_vm7, %v1589_v50, 0.0 }
 0x277   :  { %v1743_v51 = vmul.f32 %v1711_v41, %v2766_v17  ;;  %v1593_v52 = vmul.f32 0.5, %v1592_v37  ;;  %v2136_v37 = vld [vmem:[%s2950_s2 + $0x68] sm:$0xff]  }
 0x279   :  { %v1839_v28 = vadd.f32 %v2103_v5, %v1743_v51  ;;  %v1594_v47 = vsub.f32 1.5, %v1593_v52 }
 0x27a   :  { %v2253_v60 = vpop.eup %2252 }
 0x27b   :  { %1871 = vst [vmem:[#allocation3 + $0xa8] sm:$0xff] %v1839_v28  ;;  %v1595_v21 = vmul.f32 %v2251_v29, %v1594_v47  ;;  %v1601_v49 = vmul.f32 %v2253_v60, %v1321_v24  ;;  %v1323_v19 = vpop.xlane.xlu2 %1322  ;;  %vm1607_vm12 = vweird.f32 %v2253_v60  ;;  %v2114_v28 = vunpack.c.l.bf16 %v2136_v37 }
 0x27c   :  { %2254 = vrsqrt.f32 %v1323_v19  ;;  %vm1608_vm14 = vmor %vm1606_vm13, %vm1607_vm12  ;;  %vm1616_vm1 = vweird.f32 %v1323_v19  ;;  %vm1362_vm3 = vcmp.gt.f32.partialorder %v1323_v19, 0.0 }
 0x27d   :  { %v1599_v61 = vsel %vm1598_vm10, %v2251_v29, %v1595_v21  ;;  %v1602_v17 = vmul.f32 %v2253_v60, %v1601_v49 }
 0x27e   :  { %v1712_v54 = vsel %vm1360_vm11, %v1599_v61, 0.0 }
 0x27f   :  { %v1744_v13 = vmul.f32 %v1712_v54, %v2778_v43  ;;  %v1603_v44 = vmul.f32 0.5, %v1602_v17 }
 0x281   :  { %v1840_v26 = vadd.f32 %v2106_v32, %v1744_v13  ;;  %v1604_v57 = vsub.f32 1.5, %v1603_v44  ;;  %v2115_v13 = vunpack.c.h.bf16 %v2136_v37 }
 0x282   :  { %v2255_v45 = vpop.eup %2254 }
 0x283   :  { %1872 = vst [vmem:[#allocation3 + $0xb0] sm:$0xff] %v1840_v26  ;;  %v1605_v39 = vmul.f32 %v2253_v60, %v1604_v57  ;;  %v1611_v59 = vmul.f32 %v2255_v45, %v1323_v19  ;;  %v1325_v4 = vpop.xlane.xlu2 %1324  ;;  %vm1617_vm0 = vweird.f32 %v2255_v45 }
 0x284   :  { %2256 = vrsqrt.f32 %v1325_v4  ;;  %vm1618_vm2 = vmor %vm1616_vm1, %vm1617_vm0  ;;  %vm1626_vm5 = vweird.f32 %v1325_v4  ;;  %vm1363_vm7 = vcmp.gt.f32.partialorder %v1325_v4, 0.0 }
 0x285   :  { %v1609_v38 = vsel %vm1608_vm14, %v2253_v60, %v1605_v39  ;;  %v1612_v6 = vmul.f32 %v2255_v45, %v1611_v59 }
 0x286   :  { %v1713_v35 = vsel %vm1361_vm15, %v1609_v38, 0.0 }
 0x287   :  { %v1745_v34 = vmul.f32 %v1713_v35, %v2795_v15  ;;  %v1613_v43 = vmul.f32 0.5, %v1612_v6 }
 0x289   :  { %v1841_v3 = vadd.f32 %v2107_v42, %v1745_v34  ;;  %v1614_v56 = vsub.f32 1.5, %v1613_v43  ;;  %v2137_v42 = vld [vmem:[%s2950_s2 + $0x70] sm:$0xff]  }
 0x28a   :  { %v2257_v33 = vpop.eup %2256  ;;  %v2118_v34 = vunpack.c.l.bf16 %v2137_v42 }
 0x28b   :  { %1873 = vst [vmem:[#allocation3 + $0xb8] sm:$0xff] %v1841_v3  ;;  %v1615_v55 = vmul.f32 %v2255_v45, %v1614_v56  ;;  %v1621_v10 = vmul.f32 %v2257_v33, %v1325_v4  ;;  %v1327_v11 = vpop.xlane.xlu2 %1326  ;;  %vm1627_vm4 = vweird.f32 %v2257_v33 }
 0x28c   :  { %2258 = vrsqrt.f32 %v1327_v11  ;;  %vm1628_vm6 = vmor %vm1626_vm5, %vm1627_vm4  ;;  %vm1636_vm9 = vweird.f32 %v1327_v11  ;;  %vm1364_vm11 = vcmp.gt.f32.partialorder %v1327_v11, 0.0 }
 0x28d   :  { %v1619_v16 = vsel %vm1618_vm2, %v2255_v45, %v1615_v55  ;;  %v1622_v15 = vmul.f32 %v2257_v33, %v1621_v10 }
 0x28e   :  { %v1714_v58 = vsel %vm1362_vm3, %v1619_v16, 0.0 }
 0x28f   :  { %v1746_v18 = vmul.f32 %v1714_v58, %v2807_v40  ;;  %v1623_v62 = vmul.f32 0.5, %v1622_v15  ;;  %v2119_v15 = vunpack.c.h.bf16 %v2137_v42 }
 0x291   :  { %v1842_v23 = vadd.f32 %v2110_v14, %v1746_v18  ;;  %v1624_v20 = vsub.f32 1.5, %v1623_v62 }
 0x292   :  { %v2259_v22 = vpop.eup %2258 }
 0x293   :  { %1874 = vst [vmem:[#allocation3 + $0xc0] sm:$0xff] %v1842_v23  ;;  %v1625_v9 = vmul.f32 %v2257_v33, %v1624_v20  ;;  %v1631_v7 = vmul.f32 %v2259_v22, %v1327_v11  ;;  %v1329_v25 = vpop.xlane.xlu2 %1328  ;;  %vm1637_vm8 = vweird.f32 %v2259_v22 }
 0x294   :  { %2260 = vrsqrt.f32 %v1329_v25  ;;  %vm1638_vm10 = vmor %vm1636_vm9, %vm1637_vm8  ;;  %vm1646_vm13 = vweird.f32 %v1329_v25  ;;  %vm1365_vm15 = vcmp.gt.f32.partialorder %v1329_v25, 0.0 }
 0x295   :  { %v1629_v2 = vsel %vm1628_vm6, %v2257_v33, %v1625_v9  ;;  %v1632_v29 = vmul.f32 %v2259_v22, %v1631_v7  ;;  %v2138_v7 = vld [vmem:[%s2950_s2 + $0x78] sm:$0xff]   ;;  %s2296_s2 = smov [#allocation3]  }
 0x296   :  { %v1715_v48 = vsel %vm1363_vm7, %v1629_v2, 0.0  ;;  %v2122_v2 = vunpack.c.l.bf16 %v2138_v7  ;;  %v2123_v37 = vunpack.c.h.bf16 %v2138_v7  ;;  %s1886_s7 = sshll.u32 %s2296_s2, 4  ;;  %s1887_s7 = int_to_ptr.vmem [resolvable:$true] %s1886_s7 }
 0x297   :  { %v1747_v31 = vmul.f32 %v1715_v48, %v2824_v12  ;;  %v1633_v40 = vmul.f32 0.5, %v1632_v29 }
 0x299   :  { %v1843_v24 = vadd.f32 %v2111_v27, %v1747_v31  ;;  %v1634_v5 = vsub.f32 1.5, %v1633_v40 }
 0x29a   :  { %v2261_v50 = vpop.eup %2260 }
 0x29b   :  { %1875 = vst [vmem:[#allocation3 + $0xc8] sm:$0xff] %v1843_v24  ;;  %v1635_v41 = vmul.f32 %v2259_v22, %v1634_v5  ;;  %v1641_v51 = vmul.f32 %v2261_v50, %v1329_v25  ;;  %v1331_v52 = vpop.xlane.xlu2 %1330  ;;  %vm1647_vm12 = vweird.f32 %v2261_v50 }
 0x29c   :  { %2262 = vrsqrt.f32 %v1331_v52  ;;  %vm1648_vm14 = vmor %vm1646_vm13, %vm1647_vm12  ;;  %vm1656_vm1 = vweird.f32 %v1331_v52  ;;  %vm1366_vm3 = vcmp.gt.f32.partialorder %v1331_v52, 0.0 }
 0x29d   :  { %v1639_v47 = vsel %vm1638_vm10, %v2259_v22, %v1635_v41  ;;  %v1642_v12 = vmul.f32 %v2261_v50, %v1641_v51 }
 0x29e   :  { %v1716_v60 = vsel %vm1364_vm11, %v1639_v47, 0.0 }
 0x29f   :  { %v1748_v46 = vmul.f32 %v1716_v60, %v2836_v0  ;;  %v1643_v21 = vmul.f32 0.5, %v1642_v12 }
 0x2a1   :  { %v1844_v49 = vadd.f32 %v2114_v28, %v1748_v46  ;;  %v1644_v19 = vsub.f32 1.5, %v1643_v21 }
 0x2a2   :  { %v2263_v32 = vpop.eup %2262 }
 0x2a3   :  { %1876 = vst [vmem:[#allocation3 + $0xd0] sm:$0xff] %v1844_v49  ;;  %v1645_v61 = vmul.f32 %v2261_v50, %v1644_v19  ;;  %v1651_v17 = vmul.f32 %v2263_v32, %v1331_v52  ;;  %v1333_v54 = vpop.xlane.xlu1 %1332  ;;  %vm1657_vm0 = vweird.f32 %v2263_v32 }
 0x2a4   :  { %2264 = vrsqrt.f32 %v1333_v54  ;;  %vm1658_vm2 = vmor %vm1656_vm1, %vm1657_vm0  ;;  %vm1666_vm5 = vweird.f32 %v1333_v54  ;;  %vm1367_vm7 = vcmp.gt.f32.partialorder %v1333_v54, 0.0 }
 0x2a5   :  { %v1649_v44 = vsel %vm1648_vm14, %v2261_v50, %v1645_v61  ;;  %v1652_v26 = vmul.f32 %v2263_v32, %v1651_v17 }
 0x2a6   :  { %v1717_v57 = vsel %vm1365_vm15, %v1649_v44, 0.0 }
 0x2a7   :  { %v1749_v45 = vmul.f32 %v1717_v57, %v2850_v1  ;;  %v1653_v0 = vmul.f32 0.5, %v1652_v26 }
 0x2a9   :  { %v1845_v39 = vadd.f32 %v2115_v13, %v1749_v45  ;;  %v1654_v59 = vsub.f32 1.5, %v1653_v0 }
 0x2aa   :  { %v2265_v4 = vpop.eup %2264 }
 0x2ab   :  { %1877 = vst [vmem:[#allocation3 + $0xd8] sm:$0xff] %v1845_v39  ;;  %v1655_v38 = vmul.f32 %v2263_v32, %v1654_v59  ;;  %v1661_v6 = vmul.f32 %v2265_v4, %v1333_v54  ;;  %v1335_v35 = vpop.xlane.xlu2 %1334  ;;  %vm1667_vm4 = vweird.f32 %v2265_v4 }
 0x2ac   :  { %2266 = vrsqrt.f32 %v1335_v35  ;;  %vm1668_vm6 = vmor %vm1666_vm5, %vm1667_vm4  ;;  %vm1676_vm9 = vweird.f32 %v1335_v35  ;;  %vm1368_vm11 = vcmp.gt.f32.partialorder %v1335_v35, 0.0 }
 0x2ad   :  { %v1659_v43 = vsel %vm1658_vm2, %v2263_v32, %v1655_v38  ;;  %v1662_v1 = vmul.f32 %v2265_v4, %v1661_v6 }
 0x2ae   :  { %v1718_v3 = vsel %vm1366_vm3, %v1659_v43, 0.0 }
 0x2af   :  { %v1750_v56 = vmul.f32 %v1718_v3, %v2861_v36  ;;  %v1663_v33 = vmul.f32 0.5, %v1662_v1 }
 0x2b1   :  { %v1846_v30 = vadd.f32 %v2118_v34, %v1750_v56  ;;  %v1664_v55 = vsub.f32 1.5, %v1663_v33 }
 0x2b2   :  { %v2267_v10 = vpop.eup %2266 }
 0x2b3   :  { %v1337_v11 = vpop.xlane.xlu1 %1336  ;;  %1878 = vst [vmem:[#allocation3 + $0xe0] sm:$0xff] %v1846_v30  ;;  %v1665_v14 = vmul.f32 %v2265_v4, %v1664_v55  ;;  %v1671_v16 = vmul.f32 %v2267_v10, %v1335_v35  ;;  %vm1677_vm8 = vweird.f32 %v2267_v10 }
 0x2b4   :  { %2268 = vrsqrt.f32 %v1337_v11  ;;  %vm1678_vm10 = vmor %vm1676_vm9, %vm1677_vm8  ;;  %vm1686_vm13 = vweird.f32 %v1337_v11  ;;  %vm1369_vm15 = vcmp.gt.f32.partialorder %v1337_v11, 0.0 }
 0x2b5   :  { %v1669_v58 = vsel %vm1668_vm6, %v2265_v4, %v1665_v14  ;;  %v1672_v18 = vmul.f32 %v2267_v10, %v1671_v16 }
 0x2b6   :  { %v1719_v62 = vsel %vm1367_vm7, %v1669_v58, 0.0 }
 0x2b7   :  { %v1751_v23 = vmul.f32 %v1719_v62, %v2875_v63  ;;  %v1673_v36 = vmul.f32 0.5, %v1672_v18 }
 0x2b9   :  { %v1847_v20 = vadd.f32 %v2119_v15, %v1751_v23  ;;  %v1674_v22 = vsub.f32 1.5, %v1673_v36 }
 0x2ba   :  { %v2269_v9 = vpop.eup %2268 }
 0x2bb   :  { %1879 = vst [vmem:[#allocation3 + $0xe8] sm:$0xff] %v1847_v20  ;;  %v1675_v25 = vmul.f32 %v2267_v10, %v1674_v22  ;;  %v1681_v27 = vmul.f32 %v2269_v9, %v1337_v11  ;;  %vm1687_vm12 = vweird.f32 %v2269_v9 }
 0x2bc   :  { %vm1688_vm14 = vmor %vm1686_vm13, %vm1687_vm12 }
 0x2bd   :  { %v1679_v29 = vsel %vm1678_vm10, %v2267_v10, %v1675_v25  ;;  %v1682_v48 = vmul.f32 %v2269_v9, %v1681_v27 }
 0x2be   :  { %v1720_v31 = vsel %vm1368_vm11, %v1679_v29, 0.0 }
 0x2bf   :  { %v1752_v63 = vmul.f32 %v1720_v31, %v2886_v8  ;;  %v1683_v40 = vmul.f32 0.5, %v1682_v48 }
 0x2c1   :  { %v1848_v24 = vadd.f32 %v2122_v2, %v1752_v63  ;;  %v1684_v5 = vsub.f32 1.5, %v1683_v40 }
 0x2c3   :  { %1880 = vst [vmem:[#allocation3 + $0xf0] sm:$0xff] %v1848_v24  ;;  %v1685_v50 = vmul.f32 %v2269_v9, %v1684_v5 }
 0x2c5   :  { %v1689_v41 = vsel %vm1688_vm14, %v2269_v9, %v1685_v50 }
 0x2c6   :  { %v1721_v51 = vsel %vm1369_vm15, %v1689_v41, 0.0 }
 0x2c7   :  { %v1753_v8 = vmul.f32 %v1721_v51, %v2896_v53 }
 0x2c9   :  { %v1849_v52 = vadd.f32 %v2123_v37, %v1753_v8 }
 0x2cb   :  { %1881 = vst [vmem:[#allocation3 + $0xf8] sm:$0xff] %v1849_v52 }
 0x2cc   :  { %1894 = dma.vmem_to_hbm [thread:$0]  %s1887_s7, 4096, %s1889_s10, [#allocation4], %s2297_s11, %s2297_s11, %s2298_s12  }
 0x2cd   :  { %2294 = dma.done.wait [#allocation4], 4096  }
 0x2ce   :  { %2295 = vsyncadd [#allocation4], 4294963200 }
 0x2cf   :  { %1899 = vsyncpa [#allocation4], 1 }

</bundles_post_ra>
